<compile_context>
chip_gen: v7x
topology: tpu7x:2x2x1
jax: 0.10.0
libtpu: 0.0.40
codegen_flags: <defaults>
</compile_context>

<pallas_src>
import functools

import jax
import jax.numpy as jnp
from jax.experimental import pallas as pl
from jax.experimental.pallas import tpu as pltpu


# ----------------------------- Pallas kernels ------------------------------

def _conv_block_kernel(p_ref, w_ref, b_ref, g_ref, be_ref, o_ref,
                       *, groups, eps, inv_count):
    """Fused Conv2d(3x3, pad=1) + BatchNorm2d(train stats) + ReLU (+ MaxPool2d(2)).

    p_ref : (G, Mo, K) bf16  im2col patches; G = 4 pool positions (or 1), K = 9*Cin
    w_ref : (K, C)     bf16  conv weight, rows ordered (kh, kw, cin)
    b_ref, g_ref, be_ref : (1, C) f32  conv bias / BN gamma / BN beta
    o_ref : (Mo, C)    f32   pooled (or plain) activations, rows ordered (n, ho, wo)
    """
    w = w_ref[...]
    bias = b_ref[...]

    # 3x3 conv as one MXU matmul per pool position; f32 accumulation.
    acc = [jnp.dot(p_ref[j], w, preferred_element_type=jnp.float32) + bias
           for j in range(groups)]

    # BatchNorm2d training-mode batch statistics over all N*H*W positions.
    total = acc[0]
    for j in range(1, groups):
        total = total + acc[j]
    mean = jnp.sum(total, axis=0, keepdims=True) * inv_count            # (1, C)

    cent = [a - mean for a in acc]
    ssq = cent[0] * cent[0]
    for j in range(1, groups):
        ssq = ssq + cent[j] * cent[j]
    var = jnp.sum(ssq, axis=0, keepdims=True) * inv_count               # biased (torch train)

    scale = g_ref[...] * jax.lax.rsqrt(var + eps)
    shift = be_ref[...]

    # Affine + ReLU, then 2x2 max-pool = max over the 4 window positions.
    y = jnp.maximum(cent[0] * scale + shift, 0.0)
    for j in range(1, groups):
        y = jnp.maximum(y, jnp.maximum(cent[j] * scale + shift, 0.0))
    o_ref[...] = y.astype(o_ref.dtype)


def conv_block(patches, w_col, b, gamma, beta, *, count):
    """patches: (G, Mo, K) bf16 -> fused conv/BN/ReLU/pool output (Mo, C) f32."""
    G, Mo, K = patches.shape
    C = w_col.shape[1]
    kernel = functools.partial(_conv_block_kernel, groups=G, eps=1e-5,
                               inv_count=1.0 / float(count))
    return pl.pallas_call(
        kernel,
        out_shape=jax.ShapeDtypeStruct((Mo, C), jnp.float32),
        grid=(1,),
        in_specs=[
            pl.BlockSpec((G, Mo, K), lambda i: (0, 0, 0)),
            pl.BlockSpec((K, C), lambda i: (0, 0)),
            pl.BlockSpec((1, C), lambda i: (0, 0)),
            pl.BlockSpec((1, C), lambda i: (0, 0)),
            pl.BlockSpec((1, C), lambda i: (0, 0)),
        ],
        out_specs=pl.BlockSpec((Mo, C), lambda i: (0, 0)),
        compiler_params=pltpu.CompilerParams(dimension_semantics=("arbitrary",)),
    )(patches,
      w_col.astype(jnp.bfloat16),
      b.reshape(1, C).astype(jnp.float32),
      gamma.reshape(1, C).astype(jnp.float32),
      beta.reshape(1, C).astype(jnp.float32))


def _dense_stack_kernel(*refs, n_layers):
    """Whole dense decoder in one kernel: (Linear + ReLU) * n_dense + Linear."""
    x_ref = refs[0]
    o_ref = refs[-1]
    wb = refs[1:-1]                      # (w0, b0, w1, b1, ..., w_{L-1}, b_{L-1})
    h = x_ref[...]                       # bf16 (B, Din)
    for i in range(n_layers):
        w = wb[2 * i][...]               # bf16 (Din_i, Dout_i)
        bias = wb[2 * i + 1][...]        # f32  (1, Dout_i)
        h = jnp.dot(h, w, preferred_element_type=jnp.float32) + bias
        if i < n_layers - 1:
            h = jnp.maximum(h, 0.0).astype(jnp.bfloat16)
    o_ref[...] = h.astype(o_ref.dtype)


def dense_stack(x, layers):
    """x: (B, Din) float -> logits (B, Dout) f32, all layers fused in one call."""
    B, Din = x.shape
    n_layers = len(layers)
    Dout = layers[-1]["w"].shape[1]

    operands = [x.astype(jnp.bfloat16)]
    in_specs = [pl.BlockSpec((B, Din), lambda i: (0, 0))]
    for lyr in layers:
        w = lyr["w"].astype(jnp.bfloat16)
        bias = lyr["b"].reshape(1, -1).astype(jnp.float32)
        kin, kout = w.shape
        operands += [w, bias]
        in_specs += [pl.BlockSpec((kin, kout), lambda i: (0, 0)),
                     pl.BlockSpec((1, kout), lambda i: (0, 0))]

    kernel = functools.partial(_dense_stack_kernel, n_layers=n_layers)
    return pl.pallas_call(
        kernel,
        out_shape=jax.ShapeDtypeStruct((B, Dout), jnp.float32),
        grid=(1,),
        in_specs=in_specs,
        out_specs=pl.BlockSpec((B, Dout), lambda i: (0, 0)),
        compiler_params=pltpu.CompilerParams(dimension_semantics=("arbitrary",)),
    )(*operands)


# ------------------------------- glue / model ------------------------------

def _im2col_pool_groups(x_nhwc, *, pool):
    """Build bf16 im2col patches grouped by 2x2 pool position.

    Returns (G, Mo, 9*Cin) with rows ordered (n, ho, wo); G = 4 if pool else 1.
    Inner K-ordering is (kh, kw, cin), matching the conv weight layout.
    """
    N, H, W, Cin = x_nhwc.shape
    xp = jnp.pad(x_nhwc, ((0, 0), (1, 1), (1, 1), (0, 0)))
    cols = jnp.concatenate(
        [xp[:, kh:kh + H, kw:kw + W, :] for kh in range(3) for kw in range(3)],
        axis=-1)                                          # (N, H, W, 9*Cin)
    K = 9 * Cin
    if pool:
        Ho, Wo = H // 2, W // 2
        g = cols.reshape(N, Ho, 2, Wo, 2, K)              # (N, Ho, dh, Wo, dw, K)
        g = jnp.transpose(g, (2, 4, 0, 1, 3, 5))          # (dh, dw, N, Ho, Wo, K)
        g = g.reshape(4, N * Ho * Wo, K)
    else:
        g = cols.reshape(1, N * H * W, K)
    return g.astype(jnp.bfloat16)


def conv3x3_block(x_nhwc, p, *, pool):
    """Conv2d(k=3, pad=1) + BatchNorm2d + ReLU (+ MaxPool2d(2)) — one pallas_call."""
    N, H, W, _ = x_nhwc.shape
    Cout = p["w"].shape[1]
    patches = _im2col_pool_groups(x_nhwc, pool=pool)
    out = conv_block(patches, p["w"], p["b"], p["gamma"], p["beta"], count=N * H * W)
    if pool:
        return out.reshape(N, H // 2, W // 2, Cout)
    return out.reshape(N, H, W, Cout)


def init_params(key, cfg):
    in_c = cfg["in_channels"]
    hid_c = cfg["hidden_channels"]
    n_conv = cfg["n_conv"]
    params = {"conv": [], "dense": []}

    cins = [in_c] + [hid_c] * (n_conv - 1)
    for j, cin in enumerate(cins):
        key, kw = jax.random.split(key)
        bound = (6.0 / (cin * 9)) ** 0.5
        w_torch = jax.random.uniform(kw, (hid_c, cin, 3, 3), jnp.float32, -bound, bound)
        # (Cout, Cin, kh, kw) -> (kh, kw, Cin, Cout) -> (9*Cin, Cout)
        w_col = jnp.transpose(w_torch, (2, 3, 1, 0)).reshape(9 * cin, hid_c)
        params["conv"].append(dict(
            w=w_col,
            b=jnp.zeros((hid_c,), jnp.float32),
            gamma=jnp.ones((hid_c,), jnp.float32),
            beta=jnp.zeros((hid_c,), jnp.float32),
            # torch: first block pools; block j (= i+1) pools iff i < 3.
            pool=True if j == 0 else (j - 1 < 3),
        ))

    feat_hw = 5
    in_dim = hid_c * feat_hw * feat_hw
    shapes = [in_dim] + [cfg["hidden_dim"]] * cfg["n_dense"] + [cfg["num_way"]]
    for i in range(len(shapes) - 1):
        key, kw = jax.random.split(key)
        bound = (6.0 / shapes[i]) ** 0.5
        w_torch = jax.random.uniform(kw, (shapes[i + 1], shapes[i]), jnp.float32, -bound, bound)
        w_jax = jnp.transpose(w_torch)                    # (in, out), torch (c,h,w) row order
        if i == 0:
            # Fold torch's NCHW flatten into the first dense weight so the
            # runtime flatten stays in the kernel-native NHWC (h, w, c) order.
            w_jax = w_jax.reshape(hid_c, feat_hw, feat_hw, shapes[i + 1])
            w_jax = jnp.transpose(w_jax, (1, 2, 0, 3)).reshape(in_dim, shapes[i + 1])
        params["dense"].append(dict(w=w_jax, b=jnp.zeros((shapes[i + 1],), jnp.float32)))
    return params


def convnet_forward(params, x_nchw):
    # PyTorch input is NCHW; use NHWC (channels on the lane dim) on TPU.
    x = jnp.transpose(x_nchw, (0, 2, 3, 1)).astype(jnp.float32)
    for p in params["conv"]:
        x = conv3x3_block(x, p, pool=p["pool"])
    # Flatten in (h, w, c) order; the NCHW ordering is folded into dense w0.
    feats = x.reshape(x.shape[0], -1)
    return dense_stack(feats, params["dense"])


if __name__ == "__main__":
    cfg = dict(in_channels=3, hidden_channels=8, n_conv=2,
               hidden_dim=32, n_dense=2, num_way=5)
    key = jax.random.PRNGKey(0)
    kp, kx = jax.random.split(key)
    params = init_params(kp, cfg)
    # 20x20 input -> two 2x2 maxpools -> 5x5 features, as the decoder expects.
    x = jax.random.normal(kx, (2, cfg["in_channels"], 20, 20), jnp.float32)
    fwd = jax.jit(functools.partial(convnet_forward, params))
    out = jax.block_until_ready(fwd(x))
    assert out.shape == (2, cfg["num_way"])
    assert bool(jnp.all(jnp.isfinite(out)))
    print("KERNEL_OK")
</pallas_src>

<mosaic_0001>
module attributes {stable_mosaic.version = 11 : i64} {
  func.func @_conv_block_kernel(%arg0: i32, %arg1: memref<4x200x27xbf16, #tpu.memory_space<vmem>>, %arg2: memref<27x8xbf16, #tpu.memory_space<vmem>>, %arg3: memref<1x8xf32, #tpu.memory_space<vmem>>, %arg4: memref<1x8xf32, #tpu.memory_space<vmem>>, %arg5: memref<1x8xf32, #tpu.memory_space<vmem>>, %arg6: memref<200x8xf32, #tpu.memory_space<vmem>>) attributes {dimension_semantics = [#tpu.dimension_semantics<arbitrary>], iteration_bounds = array<i64: 1>, scalar_prefetch = 0 : i64, scratch_operands = 0 : i64, tpu.core_type = #tpu.core_type<tc>, window_params = [{pipeline_mode = #tpu.pipeline_mode<synchronous>, transform_indices = @transform_0, window_bounds = array<i64: 4, 200, 27>}, {pipeline_mode = #tpu.pipeline_mode<synchronous>, transform_indices = @transform_1, window_bounds = array<i64: 27, 8>}, {pipeline_mode = #tpu.pipeline_mode<synchronous>, transform_indices = @transform_2, window_bounds = array<i64: 1, 8>}, {pipeline_mode = #tpu.pipeline_mode<synchronous>, transform_indices = @transform_3, window_bounds = array<i64: 1, 8>}, {pipeline_mode = #tpu.pipeline_mode<synchronous>, transform_indices = @transform_4, window_bounds = array<i64: 1, 8>}, {pipeline_mode = #tpu.pipeline_mode<synchronous>, transform_indices = @transform_5, window_bounds = array<i64: 200, 8>}]} {
    %c0 = arith.constant 0 : index
    %c0_0 = arith.constant 0 : index
    %0 = vector.load %arg2[%c0, %c0_0] : memref<27x8xbf16, #tpu.memory_space<vmem>>, vector<27x8xbf16>
    %c0_1 = arith.constant 0 : index
    %c0_2 = arith.constant 0 : index
    %1 = vector.load %arg3[%c0_1, %c0_2] : memref<1x8xf32, #tpu.memory_space<vmem>>, vector<1x8xf32>
    %c0_3 = arith.constant 0 : index
    %c0_4 = arith.constant 0 : index
    %c0_5 = arith.constant 0 : index
    %2 = vector.load %arg1[%c0_3, %c0_4, %c0_5] : memref<4x200x27xbf16, #tpu.memory_space<vmem>>, vector<1x200x27xbf16>
    %3 = vector.shape_cast %2 : vector<1x200x27xbf16> to vector<200x27xbf16>
    %cst = arith.constant dense<0.000000e+00> : vector<200x8xf32>
    %4 = tpu.matmul %3, %0, %cst {dimension_numbers = #tpu.dot_dimension_numbers<[1], [0], [0], [1], [0, 0, 1, 1], [], []>} : vector<200x27xbf16>, vector<27x8xbf16>, vector<200x8xf32> -> vector<200x8xf32>
    %5 = vector.broadcast %1 : vector<1x8xf32> to vector<200x8xf32>
    %6 = arith.addf %4, %5 : vector<200x8xf32>
    %c1 = arith.constant 1 : index
    %c0_6 = arith.constant 0 : index
    %c0_7 = arith.constant 0 : index
    %7 = vector.load %arg1[%c1, %c0_6, %c0_7] : memref<4x200x27xbf16, #tpu.memory_space<vmem>>, vector<1x200x27xbf16>
    %8 = vector.shape_cast %7 : vector<1x200x27xbf16> to vector<200x27xbf16>
    %cst_8 = arith.constant dense<0.000000e+00> : vector<200x8xf32>
    %9 = tpu.matmul %8, %0, %cst_8 {dimension_numbers = #tpu.dot_dimension_numbers<[1], [0], [0], [1], [0, 0, 1, 1], [], []>} : vector<200x27xbf16>, vector<27x8xbf16>, vector<200x8xf32> -> vector<200x8xf32>
    %10 = vector.broadcast %1 : vector<1x8xf32> to vector<200x8xf32>
    %11 = arith.addf %9, %10 : vector<200x8xf32>
    %c2 = arith.constant 2 : index
    %c0_9 = arith.constant 0 : index
    %c0_10 = arith.constant 0 : index
    %12 = vector.load %arg1[%c2, %c0_9, %c0_10] : memref<4x200x27xbf16, #tpu.memory_space<vmem>>, vector<1x200x27xbf16>
    %13 = vector.shape_cast %12 : vector<1x200x27xbf16> to vector<200x27xbf16>
    %cst_11 = arith.constant dense<0.000000e+00> : vector<200x8xf32>
    %14 = tpu.matmul %13, %0, %cst_11 {dimension_numbers = #tpu.dot_dimension_numbers<[1], [0], [0], [1], [0, 0, 1, 1], [], []>} : vector<200x27xbf16>, vector<27x8xbf16>, vector<200x8xf32> -> vector<200x8xf32>
    %15 = vector.broadcast %1 : vector<1x8xf32> to vector<200x8xf32>
    %16 = arith.addf %14, %15 : vector<200x8xf32>
    %c3 = arith.constant 3 : index
    %c0_12 = arith.constant 0 : index
    %c0_13 = arith.constant 0 : index
    %17 = vector.load %arg1[%c3, %c0_12, %c0_13] : memref<4x200x27xbf16, #tpu.memory_space<vmem>>, vector<1x200x27xbf16>
    %18 = vector.shape_cast %17 : vector<1x200x27xbf16> to vector<200x27xbf16>
    %cst_14 = arith.constant dense<0.000000e+00> : vector<200x8xf32>
    %19 = tpu.matmul %18, %0, %cst_14 {dimension_numbers = #tpu.dot_dimension_numbers<[1], [0], [0], [1], [0, 0, 1, 1], [], []>} : vector<200x27xbf16>, vector<27x8xbf16>, vector<200x8xf32> -> vector<200x8xf32>
    %20 = vector.broadcast %1 : vector<1x8xf32> to vector<200x8xf32>
    %21 = arith.addf %19, %20 : vector<200x8xf32>
    %22 = arith.addf %6, %11 : vector<200x8xf32>
    %23 = arith.addf %22, %16 : vector<200x8xf32>
    %24 = arith.addf %23, %21 : vector<200x8xf32>
    %cst_15 = arith.constant dense<0.000000e+00> : vector<8xf32>
    %25 = vector.multi_reduction <add>, %24, %cst_15 [0] : vector<200x8xf32> to vector<8xf32>
    %26 = vector.shape_cast %25 : vector<8xf32> to vector<1x8xf32>
    %cst_16 = arith.constant 1.250000e-03 : f32
    %27 = vector.broadcast %cst_16 : f32 to vector<1x8xf32>
    %28 = arith.mulf %26, %27 : vector<1x8xf32>
    %29 = vector.broadcast %28 : vector<1x8xf32> to vector<200x8xf32>
    %30 = arith.subf %6, %29 : vector<200x8xf32>
    %31 = vector.broadcast %28 : vector<1x8xf32> to vector<200x8xf32>
    %32 = arith.subf %11, %31 : vector<200x8xf32>
    %33 = vector.broadcast %28 : vector<1x8xf32> to vector<200x8xf32>
    %34 = arith.subf %16, %33 : vector<200x8xf32>
    %35 = vector.broadcast %28 : vector<1x8xf32> to vector<200x8xf32>
    %36 = arith.subf %21, %35 : vector<200x8xf32>
    %37 = arith.mulf %30, %30 : vector<200x8xf32>
    %38 = arith.mulf %32, %32 : vector<200x8xf32>
    %39 = arith.addf %37, %38 : vector<200x8xf32>
    %40 = arith.mulf %34, %34 : vector<200x8xf32>
    %41 = arith.addf %39, %40 : vector<200x8xf32>
    %42 = arith.mulf %36, %36 : vector<200x8xf32>
    %43 = arith.addf %41, %42 : vector<200x8xf32>
    %cst_17 = arith.constant dense<0.000000e+00> : vector<8xf32>
    %44 = vector.multi_reduction <add>, %43, %cst_17 [0] : vector<200x8xf32> to vector<8xf32>
    %45 = vector.shape_cast %44 : vector<8xf32> to vector<1x8xf32>
    %cst_18 = arith.constant 1.250000e-03 : f32
    %46 = vector.broadcast %cst_18 : f32 to vector<1x8xf32>
    %47 = arith.mulf %45, %46 : vector<1x8xf32>
    %c0_19 = arith.constant 0 : index
    %c0_20 = arith.constant 0 : index
    %48 = vector.load %arg4[%c0_19, %c0_20] : memref<1x8xf32, #tpu.memory_space<vmem>>, vector<1x8xf32>
    %cst_21 = arith.constant 9.99999974E-6 : f32
    %49 = vector.broadcast %cst_21 : f32 to vector<1x8xf32>
    %50 = arith.addf %47, %49 : vector<1x8xf32>
    %51 = math.rsqrt %50 : vector<1x8xf32>
    %52 = arith.mulf %48, %51 : vector<1x8xf32>
    %c0_22 = arith.constant 0 : index
    %c0_23 = arith.constant 0 : index
    %53 = vector.load %arg5[%c0_22, %c0_23] : memref<1x8xf32, #tpu.memory_space<vmem>>, vector<1x8xf32>
    %54 = vector.broadcast %52 : vector<1x8xf32> to vector<200x8xf32>
    %55 = arith.mulf %30, %54 : vector<200x8xf32>
    %56 = vector.broadcast %53 : vector<1x8xf32> to vector<200x8xf32>
    %57 = arith.addf %55, %56 : vector<200x8xf32>
    %cst_24 = arith.constant 0.000000e+00 : f32
    %58 = vector.broadcast %cst_24 : f32 to vector<200x8xf32>
    %59 = arith.maximumf %57, %58 : vector<200x8xf32>
    %60 = vector.broadcast %52 : vector<1x8xf32> to vector<200x8xf32>
    %61 = arith.mulf %32, %60 : vector<200x8xf32>
    %62 = vector.broadcast %53 : vector<1x8xf32> to vector<200x8xf32>
    %63 = arith.addf %61, %62 : vector<200x8xf32>
    %cst_25 = arith.constant 0.000000e+00 : f32
    %64 = vector.broadcast %cst_25 : f32 to vector<200x8xf32>
    %65 = arith.maximumf %63, %64 : vector<200x8xf32>
    %66 = arith.maximumf %59, %65 : vector<200x8xf32>
    %67 = vector.broadcast %52 : vector<1x8xf32> to vector<200x8xf32>
    %68 = arith.mulf %34, %67 : vector<200x8xf32>
    %69 = vector.broadcast %53 : vector<1x8xf32> to vector<200x8xf32>
    %70 = arith.addf %68, %69 : vector<200x8xf32>
    %cst_26 = arith.constant 0.000000e+00 : f32
    %71 = vector.broadcast %cst_26 : f32 to vector<200x8xf32>
    %72 = arith.maximumf %70, %71 : vector<200x8xf32>
    %73 = arith.maximumf %66, %72 : vector<200x8xf32>
    %74 = vector.broadcast %52 : vector<1x8xf32> to vector<200x8xf32>
    %75 = arith.mulf %36, %74 : vector<200x8xf32>
    %76 = vector.broadcast %53 : vector<1x8xf32> to vector<200x8xf32>
    %77 = arith.addf %75, %76 : vector<200x8xf32>
    %cst_27 = arith.constant 0.000000e+00 : f32
    %78 = vector.broadcast %cst_27 : f32 to vector<200x8xf32>
    %79 = arith.maximumf %77, %78 : vector<200x8xf32>
    %80 = arith.maximumf %73, %79 : vector<200x8xf32>
    %c0_28 = arith.constant 0 : index
    %c0_29 = arith.constant 0 : index
    %81 = vector.load %arg6[%c0_28, %c0_29] : memref<200x8xf32, #tpu.memory_space<vmem>>, vector<200x8xf32>
    tpu.vector_store %arg6[%c0_28, %c0_29], %80 {strides = array<i32>} : memref<200x8xf32, #tpu.memory_space<vmem>>, vector<200x8xf32>,
    return
  }
  func.func @transform_0(%arg0: i32) -> (i32, i32, i32) {
    %c0_i32 = arith.constant 0 : i32
    %c0_i32_0 = arith.constant 0 : i32
    %c0_i32_1 = arith.constant 0 : i32
    %c0_i32_2 = arith.constant 0 : i32
    return %c0_i32, %c0_i32_0, %c0_i32_1 : i32, i32, i32
  }
  func.func @transform_1(%arg0: i32) -> (i32, i32) {
    %c0_i32 = arith.constant 0 : i32
    %c0_i32_0 = arith.constant 0 : i32
    %c0_i32_1 = arith.constant 0 : i32
    return %c0_i32, %c0_i32_0 : i32, i32
  }
  func.func @transform_2(%arg0: i32) -> (i32, i32) {
    %c0_i32 = arith.constant 0 : i32
    %c0_i32_0 = arith.constant 0 : i32
    %c0_i32_1 = arith.constant 0 : i32
    return %c0_i32, %c0_i32_0 : i32, i32
  }
  func.func @transform_3(%arg0: i32) -> (i32, i32) {
    %c0_i32 = arith.constant 0 : i32
    %c0_i32_0 = arith.constant 0 : i32
    %c0_i32_1 = arith.constant 0 : i32
    return %c0_i32, %c0_i32_0 : i32, i32
  }
  func.func @transform_4(%arg0: i32) -> (i32, i32) {
    %c0_i32 = arith.constant 0 : i32
    %c0_i32_0 = arith.constant 0 : i32
    %c0_i32_1 = arith.constant 0 : i32
    return %c0_i32, %c0_i32_0 : i32, i32
  }
  func.func @transform_5(%arg0: i32) -> (i32, i32) {
    %c0_i32 = arith.constant 0 : i32
    %c0_i32_0 = arith.constant 0 : i32
    %c0_i32_1 = arith.constant 0 : i32
    return %c0_i32, %c0_i32_0 : i32, i32
  }
}

module attributes {stable_mosaic.version = 11 : i64} {
  func.func @_conv_block_kernel(%arg0: i32, %arg1: memref<4x50x72xbf16, #tpu.memory_space<vmem>>, %arg2: memref<72x8xbf16, #tpu.memory_space<vmem>>, %arg3: memref<1x8xf32, #tpu.memory_space<vmem>>, %arg4: memref<1x8xf32, #tpu.memory_space<vmem>>, %arg5: memref<1x8xf32, #tpu.memory_space<vmem>>, %arg6: memref<50x8xf32, #tpu.memory_space<vmem>>) attributes {dimension_semantics = [#tpu.dimension_semantics<arbitrary>], iteration_bounds = array<i64: 1>, scalar_prefetch = 0 : i64, scratch_operands = 0 : i64, tpu.core_type = #tpu.core_type<tc>, window_params = [{pipeline_mode = #tpu.pipeline_mode<synchronous>, transform_indices = @transform_0, window_bounds = array<i64: 4, 50, 72>}, {pipeline_mode = #tpu.pipeline_mode<synchronous>, transform_indices = @transform_1, window_bounds = array<i64: 72, 8>}, {pipeline_mode = #tpu.pipeline_mode<synchronous>, transform_indices = @transform_2, window_bounds = array<i64: 1, 8>}, {pipeline_mode = #tpu.pipeline_mode<synchronous>, transform_indices = @transform_3, window_bounds = array<i64: 1, 8>}, {pipeline_mode = #tpu.pipeline_mode<synchronous>, transform_indices = @transform_4, window_bounds = array<i64: 1, 8>}, {pipeline_mode = #tpu.pipeline_mode<synchronous>, transform_indices = @transform_5, window_bounds = array<i64: 50, 8>}]} {
    %c0 = arith.constant 0 : index
    %c0_0 = arith.constant 0 : index
    %0 = vector.load %arg2[%c0, %c0_0] : memref<72x8xbf16, #tpu.memory_space<vmem>>, vector<72x8xbf16>
    %c0_1 = arith.constant 0 : index
    %c0_2 = arith.constant 0 : index
    %1 = vector.load %arg3[%c0_1, %c0_2] : memref<1x8xf32, #tpu.memory_space<vmem>>, vector<1x8xf32>
    %c0_3 = arith.constant 0 : index
    %c0_4 = arith.constant 0 : index
    %c0_5 = arith.constant 0 : index
    %2 = vector.load %arg1[%c0_3, %c0_4, %c0_5] : memref<4x50x72xbf16, #tpu.memory_space<vmem>>, vector<1x50x72xbf16>
    %3 = vector.shape_cast %2 : vector<1x50x72xbf16> to vector<50x72xbf16>
    %cst = arith.constant dense<0.000000e+00> : vector<50x8xf32>
    %4 = tpu.matmul %3, %0, %cst {dimension_numbers = #tpu.dot_dimension_numbers<[1], [0], [0], [1], [0, 0, 1, 1], [], []>} : vector<50x72xbf16>, vector<72x8xbf16>, vector<50x8xf32> -> vector<50x8xf32>
    %5 = vector.broadcast %1 : vector<1x8xf32> to vector<50x8xf32>
    %6 = arith.addf %4, %5 : vector<50x8xf32>
    %c1 = arith.constant 1 : index
    %c0_6 = arith.constant 0 : index
    %c0_7 = arith.constant 0 : index
    %7 = vector.load %arg1[%c1, %c0_6, %c0_7] : memref<4x50x72xbf16, #tpu.memory_space<vmem>>, vector<1x50x72xbf16>
    %8 = vector.shape_cast %7 : vector<1x50x72xbf16> to vector<50x72xbf16>
    %cst_8 = arith.constant dense<0.000000e+00> : vector<50x8xf32>
    %9 = tpu.matmul %8, %0, %cst_8 {dimension_numbers = #tpu.dot_dimension_numbers<[1], [0], [0], [1], [0, 0, 1, 1], [], []>} : vector<50x72xbf16>, vector<72x8xbf16>, vector<50x8xf32> -> vector<50x8xf32>
    %10 = vector.broadcast %1 : vector<1x8xf32> to vector<50x8xf32>
    %11 = arith.addf %9, %10 : vector<50x8xf32>
    %c2 = arith.constant 2 : index
    %c0_9 = arith.constant 0 : index
    %c0_10 = arith.constant 0 : index
    %12 = vector.load %arg1[%c2, %c0_9, %c0_10] : memref<4x50x72xbf16, #tpu.memory_space<vmem>>, vector<1x50x72xbf16>
    %13 = vector.shape_cast %12 : vector<1x50x72xbf16> to vector<50x72xbf16>
    %cst_11 = arith.constant dense<0.000000e+00> : vector<50x8xf32>
    %14 = tpu.matmul %13, %0, %cst_11 {dimension_numbers = #tpu.dot_dimension_numbers<[1], [0], [0], [1], [0, 0, 1, 1], [], []>} : vector<50x72xbf16>, vector<72x8xbf16>, vector<50x8xf32> -> vector<50x8xf32>
    %15 = vector.broadcast %1 : vector<1x8xf32> to vector<50x8xf32>
    %16 = arith.addf %14, %15 : vector<50x8xf32>
    %c3 = arith.constant 3 : index
    %c0_12 = arith.constant 0 : index
    %c0_13 = arith.constant 0 : index
    %17 = vector.load %arg1[%c3, %c0_12, %c0_13] : memref<4x50x72xbf16, #tpu.memory_space<vmem>>, vector<1x50x72xbf16>
    %18 = vector.shape_cast %17 : vector<1x50x72xbf16> to vector<50x72xbf16>
    %cst_14 = arith.constant dense<0.000000e+00> : vector<50x8xf32>
    %19 = tpu.matmul %18, %0, %cst_14 {dimension_numbers = #tpu.dot_dimension_numbers<[1], [0], [0], [1], [0, 0, 1, 1], [], []>} : vector<50x72xbf16>, vector<72x8xbf16>, vector<50x8xf32> -> vector<50x8xf32>
    %20 = vector.broadcast %1 : vector<1x8xf32> to vector<50x8xf32>
    %21 = arith.addf %19, %20 : vector<50x8xf32>
    %22 = arith.addf %6, %11 : vector<50x8xf32>
    %23 = arith.addf %22, %16 : vector<50x8xf32>
    %24 = arith.addf %23, %21 : vector<50x8xf32>
    %cst_15 = arith.constant dense<0.000000e+00> : vector<8xf32>
    %25 = vector.multi_reduction <add>, %24, %cst_15 [0] : vector<50x8xf32> to vector<8xf32>
    %26 = vector.shape_cast %25 : vector<8xf32> to vector<1x8xf32>
    %cst_16 = arith.constant 5.000000e-03 : f32
    %27 = vector.broadcast %cst_16 : f32 to vector<1x8xf32>
    %28 = arith.mulf %26, %27 : vector<1x8xf32>
    %29 = vector.broadcast %28 : vector<1x8xf32> to vector<50x8xf32>
    %30 = arith.subf %6, %29 : vector<50x8xf32>
    %31 = vector.broadcast %28 : vector<1x8xf32> to vector<50x8xf32>
    %32 = arith.subf %11, %31 : vector<50x8xf32>
    %33 = vector.broadcast %28 : vector<1x8xf32> to vector<50x8xf32>
    %34 = arith.subf %16, %33 : vector<50x8xf32>
    %35 = vector.broadcast %28 : vector<1x8xf32> to vector<50x8xf32>
    %36 = arith.subf %21, %35 : vector<50x8xf32>
    %37 = arith.mulf %30, %30 : vector<50x8xf32>
    %38 = arith.mulf %32, %32 : vector<50x8xf32>
    %39 = arith.addf %37, %38 : vector<50x8xf32>
    %40 = arith.mulf %34, %34 : vector<50x8xf32>
    %41 = arith.addf %39, %40 : vector<50x8xf32>
    %42 = arith.mulf %36, %36 : vector<50x8xf32>
    %43 = arith.addf %41, %42 : vector<50x8xf32>
    %cst_17 = arith.constant dense<0.000000e+00> : vector<8xf32>
    %44 = vector.multi_reduction <add>, %43, %cst_17 [0] : vector<50x8xf32> to vector<8xf32>
    %45 = vector.shape_cast %44 : vector<8xf32> to vector<1x8xf32>
    %cst_18 = arith.constant 5.000000e-03 : f32
    %46 = vector.broadcast %cst_18 : f32 to vector<1x8xf32>
    %47 = arith.mulf %45, %46 : vector<1x8xf32>
    %c0_19 = arith.constant 0 : index
    %c0_20 = arith.constant 0 : index
    %48 = vector.load %arg4[%c0_19, %c0_20] : memref<1x8xf32, #tpu.memory_space<vmem>>, vector<1x8xf32>
    %cst_21 = arith.constant 9.99999974E-6 : f32
    %49 = vector.broadcast %cst_21 : f32 to vector<1x8xf32>
    %50 = arith.addf %47, %49 : vector<1x8xf32>
    %51 = math.rsqrt %50 : vector<1x8xf32>
    %52 = arith.mulf %48, %51 : vector<1x8xf32>
    %c0_22 = arith.constant 0 : index
    %c0_23 = arith.constant 0 : index
    %53 = vector.load %arg5[%c0_22, %c0_23] : memref<1x8xf32, #tpu.memory_space<vmem>>, vector<1x8xf32>
    %54 = vector.broadcast %52 : vector<1x8xf32> to vector<50x8xf32>
    %55 = arith.mulf %30, %54 : vector<50x8xf32>
    %56 = vector.broadcast %53 : vector<1x8xf32> to vector<50x8xf32>
    %57 = arith.addf %55, %56 : vector<50x8xf32>
    %cst_24 = arith.constant 0.000000e+00 : f32
    %58 = vector.broadcast %cst_24 : f32 to vector<50x8xf32>
    %59 = arith.maximumf %57, %58 : vector<50x8xf32>
    %60 = vector.broadcast %52 : vector<1x8xf32> to vector<50x8xf32>
    %61 = arith.mulf %32, %60 : vector<50x8xf32>
    %62 = vector.broadcast %53 : vector<1x8xf32> to vector<50x8xf32>
    %63 = arith.addf %61, %62 : vector<50x8xf32>
    %cst_25 = arith.constant 0.000000e+00 : f32
    %64 = vector.broadcast %cst_25 : f32 to vector<50x8xf32>
    %65 = arith.maximumf %63, %64 : vector<50x8xf32>
    %66 = arith.maximumf %59, %65 : vector<50x8xf32>
    %67 = vector.broadcast %52 : vector<1x8xf32> to vector<50x8xf32>
    %68 = arith.mulf %34, %67 : vector<50x8xf32>
    %69 = vector.broadcast %53 : vector<1x8xf32> to vector<50x8xf32>
    %70 = arith.addf %68, %69 : vector<50x8xf32>
    %cst_26 = arith.constant 0.000000e+00 : f32
    %71 = vector.broadcast %cst_26 : f32 to vector<50x8xf32>
    %72 = arith.maximumf %70, %71 : vector<50x8xf32>
    %73 = arith.maximumf %66, %72 : vector<50x8xf32>
    %74 = vector.broadcast %52 : vector<1x8xf32> to vector<50x8xf32>
    %75 = arith.mulf %36, %74 : vector<50x8xf32>
    %76 = vector.broadcast %53 : vector<1x8xf32> to vector<50x8xf32>
    %77 = arith.addf %75, %76 : vector<50x8xf32>
    %cst_27 = arith.constant 0.000000e+00 : f32
    %78 = vector.broadcast %cst_27 : f32 to vector<50x8xf32>
    %79 = arith.maximumf %77, %78 : vector<50x8xf32>
    %80 = arith.maximumf %73, %79 : vector<50x8xf32>
    %c0_28 = arith.constant 0 : index
    %c0_29 = arith.constant 0 : index
    %81 = vector.load %arg6[%c0_28, %c0_29] : memref<50x8xf32, #tpu.memory_space<vmem>>, vector<50x8xf32>
    tpu.vector_store %arg6[%c0_28, %c0_29], %80 {strides = array<i32>} : memref<50x8xf32, #tpu.memory_space<vmem>>, vector<50x8xf32>,
    return
  }
  func.func @transform_0(%arg0: i32) -> (i32, i32, i32) {
    %c0_i32 = arith.constant 0 : i32
    %c0_i32_0 = arith.constant 0 : i32
    %c0_i32_1 = arith.constant 0 : i32
    %c0_i32_2 = arith.constant 0 : i32
    return %c0_i32, %c0_i32_0, %c0_i32_1 : i32, i32, i32
  }
  func.func @transform_1(%arg0: i32) -> (i32, i32) {
    %c0_i32 = arith.constant 0 : i32
    %c0_i32_0 = arith.constant 0 : i32
    %c0_i32_1 = arith.constant 0 : i32
    return %c0_i32, %c0_i32_0 : i32, i32
  }
  func.func @transform_2(%arg0: i32) -> (i32, i32) {
    %c0_i32 = arith.constant 0 : i32
    %c0_i32_0 = arith.constant 0 : i32
    %c0_i32_1 = arith.constant 0 : i32
    return %c0_i32, %c0_i32_0 : i32, i32
  }
  func.func @transform_3(%arg0: i32) -> (i32, i32) {
    %c0_i32 = arith.constant 0 : i32
    %c0_i32_0 = arith.constant 0 : i32
    %c0_i32_1 = arith.constant 0 : i32
    return %c0_i32, %c0_i32_0 : i32, i32
  }
  func.func @transform_4(%arg0: i32) -> (i32, i32) {
    %c0_i32 = arith.constant 0 : i32
    %c0_i32_0 = arith.constant 0 : i32
    %c0_i32_1 = arith.constant 0 : i32
    return %c0_i32, %c0_i32_0 : i32, i32
  }
  func.func @transform_5(%arg0: i32) -> (i32, i32) {
    %c0_i32 = arith.constant 0 : i32
    %c0_i32_0 = arith.constant 0 : i32
    %c0_i32_1 = arith.constant 0 : i32
    return %c0_i32, %c0_i32_0 : i32, i32
  }
}

module attributes {stable_mosaic.version = 11 : i64} {
  func.func @_dense_stack_kernel(%arg0: i32, %arg1: memref<2x200xbf16, #tpu.memory_space<vmem>>, %arg2: memref<200x32xbf16, #tpu.memory_space<vmem>>, %arg3: memref<1x32xf32, #tpu.memory_space<vmem>>, %arg4: memref<32x32xbf16, #tpu.memory_space<vmem>>, %arg5: memref<1x32xf32, #tpu.memory_space<vmem>>, %arg6: memref<32x5xbf16, #tpu.memory_space<vmem>>, %arg7: memref<1x5xf32, #tpu.memory_space<vmem>>, %arg8: memref<2x5xf32, #tpu.memory_space<vmem>>) attributes {dimension_semantics = [#tpu.dimension_semantics<arbitrary>], iteration_bounds = array<i64: 1>, scalar_prefetch = 0 : i64, scratch_operands = 0 : i64, tpu.core_type = #tpu.core_type<tc>, window_params = [{pipeline_mode = #tpu.pipeline_mode<synchronous>, transform_indices = @transform_0, window_bounds = array<i64: 2, 200>}, {pipeline_mode = #tpu.pipeline_mode<synchronous>, transform_indices = @transform_1, window_bounds = array<i64: 200, 32>}, {pipeline_mode = #tpu.pipeline_mode<synchronous>, transform_indices = @transform_2, window_bounds = array<i64: 1, 32>}, {pipeline_mode = #tpu.pipeline_mode<synchronous>, transform_indices = @transform_3, window_bounds = array<i64: 32, 32>}, {pipeline_mode = #tpu.pipeline_mode<synchronous>, transform_indices = @transform_4, window_bounds = array<i64: 1, 32>}, {pipeline_mode = #tpu.pipeline_mode<synchronous>, transform_indices = @transform_5, window_bounds = array<i64: 32, 5>}, {pipeline_mode = #tpu.pipeline_mode<synchronous>, transform_indices = @transform_6, window_bounds = array<i64: 1, 5>}, {pipeline_mode = #tpu.pipeline_mode<synchronous>, transform_indices = @transform_7, window_bounds = array<i64: 2, 5>}]} {
    %c0 = arith.constant 0 : index
    %c0_0 = arith.constant 0 : index
    %0 = vector.load %arg1[%c0, %c0_0] : memref<2x200xbf16, #tpu.memory_space<vmem>>, vector<2x200xbf16>
    %c0_1 = arith.constant 0 : index
    %c0_2 = arith.constant 0 : index
    %1 = vector.load %arg2[%c0_1, %c0_2] : memref<200x32xbf16, #tpu.memory_space<vmem>>, vector<200x32xbf16>
    %c0_3 = arith.constant 0 : index
    %c0_4 = arith.constant 0 : index
    %2 = vector.load %arg3[%c0_3, %c0_4] : memref<1x32xf32, #tpu.memory_space<vmem>>, vector<1x32xf32>
    %cst = arith.constant dense<0.000000e+00> : vector<2x32xf32>
    %3 = tpu.matmul %0, %1, %cst {dimension_numbers = #tpu.dot_dimension_numbers<[1], [0], [0], [1], [0, 0, 1, 1], [], []>} : vector<2x200xbf16>, vector<200x32xbf16>, vector<2x32xf32> -> vector<2x32xf32>
    %4 = vector.broadcast %2 : vector<1x32xf32> to vector<2x32xf32>
    %5 = arith.addf %3, %4 : vector<2x32xf32>
    %cst_5 = arith.constant 0.000000e+00 : f32
    %6 = vector.broadcast %cst_5 : f32 to vector<2x32xf32>
    %7 = arith.maximumf %5, %6 : vector<2x32xf32>
    %8 = arith.truncf %7 : vector<2x32xf32> to vector<2x32xbf16>
    %c0_6 = arith.constant 0 : index
    %c0_7 = arith.constant 0 : index
    %9 = vector.load %arg4[%c0_6, %c0_7] : memref<32x32xbf16, #tpu.memory_space<vmem>>, vector<32x32xbf16>
    %c0_8 = arith.constant 0 : index
    %c0_9 = arith.constant 0 : index
    %10 = vector.load %arg5[%c0_8, %c0_9] : memref<1x32xf32, #tpu.memory_space<vmem>>, vector<1x32xf32>
    %cst_10 = arith.constant dense<0.000000e+00> : vector<2x32xf32>
    %11 = tpu.matmul %8, %9, %cst_10 {dimension_numbers = #tpu.dot_dimension_numbers<[1], [0], [0], [1], [0, 0, 1, 1], [], []>} : vector<2x32xbf16>, vector<32x32xbf16>, vector<2x32xf32> -> vector<2x32xf32>
    %12 = vector.broadcast %10 : vector<1x32xf32> to vector<2x32xf32>
    %13 = arith.addf %11, %12 : vector<2x32xf32>
    %cst_11 = arith.constant 0.000000e+00 : f32
    %14 = vector.broadcast %cst_11 : f32 to vector<2x32xf32>
    %15 = arith.maximumf %13, %14 : vector<2x32xf32>
    %16 = arith.truncf %15 : vector<2x32xf32> to vector<2x32xbf16>
    %c0_12 = arith.constant 0 : index
    %c0_13 = arith.constant 0 : index
    %17 = vector.load %arg6[%c0_12, %c0_13] : memref<32x5xbf16, #tpu.memory_space<vmem>>, vector<32x5xbf16>
    %c0_14 = arith.constant 0 : index
    %c0_15 = arith.constant 0 : index
    %18 = vector.load %arg7[%c0_14, %c0_15] : memref<1x5xf32, #tpu.memory_space<vmem>>, vector<1x5xf32>
    %cst_16 = arith.constant dense<0.000000e+00> : vector<2x5xf32>
    %19 = tpu.matmul %16, %17, %cst_16 {dimension_numbers = #tpu.dot_dimension_numbers<[1], [0], [0], [1], [0, 0, 1, 1], [], []>} : vector<2x32xbf16>, vector<32x5xbf16>, vector<2x5xf32> -> vector<2x5xf32>
    %20 = vector.broadcast %18 : vector<1x5xf32> to vector<2x5xf32>
    %21 = arith.addf %19, %20 : vector<2x5xf32>
    %c0_17 = arith.constant 0 : index
    %c0_18 = arith.constant 0 : index
    %22 = vector.load %arg8[%c0_17, %c0_18] : memref<2x5xf32, #tpu.memory_space<vmem>>, vector<2x5xf32>
    tpu.vector_store %arg8[%c0_17, %c0_18], %21 {strides = array<i32>} : memref<2x5xf32, #tpu.memory_space<vmem>>, vector<2x5xf32>,
    return
  }
  func.func @transform_0(%arg0: i32) -> (i32, i32) {
    %c0_i32 = arith.constant 0 : i32
    %c0_i32_0 = arith.constant 0 : i32
    %c0_i32_1 = arith.constant 0 : i32
    return %c0_i32, %c0_i32_0 : i32, i32
  }
  func.func @transform_1(%arg0: i32) -> (i32, i32) {
    %c0_i32 = arith.constant 0 : i32
    %c0_i32_0 = arith.constant 0 : i32
    %c0_i32_1 = arith.constant 0 : i32
    return %c0_i32, %c0_i32_0 : i32, i32
  }
  func.func @transform_2(%arg0: i32) -> (i32, i32) {
    %c0_i32 = arith.constant 0 : i32
    %c0_i32_0 = arith.constant 0 : i32
    %c0_i32_1 = arith.constant 0 : i32
    return %c0_i32, %c0_i32_0 : i32, i32
  }
  func.func @transform_3(%arg0: i32) -> (i32, i32) {
    %c0_i32 = arith.constant 0 : i32
    %c0_i32_0 = arith.constant 0 : i32
    %c0_i32_1 = arith.constant 0 : i32
    return %c0_i32, %c0_i32_0 : i32, i32
  }
  func.func @transform_4(%arg0: i32) -> (i32, i32) {
    %c0_i32 = arith.constant 0 : i32
    %c0_i32_0 = arith.constant 0 : i32
    %c0_i32_1 = arith.constant 0 : i32
    return %c0_i32, %c0_i32_0 : i32, i32
  }
  func.func @transform_5(%arg0: i32) -> (i32, i32) {
    %c0_i32 = arith.constant 0 : i32
    %c0_i32_0 = arith.constant 0 : i32
    %c0_i32_1 = arith.constant 0 : i32
    return %c0_i32, %c0_i32_0 : i32, i32
  }
  func.func @transform_6(%arg0: i32) -> (i32, i32) {
    %c0_i32 = arith.constant 0 : i32
    %c0_i32_0 = arith.constant 0 : i32
    %c0_i32_1 = arith.constant 0 : i32
    return %c0_i32, %c0_i32_0 : i32, i32
  }
  func.func @transform_7(%arg0: i32) -> (i32, i32) {
    %c0_i32 = arith.constant 0 : i32
    %c0_i32_0 = arith.constant 0 : i32
    %c0_i32_1 = arith.constant 0 : i32
    return %c0_i32, %c0_i32_0 : i32, i32
  }
}

</mosaic_0001>

<bundles_post_ra>
// kernel: convnet_forward.3
= control target key start
LH: loop header
LB: loop body
LE: loop exit
PB: predicated region body
PF: predicated region fallthrough
CT: control target
= control target key end

     0   :  { %vm171_vm0 = vcmask 1044480   ;;  %vm172_vm1 = vcmask 1045504   ;;  %v2516_v0 = vmov 0.0   ;;  %v2517_v2 = vmov 65535   ;;  %s4822_s1 = inlined_call_operand.vmem [shape: bf16[27,8], index: 1, kind: input, shape index: {}]   ;;  %s4823_s0 = inlined_call_operand.vmem [shape: bf16[4,200,27], index: 0, kind: input, shape index: {}]   ;;  %s4824_s2 = inlined_call_operand.vmem [shape: f32[1,8], index: 2, kind: input, shape index: {}, may-alias: {2,4}]   ;;  %s4825_s3 = inlined_call_operand.vmem [shape: f32[1,8], index: 3, kind: input, shape index: {}]   ;;  %s4826_s4 = inlined_call_operand.vmem [shape: f32[1,8], index: 4, kind: input, shape index: {}, may-alias: {2,4}]   ;;  %s4827_s5 = inlined_call_operand.vmem [shape: f32[200,8], index: 5, kind: output, shape index: {}]  }
   0x1   :  { %2233 = vmatprep.subr.bf16.mxu0 %v2516_v0  ;;  %2289 = vmatprep.subr.bf16.mxu1 %v2516_v0  ;;  %v2460_v1 = vld [vmem:[%s4822_s1] sm:$0xff]   ;;  %v173_v3 = vsel %vm171_vm0, 4294967295, %v2517_v2  ;;  %v2461_v4 = vld [vmem:[%s4822_s1 + $0x8] sm:$0x3f]   ;;  %vm2518_vm2 = vmmov 0   ;;  %vm131_vm3 = vcmask 220160  }
   0x2   :  { %2234 = vmatpush3.bf16.msra.mxu0 %v2460_v1  ;;  %2290 = vmatpush3.bf16.msra.mxu1 %v2460_v1  ;;  %v174_v5 = vsel %vm172_vm1, %v173_v3, 0  ;;  %v2462_v7 = vld [vmem:[%s4823_s0] sm:$0xff]   ;;  %v2464_v9 = vld [vmem:[%s4823_s0 + $0x8] sm:$0xff]   ;;  %v2466_v11 = vld [vmem:[%s4823_s0 + $0x10] sm:$0xff]   ;;  %vm1181_vm4 = vcmask 64512  }
   0x3   :  { %2235 = vmatprep.subr.bf16.mxu0 %v2516_v0  ;;  %2291 = vmatprep.subr.bf16.mxu1 %v2516_v0  ;;  %v176_v6 = vand.u32 %v2461_v4, %v174_v5  ;;  %v2463_v8 = vld [vmem:[%s4823_s0 + $0x64] sm:$0xff]   ;;  %v2465_v10 = vld [vmem:[%s4823_s0 + $0x6c] sm:$0xff]   ;;  %v2467_v12 = vld [vmem:[%s4823_s0 + $0x74] sm:$0xff]  }
   0x4   :  { %2237 = vmatprep.mubr.msk.bf16.mxu0 %vm2518_vm2, %v2516_v0  ;;  %2293 = vmatprep.mubr.msk.bf16.mxu1 %vm2518_vm2, %v2516_v0  ;;  %v2468_v13 = vld [vmem:[%s4823_s0 + $0x18] sm:$0xff]   ;;  %v2470_v15 = vld [vmem:[%s4823_s0 + $0x20] sm:$0xff]   ;;  %v2472_v17 = vld [vmem:[%s4823_s0 + $0x28] sm:$0xff]  }
   0x5   :  { %v2469_v14 = vld [vmem:[%s4823_s0 + $0x7c] sm:$0xff]   ;;  %v2471_v16 = vld [vmem:[%s4823_s0 + $0x84] sm:$0xff]   ;;  %v2473_v18 = vld [vmem:[%s4823_s0 + $0x8c] sm:$0xff]  }
   0x6   :  { %2236 = vmatpush3.bf16.msra.mxu0 %v176_v6  ;;  %2292 = vmatpush3.bf16.msra.mxu1 %v176_v6  ;;  %v2474_v19 = vld [vmem:[%s4823_s0 + $0x30] sm:$0xff]   ;;  %v2476_v21 = vld [vmem:[%s4823_s0 + $0x38] sm:$0xff]   ;;  %v2478_v23 = vld [vmem:[%s4823_s0 + $0x40] sm:$0xff]  }
   0x7   :  { %2345 = vmatprep.subr.bf16.mxu0 %v2516_v0  ;;  %2401 = vmatprep.subr.bf16.mxu1 %v2516_v0  ;;  %v2475_v20 = vld [vmem:[%s4823_s0 + $0x94] sm:$0xff]   ;;  %v2477_v22 = vld [vmem:[%s4823_s0 + $0x9c] sm:$0xff]   ;;  %v2479_v24 = vld [vmem:[%s4823_s0 + $0xa4] sm:$0xff]  }
   0x8   :  { %v2480_v25 = vld [vmem:[%s4823_s0 + $0x48] sm:$0xff]   ;;  %v2482_v27 = vld [vmem:[%s4823_s0 + $0x50] sm:$0xff]   ;;  %v2484_v29 = vld [vmem:[%s4823_s0 + $0x58] sm:$0xff]  }
   0x9   :  { %2238 = vmatmul.mubr.msk.bf16.vlgmr.msra.gmra.mrb[0].mxu0 %vm131_vm3, %v2462_v7  ;;  %2294 = vmatmul.mubr.msk.bf16.vlgmr.msra.gmra.mrb[0].mxu1 %vm131_vm3, %v2463_v8  ;;  %v2481_v26 = vld [vmem:[%s4823_s0 + $0xac] sm:$0xff]   ;;  %v2483_v28 = vld [vmem:[%s4823_s0 + $0xb4] sm:$0xff]   ;;  %v2485_v30 = vld [vmem:[%s4823_s0 + $0xbc] sm:$0xff]  }
   0xa   :  { %2346 = vmatpush3.bf16.msra.mxu0 %v2460_v1  ;;  %2402 = vmatpush3.bf16.msra.mxu1 %v2460_v1  ;;  %v2486_v31 = vld [vmem:[%s4823_s0 + $0x60] ss:$0 sps:$4 sm:$0xff]   ;;  %v2487_v32 = vld [vmem:[%s4823_s0 + $0xc4] ss:$0 sps:$4 sm:$0xff]   ;;  %v2488_v33 = vld [vmem:[%s4823_s0 + $0xc8] sm:$0xff]  }
   0xb   :  { %2241 = vmatprep.mubr.msk.bf16.mxu0 %vm2518_vm2, %v2516_v0  ;;  %2297 = vmatprep.mubr.msk.bf16.mxu1 %vm2518_vm2, %v2516_v0  ;;  %v2489_v34 = vld [vmem:[%s4823_s0 + $0x12c] sm:$0xff]   ;;  %v2491_v36 = vld [vmem:[%s4823_s0 + $0x134] sm:$0xff]   ;;  %v2493_v38 = vld [vmem:[%s4823_s0 + $0x13c] sm:$0xff]  }
   0xc   :  { %2347 = vmatprep.subr.bf16.mxu0 %v2516_v0  ;;  %2403 = vmatprep.subr.bf16.mxu1 %v2516_v0  ;;  %v2490_v35 = vld [vmem:[%s4823_s0 + $0xd0] sm:$0xff]   ;;  %v2492_v37 = vld [vmem:[%s4823_s0 + $0xd8] sm:$0xff]   ;;  %v2494_v39 = vld [vmem:[%s4823_s0 + $0xe0] sm:$0xff]  }
   0xd   :  { %v2495_v40 = vld [vmem:[%s4823_s0 + $0x144] sm:$0xff]   ;;  %v2497_v42 = vld [vmem:[%s4823_s0 + $0x14c] sm:$0xff]   ;;  %v2499_v44 = vld [vmem:[%s4823_s0 + $0x154] sm:$0xff]  }
   0xe   :  { %2348 = vmatpush3.bf16.msra.mxu0 %v176_v6  ;;  %2404 = vmatpush3.bf16.msra.mxu1 %v176_v6  ;;  %v2496_v41 = vld [vmem:[%s4823_s0 + $0xe8] sm:$0xff]   ;;  %v2498_v43 = vld [vmem:[%s4823_s0 + $0xf0] sm:$0xff]   ;;  %v2500_v45 = vld [vmem:[%s4823_s0 + $0xf8] sm:$0xff]  }
   0xf   :  { %v2501_v46 = vld [vmem:[%s4823_s0 + $0x15c] sm:$0xff]   ;;  %v2503_v48 = vld [vmem:[%s4823_s0 + $0x164] sm:$0xff]   ;;  %v2505_v50 = vld [vmem:[%s4823_s0 + $0x16c] sm:$0xff]  }
  0x10   :  { %v2502_v47 = vld [vmem:[%s4823_s0 + $0x100] sm:$0xff]   ;;  %v2504_v49 = vld [vmem:[%s4823_s0 + $0x108] sm:$0xff]   ;;  %v2506_v51 = vld [vmem:[%s4823_s0 + $0x110] sm:$0xff]  }
  0x11   :  { %2242 = vmatmul.mubr.msk.bf16.gmra.mrb[4].mxu0 %vm131_vm3, %v2464_v9  ;;  %2298 = vmatmul.mubr.msk.bf16.gmra.mrb[4].mxu1 %vm131_vm3, %v2465_v10  ;;  %v2507_v52 = vld [vmem:[%s4823_s0 + $0x174] sm:$0xff]   ;;  %v2509_v54 = vld [vmem:[%s4823_s0 + $0x17c] sm:$0xff]   ;;  %v2511_v56 = vld [vmem:[%s4823_s0 + $0x184] sm:$0xff]  }
  0x12   :  { %2245 = vmatprep.mubr.msk.bf16.mxu0 %vm2518_vm2, %v2516_v0  ;;  %2301 = vmatprep.mubr.msk.bf16.mxu1 %vm2518_vm2, %v2516_v0  ;;  %v2508_v53 = vld [vmem:[%s4823_s0 + $0x118] sm:$0xff]   ;;  %v2510_v55 = vld [vmem:[%s4823_s0 + $0x120] sm:$0xff]   ;;  %v2512_v57 = vld [vmem:[%s4823_s0 + $0x128] ss:$0 sps:$4 sm:$0xff]  }
  0x13   :  { %v2513_v58 = vld [vmem:[%s4823_s0 + $0x18c] ss:$0 sps:$4 sm:$0xff]  }
  0x19   :  { %2246 = vmatmul.mubr.msk.bf16.gmra.mrb[8].mxu0 %vm131_vm3, %v2466_v11  ;;  %2302 = vmatmul.mubr.msk.bf16.gmra.mrb[8].mxu1 %vm131_vm3, %v2467_v12 }
  0x1a   :  { %2249 = vmatprep.mubr.msk.bf16.mxu0 %vm2518_vm2, %v2516_v0  ;;  %2305 = vmatprep.mubr.msk.bf16.mxu1 %vm2518_vm2, %v2516_v0 }
  0x21   :  { %2250 = vmatmul.mubr.msk.bf16.gmra.mrb[12].mxu0 %vm131_vm3, %v2468_v13  ;;  %2306 = vmatmul.mubr.msk.bf16.gmra.mrb[12].mxu1 %vm131_vm3, %v2469_v14 }
  0x22   :  { %2253 = vmatprep.mubr.msk.bf16.mxu0 %vm2518_vm2, %v2516_v0  ;;  %2309 = vmatprep.mubr.msk.bf16.mxu1 %vm2518_vm2, %v2516_v0 }
  0x29   :  { %2254 = vmatmul.mubr.msk.bf16.gmra.mrb[16].mxu0 %vm131_vm3, %v2470_v15  ;;  %2310 = vmatmul.mubr.msk.bf16.gmra.mrb[16].mxu1 %vm131_vm3, %v2471_v16 }
  0x2a   :  { %2257 = vmatprep.mubr.msk.bf16.mxu0 %vm2518_vm2, %v2516_v0  ;;  %2313 = vmatprep.mubr.msk.bf16.mxu1 %vm2518_vm2, %v2516_v0 }
  0x31   :  { %2258 = vmatmul.mubr.msk.bf16.gmra.mrb[20].mxu0 %vm131_vm3, %v2472_v17  ;;  %2314 = vmatmul.mubr.msk.bf16.gmra.mrb[20].mxu1 %vm131_vm3, %v2473_v18 }
  0x32   :  { %2261 = vmatprep.mubr.msk.bf16.mxu0 %vm2518_vm2, %v2516_v0  ;;  %2317 = vmatprep.mubr.msk.bf16.mxu1 %vm2518_vm2, %v2516_v0 }
  0x39   :  { %2262 = vmatmul.mubr.msk.bf16.gmra.mrb[24].mxu0 %vm131_vm3, %v2474_v19  ;;  %2318 = vmatmul.mubr.msk.bf16.gmra.mrb[24].mxu1 %vm131_vm3, %v2475_v20 }
  0x3a   :  { %2265 = vmatprep.mubr.msk.bf16.mxu0 %vm2518_vm2, %v2516_v0  ;;  %2321 = vmatprep.mubr.msk.bf16.mxu1 %vm2518_vm2, %v2516_v0 }
  0x41   :  { %2266 = vmatmul.mubr.msk.bf16.gmra.mrb[28].mxu0 %vm131_vm3, %v2476_v21  ;;  %2322 = vmatmul.mubr.msk.bf16.gmra.mrb[28].mxu1 %vm131_vm3, %v2477_v22 }
  0x42   :  { %2269 = vmatprep.mubr.msk.bf16.mxu0 %vm2518_vm2, %v2516_v0  ;;  %2325 = vmatprep.mubr.msk.bf16.mxu1 %vm2518_vm2, %v2516_v0 }
  0x49   :  { %2270 = vmatmul.mubr.msk.bf16.gmra.mrb[32].mxu0 %vm131_vm3, %v2478_v23  ;;  %2326 = vmatmul.mubr.msk.bf16.gmra.mrb[32].mxu1 %vm131_vm3, %v2479_v24 }
  0x4a   :  { %2273 = vmatprep.mubr.msk.bf16.mxu0 %vm2518_vm2, %v2516_v0  ;;  %2329 = vmatprep.mubr.msk.bf16.mxu1 %vm2518_vm2, %v2516_v0 }
  0x51   :  { %2274 = vmatmul.mubr.msk.bf16.gmra.mrb[36].mxu0 %vm131_vm3, %v2480_v25  ;;  %2330 = vmatmul.mubr.msk.bf16.gmra.mrb[36].mxu1 %vm131_vm3, %v2481_v26 }
  0x52   :  { %2277 = vmatprep.mubr.msk.bf16.mxu0 %vm2518_vm2, %v2516_v0  ;;  %2333 = vmatprep.mubr.msk.bf16.mxu1 %vm2518_vm2, %v2516_v0 }
  0x59   :  { %2278 = vmatmul.mubr.msk.bf16.gmra.mrb[40].mxu0 %vm131_vm3, %v2482_v27  ;;  %2334 = vmatmul.mubr.msk.bf16.gmra.mrb[40].mxu1 %vm131_vm3, %v2483_v28 }
  0x5a   :  { %2281 = vmatprep.mubr.msk.bf16.mxu0 %vm2518_vm2, %v2516_v0  ;;  %2337 = vmatprep.mubr.msk.bf16.mxu1 %vm2518_vm2, %v2516_v0 }
  0x61   :  { %2282 = vmatmul.mubr.msk.bf16.gmra.mrb[44].mxu0 %vm131_vm3, %v2484_v29  ;;  %2338 = vmatmul.mubr.msk.bf16.gmra.mrb[44].mxu1 %vm131_vm3, %v2485_v30 }
  0x62   :  { %2285 = vmatprep.mubr.msk.bf16.mxu0 %vm2518_vm2, %v2516_v0  ;;  %2341 = vmatprep.mubr.msk.bf16.mxu1 %vm2518_vm2, %v2516_v0 }
  0x69   :  { %2286 = vmatmul.mubr.msk.bf16.gmra.mrb[48].mxu0 %vm131_vm3, %v2486_v31  ;;  %2342 = vmatmul.mubr.msk.bf16.gmra.mrb[48].mxu1 %vm131_vm3, %v2487_v32 }
  0x6a   :  { %2349 = vmatprep.mubr.msk.bf16.mxu0 %vm2518_vm2, %v2516_v0  ;;  %2405 = vmatprep.mubr.msk.bf16.mxu1 %vm2518_vm2, %v2516_v0 }
  0x71   :  { %2350 = vmatmul.mubr.msk.bf16.vlgmr.msra.gmra.mrb[52].mxu0 %vm131_vm3, %v2488_v33  ;;  %2406 = vmatmul.mubr.msk.bf16.vlgmr.msra.gmra.mrb[52].mxu1 %vm131_vm3, %v2489_v34 }
  0x72   :  { %2353 = vmatprep.mubr.msk.bf16.mxu0 %vm2518_vm2, %v2516_v0  ;;  %2409 = vmatprep.mubr.msk.bf16.mxu1 %vm2518_vm2, %v2516_v0 }
  0x79   :  { %2354 = vmatmul.mubr.msk.bf16.gmra.mrb[56].mxu0 %vm131_vm3, %v2490_v35  ;;  %2410 = vmatmul.mubr.msk.bf16.gmra.mrb[56].mxu1 %vm131_vm3, %v2491_v36 }
  0x7a   :  { %2357 = vmatprep.mubr.msk.bf16.mxu0 %vm2518_vm2, %v2516_v0  ;;  %2413 = vmatprep.mubr.msk.bf16.mxu1 %vm2518_vm2, %v2516_v0 }
  0x81   :  { %2358 = vmatmul.mubr.msk.bf16.gmra.mrb[60].mxu0 %vm131_vm3, %v2492_v37  ;;  %2414 = vmatmul.mubr.msk.bf16.gmra.mrb[60].mxu1 %vm131_vm3, %v2493_v38 }
  0x82   :  { %2361 = vmatprep.mubr.msk.bf16.mxu0 %vm2518_vm2, %v2516_v0  ;;  %2417 = vmatprep.mubr.msk.bf16.mxu1 %vm2518_vm2, %v2516_v0 }
  0x89   :  { %2362 = vmatmul.mubr.msk.bf16.gmra.mrb[64].mxu0 %vm131_vm3, %v2494_v39  ;;  %2418 = vmatmul.mubr.msk.bf16.gmra.mrb[64].mxu1 %vm131_vm3, %v2495_v40 }
  0x8a   :  { %2365 = vmatprep.mubr.msk.bf16.mxu0 %vm2518_vm2, %v2516_v0  ;;  %2421 = vmatprep.mubr.msk.bf16.mxu1 %vm2518_vm2, %v2516_v0 }
  0x91   :  { %2366 = vmatmul.mubr.msk.bf16.gmra.mrb[68].mxu0 %vm131_vm3, %v2496_v41  ;;  %2422 = vmatmul.mubr.msk.bf16.gmra.mrb[68].mxu1 %vm131_vm3, %v2497_v42 }
  0x92   :  { %2369 = vmatprep.mubr.msk.bf16.mxu0 %vm2518_vm2, %v2516_v0  ;;  %2425 = vmatprep.mubr.msk.bf16.mxu1 %vm2518_vm2, %v2516_v0 }
  0x99   :  { %2370 = vmatmul.mubr.msk.bf16.gmra.mrb[72].mxu0 %vm131_vm3, %v2498_v43  ;;  %2426 = vmatmul.mubr.msk.bf16.gmra.mrb[72].mxu1 %vm131_vm3, %v2499_v44 }
  0x9a   :  { %2373 = vmatprep.mubr.msk.bf16.mxu0 %vm2518_vm2, %v2516_v0  ;;  %2429 = vmatprep.mubr.msk.bf16.mxu1 %vm2518_vm2, %v2516_v0 }
  0xa1   :  { %2374 = vmatmul.mubr.msk.bf16.gmra.mrb[76].mxu0 %vm131_vm3, %v2500_v45  ;;  %2430 = vmatmul.mubr.msk.bf16.gmra.mrb[76].mxu1 %vm131_vm3, %v2501_v46 }
  0xa2   :  { %2377 = vmatprep.mubr.msk.bf16.mxu0 %vm2518_vm2, %v2516_v0  ;;  %2433 = vmatprep.mubr.msk.bf16.mxu1 %vm2518_vm2, %v2516_v0 }
  0xa9   :  { %2378 = vmatmul.mubr.msk.bf16.gmra.mrb[80].mxu0 %vm131_vm3, %v2502_v47  ;;  %2434 = vmatmul.mubr.msk.bf16.gmra.mrb[80].mxu1 %vm131_vm3, %v2503_v48 }
  0xaa   :  { %2381 = vmatprep.mubr.msk.bf16.mxu0 %vm2518_vm2, %v2516_v0  ;;  %2437 = vmatprep.mubr.msk.bf16.mxu1 %vm2518_vm2, %v2516_v0 }
  0xb1   :  { %2382 = vmatmul.mubr.msk.bf16.gmra.mrb[84].mxu0 %vm131_vm3, %v2504_v49  ;;  %2438 = vmatmul.mubr.msk.bf16.gmra.mrb[84].mxu1 %vm131_vm3, %v2505_v50 }
  0xb2   :  { %2385 = vmatprep.mubr.msk.bf16.mxu0 %vm2518_vm2, %v2516_v0  ;;  %2441 = vmatprep.mubr.msk.bf16.mxu1 %vm2518_vm2, %v2516_v0 }
  0xb9   :  { %2386 = vmatmul.mubr.msk.bf16.gmra.mrb[88].mxu0 %vm131_vm3, %v2506_v51  ;;  %2442 = vmatmul.mubr.msk.bf16.gmra.mrb[88].mxu1 %vm131_vm3, %v2507_v52 }
  0xba   :  { %2389 = vmatprep.mubr.msk.bf16.mxu0 %vm2518_vm2, %v2516_v0  ;;  %2445 = vmatprep.mubr.msk.bf16.mxu1 %vm2518_vm2, %v2516_v0 }
  0xc1   :  { %2390 = vmatmul.mubr.msk.bf16.gmra.mrb[92].mxu0 %vm131_vm3, %v2508_v53  ;;  %2446 = vmatmul.mubr.msk.bf16.gmra.mrb[92].mxu1 %vm131_vm3, %v2509_v54 }
  0xc2   :  { %2393 = vmatprep.mubr.msk.bf16.mxu0 %vm2518_vm2, %v2516_v0  ;;  %2449 = vmatprep.mubr.msk.bf16.mxu1 %vm2518_vm2, %v2516_v0 }
  0xc9   :  { %2394 = vmatmul.mubr.msk.bf16.gmra.mrb[96].mxu0 %vm131_vm3, %v2510_v55  ;;  %2450 = vmatmul.mubr.msk.bf16.gmra.mrb[96].mxu1 %vm131_vm3, %v2511_v56 }
  0xca   :  { %2397 = vmatprep.mubr.msk.bf16.mxu0 %vm2518_vm2, %v2516_v0  ;;  %2453 = vmatprep.mubr.msk.bf16.mxu1 %vm2518_vm2, %v2516_v0 }
  0xd1   :  { %2398 = vmatmul.mubr.msk.bf16.gmra.mrb[100].mxu0 %vm131_vm3, %v2512_v57  ;;  %2454 = vmatmul.mubr.msk.bf16.gmra.mrb[100].mxu1 %vm131_vm3, %v2513_v58 }
  0xdc   :  { %v2875_v59 = vpop.f32.mrb[0].mxu0  ;;  %v2877_v60 = vpop.f32.mrb[0].mxu1 }
  0xdd   :  { %v2239_v61 = vpop.f32.mrb[1].mxu0  ;;  %v2295_v62 = vpop.f32.mrb[1].mxu1 }
  0xde   :  { %v2879_v63 = vpop.f32.mrb[2].mxu0  ;;  %v2881_v0 = vpop.f32.mrb[2].mxu1 }
  0xdf   :  { %v2240_v1 = vpop.f32.mrb[3].mxu0  ;;  %v2296_v2 = vpop.f32.mrb[3].mxu1 }
  0xe4   :  { %v2883_v3 = vpop.f32.mrb[4].mxu0  ;;  %v2885_v4 = vpop.f32.mrb[4].mxu1 }
  0xe5   :  { %v2243_v5 = vpop.f32.mrb[5].mxu0  ;;  %v2299_v6 = vpop.f32.mrb[5].mxu1 }
  0xe6   :  { %v2887_v7 = vpop.f32.mrb[6].mxu0  ;;  %v2889_v8 = vpop.f32.mrb[6].mxu1 }
  0xe7   :  { %v2244_v9 = vpop.f32.mrb[7].mxu0  ;;  %v2300_v10 = vpop.f32.mrb[7].mxu1 }
  0xec   :  { %v2891_v11 = vpop.f32.mrb[8].mxu0  ;;  %v2893_v12 = vpop.f32.mrb[8].mxu1 }
  0xed   :  { %v2247_v13 = vpop.f32.mrb[9].mxu0  ;;  %v2303_v14 = vpop.f32.mrb[9].mxu1 }
  0xee   :  { %v2895_v15 = vpop.f32.mrb[10].mxu0  ;;  %v2897_v16 = vpop.f32.mrb[10].mxu1 }
  0xef   :  { %v2248_v17 = vpop.f32.mrb[11].mxu0  ;;  %v2304_v18 = vpop.f32.mrb[11].mxu1 }
  0xf4   :  { %v2899_v19 = vpop.f32.mrb[12].mxu0  ;;  %v2901_v20 = vpop.f32.mrb[12].mxu1 }
  0xf5   :  { %v2251_v21 = vpop.f32.mrb[13].mxu0  ;;  %v2307_v22 = vpop.f32.mrb[13].mxu1 }
  0xf6   :  { %v2903_v23 = vpop.f32.mrb[14].mxu0  ;;  %v2905_v24 = vpop.f32.mrb[14].mxu1 }
  0xf7   :  { %v2252_v25 = vpop.f32.mrb[15].mxu0  ;;  %v2308_v26 = vpop.f32.mrb[15].mxu1 }
  0xfc   :  { %v2907_v27 = vpop.f32.mrb[16].mxu0  ;;  %v2909_v28 = vpop.f32.mrb[16].mxu1 }
  0xfd   :  { %v2255_v29 = vpop.f32.mrb[17].mxu0  ;;  %v2311_v30 = vpop.f32.mrb[17].mxu1 }
  0xfe   :  { %v2911_v31 = vpop.f32.mrb[18].mxu0  ;;  %v2913_v32 = vpop.f32.mrb[18].mxu1 }
  0xff   :  { %v2256_v33 = vpop.f32.mrb[19].mxu0  ;;  %v2312_v34 = vpop.f32.mrb[19].mxu1 }
 0x104   :  { %v2915_v35 = vpop.f32.mrb[20].mxu0  ;;  %v2917_v36 = vpop.f32.mrb[20].mxu1 }
 0x105   :  { %v2259_v37 = vpop.f32.mrb[21].mxu0  ;;  %v2315_v38 = vpop.f32.mrb[21].mxu1 }
 0x106   :  { %v2919_v39 = vpop.f32.mrb[22].mxu0  ;;  %v2921_v40 = vpop.f32.mrb[22].mxu1 }
 0x107   :  { %v2260_v41 = vpop.f32.mrb[23].mxu0  ;;  %v2316_v42 = vpop.f32.mrb[23].mxu1 }
 0x10c   :  { %v2923_v43 = vpop.f32.mrb[24].mxu0  ;;  %v2925_v44 = vpop.f32.mrb[24].mxu1 }
 0x10d   :  { %v2263_v45 = vpop.f32.mrb[25].mxu0  ;;  %v2319_v46 = vpop.f32.mrb[25].mxu1 }
 0x10e   :  { %v2927_v47 = vpop.f32.mrb[26].mxu0  ;;  %v2929_v48 = vpop.f32.mrb[26].mxu1 }
 0x10f   :  { %v2264_v49 = vpop.f32.mrb[27].mxu0  ;;  %v2320_v50 = vpop.f32.mrb[27].mxu1 }
 0x114   :  { %v2931_v51 = vpop.f32.mrb[28].mxu0  ;;  %v2933_v52 = vpop.f32.mrb[28].mxu1 }
 0x115   :  { %v2267_v53 = vpop.f32.mrb[29].mxu0  ;;  %v2323_v54 = vpop.f32.mrb[29].mxu1 }
 0x116   :  { %v2935_v55 = vpop.f32.mrb[30].mxu0  ;;  %v2937_v56 = vpop.f32.mrb[30].mxu1 }
 0x117   :  { %v2268_v57 = vpop.f32.mrb[31].mxu0  ;;  %v2324_v58 = vpop.f32.mrb[31].mxu1 }
 0x11c   :  { %v2939_v61 = vpop.f32.mrb[32].mxu0  ;;  %v2941_v62 = vpop.f32.mrb[32].mxu1 }
 0x11d   :  { %v2271_v1 = vpop.f32.mrb[33].mxu0  ;;  %v2327_v2 = vpop.f32.mrb[33].mxu1 }
 0x11e   :  { %v2943_v5 = vpop.f32.mrb[34].mxu0  ;;  %v2945_v6 = vpop.f32.mrb[34].mxu1 }
 0x11f   :  { %v2272_v9 = vpop.f32.mrb[35].mxu0  ;;  %v2328_v10 = vpop.f32.mrb[35].mxu1 }
 0x124   :  { %v2947_v13 = vpop.f32.mrb[36].mxu0  ;;  %v2949_v14 = vpop.f32.mrb[36].mxu1 }
 0x125   :  { %v2275_v17 = vpop.f32.mrb[37].mxu0  ;;  %v2331_v18 = vpop.f32.mrb[37].mxu1 }
 0x126   :  { %v2951_v21 = vpop.f32.mrb[38].mxu0  ;;  %v2953_v22 = vpop.f32.mrb[38].mxu1 }
 0x127   :  { %v2276_v25 = vpop.f32.mrb[39].mxu0  ;;  %v2332_v26 = vpop.f32.mrb[39].mxu1 }
 0x12c   :  { %v2955_v29 = vpop.f32.mrb[40].mxu0  ;;  %v2957_v30 = vpop.f32.mrb[40].mxu1 }
 0x12d   :  { %v2279_v33 = vpop.f32.mrb[41].mxu0  ;;  %v2335_v34 = vpop.f32.mrb[41].mxu1 }
 0x12e   :  { %v2959_v37 = vpop.f32.mrb[42].mxu0  ;;  %v2961_v38 = vpop.f32.mrb[42].mxu1 }
 0x12f   :  { %v2280_v41 = vpop.f32.mrb[43].mxu0  ;;  %v2336_v42 = vpop.f32.mrb[43].mxu1 }
 0x134   :  { %v2963_v45 = vpop.f32.mrb[44].mxu0  ;;  %v2965_v46 = vpop.f32.mrb[44].mxu1 }
 0x135   :  { %4987 = vst [vmem:[#allocation2_spill] sm:$0xff] %v2963_v45  ;;  %4988 = vst [vmem:[#allocation3_spill] sm:$0xff] %v2965_v46  ;;  %v2283_v49 = vpop.f32.mrb[45].mxu0  ;;  %v2339_v50 = vpop.f32.mrb[45].mxu1 }
 0x136   :  { %v2967_v53 = vpop.f32.mrb[46].mxu0  ;;  %v2969_v54 = vpop.f32.mrb[46].mxu1 }
 0x137   :  { %4989 = vst [vmem:[#allocation4_spill] sm:$0xff] %v2967_v53  ;;  %4990 = vst [vmem:[#allocation5_spill] sm:$0xff] %v2969_v54  ;;  %v2284_v57 = vpop.f32.mrb[47].mxu0  ;;  %v2340_v58 = vpop.f32.mrb[47].mxu1 }
 0x13c   :  { %v2971_v1 = vpop.f32.mrb[48].mxu0  ;;  %v2973_v2 = vpop.f32.mrb[48].mxu1 }
 0x13d   :  { %4991 = vst [vmem:[#allocation6_spill] sm:$0xff] %v2971_v1  ;;  %4992 = vst [vmem:[#allocation7_spill] sm:$0xff] %v2973_v2  ;;  %v2287_v9 = vpop.f32.mrb[49].mxu0  ;;  %v2343_v10 = vpop.f32.mrb[49].mxu1 }
 0x13e   :  { %v311_v17 = vpop.f32.mrb[50].mxu0  ;;  %v575_v18 = vpop.f32.mrb[50].mxu1  ;;  %v2978_v9 = vld [vmem:[%s4824_s2] ss:$0 sm:$0xff] }
 0x13f   :  { %v2288_v25 = vpop.f32.mrb[51].mxu0  ;;  %v2344_v26 = vpop.f32.mrb[51].mxu1  ;;  %v2982_v18 = vadd.f32 %v2978_v9, %v2879_v63  ;;  %v3002_v63 = vadd.f32 %v2978_v9, %v2885_v4  ;;  %v3017_v4 = vadd.f32 %v2978_v9, %v2887_v7  ;;  %v3030_v7 = vadd.f32 %v2978_v9, %v2891_v11 }
 0x141   :  { %4993 = vst [vmem:[#allocation8_spill] sm:$0xff] %v2982_v18  ;;  %4996 = vst [vmem:[#allocation11_spill] sm:$0xff] %v3002_v63 }
 0x144   :  { %v740_v33 = vpop.f32.mrb[52].mxu0  ;;  %v1004_v34 = vpop.f32.mrb[52].mxu1 }
 0x145   :  { %v2351_v41 = vpop.f32.mrb[53].mxu0  ;;  %v2407_v42 = vpop.f32.mrb[53].mxu1 }
 0x146   :  { %v743_v49 = vpop.f32.mrb[54].mxu0  ;;  %v1007_v50 = vpop.f32.mrb[54].mxu1  ;;  %v3010_v41 = vadd.f32 %v2978_v9, %v740_v33 }
 0x147   :  { %v2352_v53 = vpop.f32.mrb[55].mxu0  ;;  %v2408_v54 = vpop.f32.mrb[55].mxu1  ;;  %v3005_v25 = vadd.f32 %v2978_v9, %v743_v49  ;;  %v3021_v49 = vadd.f32 %v2978_v9, %v2889_v8  ;;  %v3034_v8 = vadd.f32 %v2978_v9, %v2893_v12 }
 0x148   :  { %v2986_v53 = vadd.f32 %v2978_v9, %v2881_v0  ;;  %v2994_v54 = vadd.f32 %v2978_v9, %v2877_v60  ;;  %4998 = vst [vmem:[#allocation13_spill] sm:$0xff] %v3010_v41 }
 0x149   :  { %4997 = vst [vmem:[#allocation12_spill] sm:$0xff] %v3005_v25  ;;  %5000 = vst [vmem:[#allocation15_spill] sm:$0xff] %v3034_v8  ;;  %v1109_v12 = vadd.f32 %v3021_v49, %v3017_v4 }
 0x14a   :  { %4994 = vst [vmem:[#allocation9_spill] sm:$0xff] %v2986_v53  ;;  %4995 = vst [vmem:[#allocation10_spill] sm:$0xff] %v2994_v54 }
 0x14c   :  { %v748_v57 = vpop.f32.mrb[56].mxu0  ;;  %v1012_v58 = vpop.f32.mrb[56].mxu1 }
 0x14d   :  { %v2355_v46 = vpop.f32.mrb[57].mxu0  ;;  %v2411_v1 = vpop.f32.mrb[57].mxu1  ;;  %v3013_v60 = vadd.f32 %v2978_v9, %v748_v57  ;;  %v3048_v11 = vadd.f32 %v2978_v9, %v1012_v58  ;;  %v3065_v58 = vadd.f32 %v2978_v9, %v2897_v16 }
 0x14e   :  { %v751_v45 = vpop.f32.mrb[58].mxu0  ;;  %v1015_v2 = vpop.f32.mrb[58].mxu1  ;;  %v2990_v46 = vadd.f32 %v2978_v9, %v2875_v59  ;;  %v2998_v1 = vadd.f32 %v2978_v9, %v2883_v3  ;;  %v1107_v59 = vadd.f32 %v2986_v53, %v2982_v18  ;;  %v3037_v18 = vadd.f32 %v2978_v9, %v1004_v34 }
 0x14f   :  { %v2356_v10 = vpop.f32.mrb[59].mxu0  ;;  %v2412_v17 = vpop.f32.mrb[59].mxu1  ;;  %4999 = vst [vmem:[#allocation14_spill] sm:$0xff] %v3013_v60  ;;  %5004 = vst [vmem:[#allocation19_spill] sm:$0xff] %v3048_v11 }
 0x150   :  { %v1106_v53 = vadd.f32 %v2994_v54, %v2990_v46  ;;  %v1108_v33 = vadd.f32 %v3002_v63, %v2998_v1  ;;  %v1132_v57 = vadd.f32 %v1107_v59, %v3005_v25  ;;  %5001 = vst [vmem:[#allocation16_spill] sm:$0xff] %v3037_v18  ;;  %v3040_v54 = vadd.f32 %v2978_v9, %v751_v45 }
 0x151   :  { %v3044_v59 = vadd.f32 %v2978_v9, %v1007_v50  ;;  %v1110_v45 = vadd.f32 %v3034_v8, %v3030_v7 }
 0x152   :  { %5002 = vst [vmem:[#allocation17_spill] sm:$0xff] %v3040_v54  ;;  %v1131_v63 = vadd.f32 %v1106_v53, %v3010_v41  ;;  %v1134_v53 = vadd.f32 %v1109_v12, %v3040_v54  ;;  %v3071_v41 = vadd.f32 %v2978_v9, %v2899_v19  ;;  %v3075_v12 = vadd.f32 %v2978_v9, %v2901_v20 }
 0x153   :  { %5003 = vst [vmem:[#allocation18_spill] sm:$0xff] %v3044_v59 }
 0x154   :  { %v756_v0 = vpop.f32.mrb[60].mxu0  ;;  %v1020_v26 = vpop.f32.mrb[60].mxu1 }
 0x155   :  { %v2359_v3 = vpop.f32.mrb[61].mxu0  ;;  %v2415_v42 = vpop.f32.mrb[61].mxu1  ;;  %v3054_v34 = vadd.f32 %v2978_v9, %v756_v0 }
 0x156   :  { %v759_v10 = vpop.f32.mrb[62].mxu0  ;;  %v1023_v17 = vpop.f32.mrb[62].mxu1 }
 0x157   :  { %v2360_v3 = vpop.f32.mrb[63].mxu0  ;;  %v2416_v42 = vpop.f32.mrb[63].mxu1  ;;  %5005 = vst [vmem:[#allocation20_spill] sm:$0xff] %v3054_v34  ;;  %v3086_v19 = vadd.f32 %v2978_v9, %v759_v10  ;;  %v3100_v10 = vadd.f32 %v2978_v9, %v2903_v23 }
 0x158   :  { %v1133_v3 = vadd.f32 %v1108_v33, %v3013_v60  ;;  %v1157_v42 = vadd.f32 %v1132_v57, %v3044_v59  ;;  %v3061_v33 = vadd.f32 %v2978_v9, %v2895_v15  ;;  %v1156_v57 = vadd.f32 %v1131_v63, %v3037_v18 }
 0x159   :  { %v3078_v15 = vadd.f32 %v2978_v9, %v1015_v2  ;;  %5008 = vst [vmem:[#allocation23_spill] sm:$0xff] %v3086_v19 }
 0x15a   :  { %v1158_v0 = vadd.f32 %v1133_v3, %v3048_v11  ;;  %v1183_v63 = vsel %vm1181_vm4, %v1157_v42, 0.0  ;;  %v1135_v3 = vadd.f32 %v1110_v45, %v3054_v34  ;;  %v1111_v2 = vadd.f32 %v3065_v58, %v3061_v33 }
 0x15b   :  { %5006 = vst [vmem:[#allocation21_spill] sm:$0xff] %v3078_v15  ;;  %v1159_v20 = vadd.f32 %v1134_v53, %v3078_v15  ;;  %v1182_v18 = vsel %vm1181_vm4, %v1156_v57, 0.0 }
 0x15c   :  { %v764_v50 = vpop.f32.mrb[64].mxu0  ;;  %v1028_v25 = vpop.f32.mrb[64].mxu1  ;;  %v1185_v8 = vsel %vm1181_vm4, %v1158_v0, 0.0  ;;  %v1184_v45 = vadd.f32 %v1183_v63, %v1182_v18  ;;  %v1136_v57 = vadd.f32 %v1111_v2, %v3086_v19  ;;  %v3114_v0 = vadd.f32 %v2978_v9, %v2909_v28 }
 0x15d   :  { %v2363_v59 = vpop.f32.mrb[65].mxu0  ;;  %v2419_v60 = vpop.f32.mrb[65].mxu1  ;;  %v3094_v42 = vadd.f32 %v2978_v9, %v764_v50  ;;  %v3110_v50 = vadd.f32 %v2978_v9, %v2907_v27  ;;  %v1187_v23 = vsel %vm1181_vm4, %v1159_v20, 0.0  ;;  %v3122_v2 = vadd.f32 %v2978_v9, %v1028_v25 }
 0x15e   :  { %v767_v16 = vpop.f32.mrb[66].mxu0  ;;  %v1031_v54 = vpop.f32.mrb[66].mxu1  ;;  %v3083_v60 = vadd.f32 %v2978_v9, %v1020_v26  ;;  %v1112_v26 = vadd.f32 %v3075_v12, %v3071_v41  ;;  %5010 = vst [vmem:[#allocation25_spill] sm:$0xff] %v3114_v0  ;;  %v1186_v18 = vadd.f32 %v1185_v8, %v1184_v45 }
 0x15f   :  { %v2364_v59 = vpop.f32.mrb[67].mxu0  ;;  %v2420_v11 = vpop.f32.mrb[67].mxu1  ;;  %5009 = vst [vmem:[#allocation24_spill] sm:$0xff] %v3094_v42  ;;  %5012 = vst [vmem:[#allocation27_spill] sm:$0xff] %v3122_v2  ;;  %v3125_v27 = vadd.f32 %v2978_v9, %v767_v16  ;;  %v3136_v16 = vadd.f32 %v2978_v9, %v2911_v31  ;;  %v3152_v31 = vadd.f32 %v2978_v9, %v2917_v36 }
 0x160   :  { %5007 = vst [vmem:[#allocation22_spill] sm:$0xff] %v3083_v60  ;;  %v3104_v11 = vadd.f32 %v2978_v9, %v2905_v24  ;;  %v1160_v53 = vadd.f32 %v1135_v3, %v3083_v60  ;;  %v3118_v24 = vadd.f32 %v2978_v9, %v1023_v17  ;;  %v1137_v3 = vadd.f32 %v1112_v26, %v3094_v42 }
 0x161   :  { %5013 = vst [vmem:[#allocation28_spill] sm:$0xff] %v3125_v27  ;;  %v1114_v42 = vadd.f32 %v3114_v0, %v3110_v50  ;;  %5016 = vst [vmem:[#allocation31_spill] sm:$0xff] %v3152_v31 }
 0x162   :  { %5011 = vst [vmem:[#allocation26_spill] sm:$0xff] %v3118_v24  ;;  %v1113_v8 = vadd.f32 %v3104_v11, %v3100_v10  ;;  %v1189_v20 = vsel %vm1181_vm4, %v1160_v53, 0.0  ;;  %v1161_v17 = vadd.f32 %v1136_v57, %v3118_v24  ;;  %v1162_v53 = vadd.f32 %v1137_v3, %v3122_v2 }
 0x164   :  { %v772_v63 = vpop.f32.mrb[68].mxu0  ;;  %v1036_v59 = vpop.f32.mrb[68].mxu1  ;;  %v1138_v57 = vadd.f32 %v1113_v8, %v3125_v27  ;;  %v3177_v27 = vadd.f32 %v2978_v9, %v2919_v39 }
 0x165   :  { %v2367_v60 = vpop.f32.mrb[69].mxu0  ;;  %v2423_v15 = vpop.f32.mrb[69].mxu1  ;;  %v3132_v45 = vadd.f32 %v2978_v9, %v772_v63  ;;  %v3148_v63 = vadd.f32 %v2978_v9, %v2915_v35  ;;  %v3163_v8 = vadd.f32 %v2978_v9, %v1036_v59 }
 0x166   :  { %v775_v28 = vpop.f32.mrb[70].mxu0  ;;  %v1039_v19 = vpop.f32.mrb[70].mxu1  ;;  %v3140_v15 = vadd.f32 %v2978_v9, %v2913_v32  ;;  %v1188_v60 = vadd.f32 %v1187_v23, %v1186_v18  ;;  %v1191_v18 = vsel %vm1181_vm4, %v1161_v17, 0.0  ;;  %v3159_v23 = vadd.f32 %v2978_v9, %v1031_v54 }
 0x167   :  { %5014 = vst [vmem:[#allocation29_spill] sm:$0xff] %v3132_v45  ;;  %v2368_v26 = vpop.f32.mrb[71].mxu0  ;;  %v2424_v25 = vpop.f32.mrb[71].mxu1  ;;  %v3155_v32 = vadd.f32 %v2978_v9, %v775_v28  ;;  %v1139_v3 = vadd.f32 %v1114_v42, %v3132_v45  ;;  %5019 = vst [vmem:[#allocation34_spill] sm:$0xff] %v3163_v8  ;;  %v1116_v45 = vadd.f32 %v3152_v31, %v3148_v63 }
 0x168   :  { %5015 = vst [vmem:[#allocation30_spill] sm:$0xff] %v3140_v15  ;;  %v1190_v26 = vadd.f32 %v1189_v20, %v1188_v60  ;;  %5018 = vst [vmem:[#allocation33_spill] sm:$0xff] %v3159_v23  ;;  %v1115_v35 = vadd.f32 %v3140_v15, %v3136_v16  ;;  %v1193_v20 = vsel %vm1181_vm4, %v1162_v53, 0.0  ;;  %v1163_v28 = vadd.f32 %v1138_v57, %v3159_v23 }
 0x169   :  { %5017 = vst [vmem:[#allocation32_spill] sm:$0xff] %v3155_v32  ;;  %v3181_v53 = vadd.f32 %v2978_v9, %v2921_v40  ;;  %v1164_v57 = vadd.f32 %v1139_v3, %v3163_v8  ;;  %v3193_v39 = vadd.f32 %v2978_v9, %v1039_v19 }
 0x16a   :  { %v1192_v2 = vadd.f32 %v1191_v18, %v1190_v26  ;;  %v1140_v42 = vadd.f32 %v1115_v35, %v3155_v32  ;;  %v3186_v26 = vadd.f32 %v2978_v9, %v2923_v43  ;;  %v3190_v18 = vadd.f32 %v2978_v9, %v2925_v44 }
 0x16b   :  { %5021 = vst [vmem:[#allocation36_spill] sm:$0xff] %v3181_v53  ;;  %5023 = vst [vmem:[#allocation38_spill] sm:$0xff] %v3193_v39  ;;  %v1117_v44 = vadd.f32 %v3181_v53, %v3177_v27 }
 0x16c   :  { %v780_v25 = vpop.f32.mrb[72].mxu0  ;;  %v1044_v36 = vpop.f32.mrb[72].mxu1  ;;  %5022 = vst [vmem:[#allocation37_spill] sm:$0xff] %v3190_v18  ;;  %v1194_v35 = vadd.f32 %v1193_v20, %v1192_v2  ;;  %v1165_v43 = vadd.f32 %v1140_v42, %v3193_v39  ;;  %v1197_v2 = vsel %vm1181_vm4, %v1164_v57, 0.0  ;;  %v1118_v19 = vadd.f32 %v3190_v18, %v3186_v26 }
 0x16d   :  { %v3170_v60 = vadd.f32 %v2978_v9, %v780_v25  ;;  %v2371_v17 = vpop.f32.mrb[73].mxu0  ;;  %v2427_v54 = vpop.f32.mrb[73].mxu1  ;;  %v3198_v3 = vadd.f32 %v2978_v9, %v1044_v36  ;;  %v3211_v20 = vadd.f32 %v2978_v9, %v2927_v47 }
 0x16e   :  { %v783_v24 = vpop.f32.mrb[74].mxu0  ;;  %v1047_v59 = vpop.f32.mrb[74].mxu1  ;;  %v1195_v54 = vsel %vm1181_vm4, %v1163_v28, 0.0  ;;  %v1199_v47 = vsel %vm1181_vm4, %v1165_v43, 0.0 }
 0x16f   :  { %5020 = vst [vmem:[#allocation35_spill] sm:$0xff] %v3170_v60  ;;  %v2372_v25 = vpop.f32.mrb[75].mxu0  ;;  %v2428_v17 = vpop.f32.mrb[75].mxu1  ;;  %v1141_v40 = vadd.f32 %v1116_v45, %v3170_v60  ;;  %5024 = vst [vmem:[#allocation39_spill] sm:$0xff] %v3198_v3  ;;  %v1196_v45 = vadd.f32 %v1195_v54, %v1194_v35  ;;  %v3224_v54 = vadd.f32 %v2978_v9, %v1047_v59 }
 0x170   :  { %v3201_v25 = vadd.f32 %v2978_v9, %v783_v24  ;;  %v3215_v24 = vadd.f32 %v2978_v9, %v2929_v48 }
 0x171   :  { %v1166_v42 = vadd.f32 %v1141_v40, %v3198_v3  ;;  %v1198_v23 = vadd.f32 %v1197_v2, %v1196_v45  ;;  %5028 = vst [vmem:[#allocation43_spill] sm:$0xff] %v3224_v54 }
 0x172   :  { %5025 = vst [vmem:[#allocation40_spill] sm:$0xff] %v3201_v25  ;;  %5026 = vst [vmem:[#allocation41_spill] sm:$0xff] %v3215_v24  ;;  %v1142_v17 = vadd.f32 %v1117_v44, %v3201_v25  ;;  %v1119_v59 = vadd.f32 %v3215_v24, %v3211_v20 }
 0x173   :  { %v1201_v43 = vsel %vm1181_vm4, %v1166_v42, 0.0 }
 0x174   :  { %v788_v36 = vpop.f32.mrb[76].mxu0  ;;  %v1052_v28 = vpop.f32.mrb[76].mxu1  ;;  %v1167_v2 = vadd.f32 %v1142_v17, %v3224_v54 }
 0x175   :  { %v3220_v57 = vadd.f32 %v2978_v9, %v788_v36  ;;  %v2375_v39 = vpop.f32.mrb[77].mxu0  ;;  %v2431_v8 = vpop.f32.mrb[77].mxu1  ;;  %v3228_v32 = vadd.f32 %v2978_v9, %v1052_v28 }
 0x176   :  { %v791_v60 = vpop.f32.mrb[78].mxu0  ;;  %v1055_v35 = vpop.f32.mrb[78].mxu1  ;;  %v3235_v8 = vadd.f32 %v2978_v9, %v2931_v51  ;;  %v3239_v39 = vadd.f32 %v2978_v9, %v2933_v52  ;;  %v1200_v51 = vadd.f32 %v1199_v47, %v1198_v23  ;;  %v1203_v17 = vsel %vm1181_vm4, %v1167_v2, 0.0 }
 0x177   :  { %5027 = vst [vmem:[#allocation42_spill] sm:$0xff] %v3220_v57  ;;  %v1143_v48 = vadd.f32 %v1118_v19, %v3220_v57  ;;  %5029 = vst [vmem:[#allocation44_spill] sm:$0xff] %v3228_v32  ;;  %v3231_v40 = vadd.f32 %v2978_v9, %v791_v60  ;;  %v2376_v44 = vpop.f32.mrb[79].mxu0  ;;  %v2432_v36 = vpop.f32.mrb[79].mxu1  ;;  %v3247_v60 = vadd.f32 %v2978_v9, %v2935_v55 }
 0x178   :  { %5031 = vst [vmem:[#allocation46_spill] sm:$0xff] %v3239_v39  ;;  %v3251_v19 = vadd.f32 %v2978_v9, %v2937_v56  ;;  %v1120_v28 = vadd.f32 %v3239_v39, %v3235_v8  ;;  %v1202_v44 = vadd.f32 %v1201_v43, %v1200_v51  ;;  %v3259_v55 = vadd.f32 %v2978_v9, %v1055_v35 }
 0x179   :  { %5030 = vst [vmem:[#allocation45_spill] sm:$0xff] %v3231_v40  ;;  %v1168_v45 = vadd.f32 %v1143_v48, %v3228_v32  ;;  %v1144_v52 = vadd.f32 %v1119_v59, %v3231_v40 }
 0x17a   :  { %5032 = vst [vmem:[#allocation47_spill] sm:$0xff] %v3251_v19  ;;  %5033 = vst [vmem:[#allocation48_spill] sm:$0xff] %v3259_v55  ;;  %v1121_v48 = vadd.f32 %v3251_v19, %v3247_v60 }
 0x17b   :  { %v1205_v51 = vsel %vm1181_vm4, %v1168_v45, 0.0  ;;  %v1169_v2 = vadd.f32 %v1144_v52, %v3259_v55 }
 0x17c   :  { %v796_v42 = vpop.f32.mrb[80].mxu0  ;;  %v1060_v36 = vpop.f32.mrb[80].mxu1 }
 0x17d   :  { %v3262_v54 = vadd.f32 %v2978_v9, %v796_v42  ;;  %v3265_v56 = vadd.f32 %v2978_v9, %v1060_v36  ;;  %v2379_v23 = vpop.f32.mrb[81].mxu0  ;;  %v2435_v47 = vpop.f32.mrb[81].mxu1  ;;  %v3277_v36 = vadd.f32 %v2978_v9, %v2939_v61  ;;  %v1207_v61 = vsel %vm1181_vm4, %v1169_v2, 0.0 }
 0x17e   :  { %v799_v59 = vpop.f32.mrb[82].mxu0  ;;  %v1063_v43 = vpop.f32.mrb[82].mxu1  ;;  %v3281_v23 = vadd.f32 %v2978_v9, %v2941_v62  ;;  %v1204_v47 = vadd.f32 %v1203_v17, %v1202_v44 }
 0x17f   :  { %5034 = vst [vmem:[#allocation49_spill] sm:$0xff] %v3262_v54  ;;  %5035 = vst [vmem:[#allocation50_spill] sm:$0xff] %v3265_v56  ;;  %v1145_v35 = vadd.f32 %v1120_v28, %v3262_v54  ;;  %v3273_v32 = vadd.f32 %v2978_v9, %v799_v59  ;;  %v2380_v42 = vpop.f32.mrb[83].mxu0  ;;  %v2436_v3 = vpop.f32.mrb[83].mxu1  ;;  %v3287_v28 = vadd.f32 %v2978_v9, %v2943_v5 }
 0x180   :  { %5037 = vst [vmem:[#allocation52_spill] sm:$0xff] %v3281_v23  ;;  %v1206_v55 = vadd.f32 %v1205_v51, %v1204_v47  ;;  %v3291_v3 = vadd.f32 %v2978_v9, %v2945_v6  ;;  %v3295_v59 = vadd.f32 %v2978_v9, %v1063_v43  ;;  %v1122_v62 = vadd.f32 %v3281_v23, %v3277_v36 }
 0x181   :  { %5036 = vst [vmem:[#allocation51_spill] sm:$0xff] %v3273_v32  ;;  %v1170_v45 = vadd.f32 %v1145_v35, %v3265_v56  ;;  %v1146_v52 = vadd.f32 %v1121_v48, %v3273_v32 }
 0x182   :  { %5038 = vst [vmem:[#allocation53_spill] sm:$0xff] %v3291_v3  ;;  %5039 = vst [vmem:[#allocation54_spill] sm:$0xff] %v3295_v59  ;;  %v1208_v42 = vadd.f32 %v1207_v61, %v1206_v55  ;;  %v1123_v56 = vadd.f32 %v3291_v3, %v3287_v28  ;;  %v5055_v3 = vld [vmem:[#allocation6_spill] sm:$0xff] }
 0x183   :  { %v1209_v48 = vsel %vm1181_vm4, %v1170_v45, 0.0  ;;  %v1171_v51 = vadd.f32 %v1146_v52, %v3295_v59 }
 0x184   :  { %v804_v44 = vpop.f32.mrb[84].mxu0  ;;  %v1068_v17 = vpop.f32.mrb[84].mxu1  ;;  %v1210_v55 = vadd.f32 %v1209_v48, %v1208_v42 }
 0x185   :  { %v3302_v5 = vadd.f32 %v2978_v9, %v804_v44  ;;  %v3305_v6 = vadd.f32 %v2978_v9, %v1068_v17  ;;  %v2383_v35 = vpop.f32.mrb[85].mxu0  ;;  %v2439_v2 = vpop.f32.mrb[85].mxu1  ;;  %v3315_v44 = vadd.f32 %v2978_v9, %v2947_v13  ;;  %v3319_v17 = vadd.f32 %v2978_v9, %v2949_v14 }
 0x186   :  { %v807_v43 = vpop.f32.mrb[86].mxu0  ;;  %v1071_v47 = vpop.f32.mrb[86].mxu1  ;;  %v1211_v61 = vsel %vm1181_vm4, %v1171_v51, 0.0  ;;  %v3333_v13 = vadd.f32 %v2978_v9, %v2953_v22 }
 0x187   :  { %5040 = vst [vmem:[#allocation55_spill] sm:$0xff] %v3302_v5  ;;  %5041 = vst [vmem:[#allocation56_spill] sm:$0xff] %v3305_v6  ;;  %v1147_v32 = vadd.f32 %v1122_v62, %v3302_v5  ;;  %v3311_v45 = vadd.f32 %v2978_v9, %v807_v43  ;;  %v2384_v52 = vpop.f32.mrb[87].mxu0  ;;  %v2440_v59 = vpop.f32.mrb[87].mxu1  ;;  %v3325_v2 = vadd.f32 %v2978_v9, %v1071_v47 }
 0x188   :  { %5043 = vst [vmem:[#allocation58_spill] sm:$0xff] %v3319_v17  ;;  %v3329_v59 = vadd.f32 %v2978_v9, %v2951_v21  ;;  %5045 = vst [vmem:[#allocation60_spill] sm:$0xff] %v3333_v13  ;;  %v1212_v51 = vadd.f32 %v1211_v61, %v1210_v55 }
 0x189   :  { %5042 = vst [vmem:[#allocation57_spill] sm:$0xff] %v3311_v45  ;;  %v1172_v35 = vadd.f32 %v1147_v32, %v3305_v6  ;;  %v1148_v62 = vadd.f32 %v1123_v56, %v3311_v45  ;;  %5044 = vst [vmem:[#allocation59_spill] sm:$0xff] %v3325_v2  ;;  %v1124_v56 = vadd.f32 %v3319_v17, %v3315_v44 }
 0x18b   :  { %v1213_v14 = vsel %vm1181_vm4, %v1172_v35, 0.0  ;;  %v1173_v48 = vadd.f32 %v1148_v62, %v3325_v2  ;;  %v1125_v35 = vadd.f32 %v3333_v13, %v3329_v59 }
 0x18c   :  { %v812_v42 = vpop.f32.mrb[88].mxu0  ;;  %v1076_v32 = vpop.f32.mrb[88].mxu1  ;;  %v1214_v22 = vadd.f32 %v1213_v14, %v1212_v51  ;;  %v3358_v14 = vadd.f32 %v2978_v9, %v2957_v30 }
 0x18d   :  { %v3340_v43 = vadd.f32 %v2978_v9, %v812_v42  ;;  %v3343_v21 = vadd.f32 %v2978_v9, %v1076_v32  ;;  %v2387_v47 = vpop.f32.mrb[89].mxu0  ;;  %v2443_v52 = vpop.f32.mrb[89].mxu1  ;;  %v1215_v55 = vsel %vm1181_vm4, %v1173_v48, 0.0  ;;  %v3354_v32 = vadd.f32 %v2978_v9, %v2955_v29 }
 0x18e   :  { %v815_v6 = vpop.f32.mrb[90].mxu0  ;;  %v1079_v45 = vpop.f32.mrb[90].mxu1  ;;  %5047 = vst [vmem:[#allocation62_spill] sm:$0xff] %v3358_v14  ;;  %v3371_v29 = vadd.f32 %v2978_v9, %v2961_v38 }
 0x18f   :  { %5046 = vst [vmem:[#allocation61_spill] sm:$0xff] %v3343_v21  ;;  %v1149_v61 = vadd.f32 %v1124_v56, %v3340_v43  ;;  %v3350_v62 = vadd.f32 %v2978_v9, %v815_v6  ;;  %v2388_v42 = vpop.f32.mrb[91].mxu0  ;;  %v2444_v2 = vpop.f32.mrb[91].mxu1  ;;  %v3363_v48 = vadd.f32 %v2978_v9, %v1079_v45  ;;  %v1216_v56 = vadd.f32 %v1215_v55, %v1214_v22 }
 0x190   :  { %v3367_v6 = vadd.f32 %v2978_v9, %v2959_v37  ;;  %5048 = vst [vmem:[#allocation63_spill] sm:$0xff] %v3371_v29  ;;  %v1126_v45 = vadd.f32 %v3358_v14, %v3354_v32 }
 0x191   :  { %v1174_v51 = vadd.f32 %v1149_v61, %v3343_v21  ;;  %v1150_v47 = vadd.f32 %v1125_v35, %v3350_v62 }
 0x193   :  { %v1217_v2 = vsel %vm1181_vm4, %v1174_v51, 0.0  ;;  %v1175_v30 = vadd.f32 %v1150_v47, %v3363_v48  ;;  %v1127_v47 = vadd.f32 %v3371_v29, %v3367_v6 }
 0x194   :  { %v1218_v52 = vadd.f32 %v1217_v2, %v1216_v56  ;;  %v820_v61 = vpop.f32.mrb[92].mxu0  ;;  %v1084_v42 = vpop.f32.mrb[92].mxu1 }
 0x195   :  { %v1219_v22 = vsel %vm1181_vm4, %v1175_v30, 0.0  ;;  %v3379_v35 = vadd.f32 %v2978_v9, %v820_v61  ;;  %v3382_v37 = vadd.f32 %v2978_v9, %v1084_v42  ;;  %v2391_v38 = vpop.f32.mrb[93].mxu0  ;;  %v2447_v55 = vpop.f32.mrb[93].mxu1  ;;  %v5049_v61 = vld [vmem:[#allocation2_spill] sm:$0xff]  ;;  %v5050_v42 = vld [vmem:[#allocation3_spill] sm:$0xff] }
 0x196   :  { %v1220_v21 = vadd.f32 %v1219_v22, %v1218_v52  ;;  %v823_v51 = vpop.f32.mrb[94].mxu0  ;;  %v1087_v5 = vpop.f32.mrb[94].mxu1  ;;  %v3392_v40 = vadd.f32 %v2978_v9, %v5049_v61  ;;  %v3396_v38 = vadd.f32 %v2978_v9, %v5050_v42 }
 0x197   :  { %v1151_v56 = vadd.f32 %v1126_v45, %v3379_v35  ;;  %v3388_v2 = vadd.f32 %v2978_v9, %v823_v51  ;;  %v2392_v30 = vpop.f32.mrb[95].mxu0  ;;  %v2448_v54 = vpop.f32.mrb[95].mxu1  ;;  %v3401_v55 = vadd.f32 %v2978_v9, %v1087_v5  ;;  %v5052_v45 = vld [vmem:[#allocation4_spill] sm:$0xff] }
 0x198   :  { %5051 = vst [vmem:[#allocation2_spill] sm:$0xff] %v3396_v38  ;;  %v3405_v51 = vadd.f32 %v2978_v9, %v5052_v45  ;;  %v5053_v54 = vld [vmem:[#allocation5_spill] sm:$0xff] }
 0x199   :  { %v1176_v52 = vadd.f32 %v1151_v56, %v3382_v37  ;;  %v1152_v22 = vadd.f32 %v1127_v47, %v3388_v2  ;;  %v3409_v30 = vadd.f32 %v2978_v9, %v5053_v54  ;;  %v1128_v47 = vadd.f32 %v3396_v38, %v3392_v40 }
 0x19b   :  { %5054 = vst [vmem:[#allocation3_spill] sm:$0xff] %v3409_v30  ;;  %v1221_v61 = vsel %vm1181_vm4, %v1176_v52, 0.0  ;;  %v1177_v42 = vadd.f32 %v1152_v22, %v3401_v55 }
 0x19c   :  { %v1222_v57 = vadd.f32 %v1221_v61, %v1220_v21  ;;  %v828_v25 = vpop.f32.mrb[96].mxu0  ;;  %v1092_v56 = vpop.f32.mrb[96].mxu1  ;;  %v1129_v21 = vadd.f32 %v3409_v30, %v3405_v51 }
 0x19d   :  { %v1223_v5 = vsel %vm1181_vm4, %v1177_v42, 0.0  ;;  %v829_v34 = vadd.f32 %v2978_v9, %v828_v25  ;;  %v3418_v45 = vadd.f32 %v2978_v9, %v1092_v56  ;;  %v2395_v29 = vpop.f32.mrb[97].mxu0  ;;  %v2451_v54 = vpop.f32.mrb[97].mxu1  ;;  %v3425_v42 = vadd.f32 %v2978_v9, %v5055_v3  ;;  %v5056_v25 = vld [vmem:[#allocation7_spill] sm:$0xff] }
 0x19e   :  { %v1224_v14 = vadd.f32 %v1223_v5, %v1222_v57  ;;  %v831_v13 = vpop.f32.mrb[98].mxu0  ;;  %v1095_v52 = vpop.f32.mrb[98].mxu1  ;;  %v3429_v56 = vadd.f32 %v2978_v9, %v5056_v25 }
 0x19f   :  { %v1153_v22 = vadd.f32 %v1128_v47, %v829_v34  ;;  %v832_v61 = vadd.f32 %v2978_v9, %v831_v13  ;;  %v2396_v17 = vpop.f32.mrb[99].mxu0  ;;  %v2452_v38 = vpop.f32.mrb[99].mxu1  ;;  %v1096_v5 = vadd.f32 %v2978_v9, %v1095_v52 }
 0x1a0   :  { %5057 = vst [vmem:[#allocation4_spill] sm:$0xff] %v3429_v56  ;;  %v1130_v38 = vadd.f32 %v3429_v56, %v3425_v42 }
 0x1a1   :  { %v1178_v57 = vadd.f32 %v1153_v22, %v3418_v45  ;;  %v1154_v29 = vadd.f32 %v1129_v21, %v832_v61 }
 0x1a3   :  { %v1225_v54 = vsel %vm1181_vm4, %v1178_v57, 0.0  ;;  %v1179_v47 = vadd.f32 %v1154_v29, %v1096_v5 }
 0x1a4   :  { %v1226_v30 = vadd.f32 %v1225_v54, %v1224_v14  ;;  %v836_v13 = vpop.f32.mrb[100].mxu0  ;;  %v1100_v17 = vpop.f32.mrb[100].mxu1 }
 0x1a5   :  { %v1227_v3 = vsel %vm1181_vm4, %v1179_v47, 0.0  ;;  %v837_v23 = vadd.f32 %v2978_v9, %v836_v13  ;;  %v1101_v25 = vadd.f32 %v2978_v9, %v1100_v17  ;;  %v2399_v19 = vpop.f32.mrb[101].mxu0  ;;  %v2455_v22 = vpop.f32.mrb[101].mxu1  ;;  %v5098_v17 = vld [vmem:[#allocation11_spill] sm:$0xff] }
 0x1a6   :  { %v1228_v21 = vadd.f32 %v1227_v3, %v1226_v30  ;;  %v839_v39 = vpop.f32.mrb[102].mxu0  ;;  %v1103_v52 = vpop.f32.mrb[102].mxu1 }
 0x1a7   :  { %v1155_v24 = vadd.f32 %v1130_v38, %v837_v23  ;;  %v2400_v57 = vpop.f32.mrb[103].mxu0  ;;  %v2456_v29 = vpop.f32.mrb[103].mxu1  ;;  %v5099_v38 = vld [vmem:[#allocation15_spill] sm:$0xff]  ;;  %v5101_v52 = vld [vmem:[#allocation30_spill] sm:$0xff] }
 0x1a8   :  { %v5102_v29 = vld [vmem:[#allocation31_spill] sm:$0xff] }
 0x1a9   :  { %v1180_v14 = vadd.f32 %v1155_v24, %v1101_v25 }
 0x1ab   :  { %v1229_v54 = vsel %vm1181_vm4, %v1180_v14, 0.0  ;;  %v5104_v14 = vld [vmem:[#allocation36_spill] sm:$0xff] }
 0x1ac   :  { %v1230_v18 = vadd.f32 %v1229_v54, %v1228_v21  ;;  %v5100_v21 = vld [vmem:[#allocation25_spill] sm:$0xff] }
 0x1ad   :  { %v5106_v54 = vld [vmem:[#allocation37_spill] sm:$0xff] }
 0x1ae   :  { %v1231_v53 = vrot.slane %v1230_v18, 4 }
 0x1b0   :  { %v1232_v56 = vadd.f32 %v1231_v53, %v1230_v18 }
 0x1b2   :  { %v1233_v31 = vrot.slane %v1232_v56, 2 }
 0x1b4   :  { %v1234_v47 = vadd.f32 %v1233_v31, %v1232_v56  ;;  %v5094_v56 = vld [vmem:[#allocation10_spill] sm:$0xff] }
 0x1b6   :  { %v1235_v15 = vrot.slane %v1234_v47, 1 }
 0x1b8   :  { %v1236_v13 = vadd.f32 %v1235_v15, %v1234_v47  ;;  %v5108_v47 = vld [vmem:[#allocation41_spill] sm:$0xff] }
 0x1ba   :  { %v3440_v0 = vmul.f32 0.00125, %v1236_v13 }
 0x1bc   :  { %5058 = vst [vmem:[#allocation5_spill] sm:$0xff] %v3440_v0  ;;  %v3444_v9 = vsub.f32 %v3340_v43, %v3440_v0  ;;  %v3448_v39 = vsub.f32 %v3350_v62, %v3440_v0  ;;  %v3452_v24 = vsub.f32 %v3379_v35, %v3440_v0  ;;  %v3456_v53 = vsub.f32 %v3388_v2, %v3440_v0  ;;  %v5067_v43 = vld [vmem:[#allocation8_spill] sm:$0xff] }
 0x1bd   :  { %v3459_v15 = vsub.f32 %v829_v34, %v3440_v0  ;;  %v3462_v31 = vsub.f32 %v832_v61, %v3440_v0  ;;  %v3465_v18 = vsub.f32 %v837_v23, %v3440_v0  ;;  %v3469_v19 = vsub.f32 %v2990_v46, %v3440_v0 }
 0x1be   :  { %5059 = vst [vmem:[#allocation6_spill] sm:$0xff] %v3444_v9  ;;  %5060 = vst [vmem:[#allocation7_spill] sm:$0xff] %v3448_v39  ;;  %v3473_v62 = vsub.f32 %v5067_v43, %v3440_v0  ;;  %v3477_v35 = vsub.f32 %v2998_v1, %v3440_v0  ;;  %v3481_v34 = vsub.f32 %v3017_v4, %v3440_v0  ;;  %v5110_v43 = vld [vmem:[#allocation46_spill] sm:$0xff] }
 0x1bf   :  { %5061 = vst [vmem:[#allocation64_spill] sm:$0xff] %v3452_v24  ;;  %5062 = vst [vmem:[#allocation65_spill] sm:$0xff] %v3456_v53  ;;  %v3485_v23 = vsub.f32 %v3030_v7, %v3440_v0  ;;  %v3489_v46 = vsub.f32 %v3061_v33, %v3440_v0  ;;  %v3493_v2 = vsub.f32 %v3071_v41, %v3440_v0 }
 0x1c0   :  { %5063 = vst [vmem:[#allocation66_spill] sm:$0xff] %v3459_v15  ;;  %5064 = vst [vmem:[#allocation67_spill] sm:$0xff] %v3462_v31  ;;  %v3497_v1 = vsub.f32 %v3100_v10, %v3440_v0  ;;  %v3501_v4 = vsub.f32 %v3110_v50, %v3440_v0  ;;  %v3505_v7 = vsub.f32 %v3136_v16, %v3440_v0 }
 0x1c1   :  { %5065 = vst [vmem:[#allocation68_spill] sm:$0xff] %v3465_v18  ;;  %5066 = vst [vmem:[#allocation69_spill] sm:$0xff] %v3469_v19  ;;  %v3509_v33 = vsub.f32 %v3148_v63, %v3440_v0  ;;  %v3513_v41 = vsub.f32 %v3177_v27, %v3440_v0  ;;  %v3517_v10 = vsub.f32 %v3186_v26, %v3440_v0 }
 0x1c2   :  { %5068 = vst [vmem:[#allocation8_spill] sm:$0xff] %v3473_v62  ;;  %5069 = vst [vmem:[#allocation70_spill] sm:$0xff] %v3477_v35  ;;  %v3521_v50 = vsub.f32 %v3363_v48, %v3440_v0  ;;  %v3525_v16 = vsub.f32 %v3382_v37, %v3440_v0  ;;  %v3529_v63 = vsub.f32 %v3401_v55, %v3440_v0 }
 0x1c3   :  { %5070 = vst [vmem:[#allocation71_spill] sm:$0xff] %v3481_v34  ;;  %5071 = vst [vmem:[#allocation72_spill] sm:$0xff] %v3485_v23  ;;  %v3533_v27 = vsub.f32 %v3418_v45, %v3440_v0  ;;  %v3536_v30 = vsub.f32 %v1096_v5, %v3440_v0  ;;  %v3539_v26 = vsub.f32 %v1101_v25, %v3440_v0  ;;  %v5096_v5 = vld [vmem:[#allocation9_spill] sm:$0xff] }
 0x1c4   :  { %5072 = vst [vmem:[#allocation73_spill] sm:$0xff] %v3489_v46  ;;  %5073 = vst [vmem:[#allocation74_spill] sm:$0xff] %v3493_v2  ;;  %v3543_v48 = vsub.f32 %v3211_v20, %v3440_v0  ;;  %v3547_v37 = vsub.f32 %v3235_v8, %v3440_v0  ;;  %v3551_v55 = vsub.f32 %v3247_v60, %v3440_v0 }
 0x1c5   :  { %5074 = vst [vmem:[#allocation75_spill] sm:$0xff] %v3497_v1  ;;  %5075 = vst [vmem:[#allocation76_spill] sm:$0xff] %v3501_v4  ;;  %v3555_v45 = vsub.f32 %v3277_v36, %v3440_v0  ;;  %v3559_v61 = vsub.f32 %v3287_v28, %v3440_v0  ;;  %v3563_v20 = vsub.f32 %v3315_v44, %v3440_v0 }
 0x1c6   :  { %5076 = vst [vmem:[#allocation77_spill] sm:$0xff] %v3505_v7  ;;  %5077 = vst [vmem:[#allocation78_spill] sm:$0xff] %v3509_v33  ;;  %v3567_v8 = vsub.f32 %v3329_v59, %v3440_v0  ;;  %v3571_v60 = vsub.f32 %v3354_v32, %v3440_v0  ;;  %v3575_v36 = vsub.f32 %v3367_v6, %v3440_v0 }
 0x1c7   :  { %5078 = vst [vmem:[#allocation79_spill] sm:$0xff] %v3513_v41  ;;  %5079 = vst [vmem:[#allocation80_spill] sm:$0xff] %v3517_v10  ;;  %v3579_v28 = vsub.f32 %v3392_v40, %v3440_v0  ;;  %v3583_v44 = vsub.f32 %v3405_v51, %v3440_v0  ;;  %v3587_v59 = vsub.f32 %v3425_v42, %v3440_v0 }
 0x1c8   :  { %5080 = vst [vmem:[#allocation81_spill] sm:$0xff] %v3521_v50  ;;  %5081 = vst [vmem:[#allocation82_spill] sm:$0xff] %v3525_v16  ;;  %v3591_v32 = vsub.f32 %v5094_v56, %v3440_v0  ;;  %v3595_v6 = vsub.f32 %v5096_v5, %v3440_v0  ;;  %v3599_v40 = vsub.f32 %v5098_v17, %v3440_v0  ;;  %v5112_v5 = vld [vmem:[#allocation47_spill] sm:$0xff]  ;;  %v5146_v16 = vld [vmem:[#allocation28_spill] sm:$0xff] }
 0x1c9   :  { %5082 = vst [vmem:[#allocation83_spill] sm:$0xff] %v3529_v63  ;;  %5083 = vst [vmem:[#allocation84_spill] sm:$0xff] %v3533_v27  ;;  %v3603_v51 = vsub.f32 %v3021_v49, %v3440_v0  ;;  %v3607_v42 = vsub.f32 %v5099_v38, %v3440_v0  ;;  %v3611_v3 = vsub.f32 %v3065_v58, %v3440_v0  ;;  %v5114_v38 = vld [vmem:[#allocation52_spill] sm:$0xff]  ;;  %v5142_v27 = vld [vmem:[#allocation23_spill] sm:$0xff] }
 0x1ca   :  { %5084 = vst [vmem:[#allocation85_spill] sm:$0xff] %v3536_v30  ;;  %5085 = vst [vmem:[#allocation86_spill] sm:$0xff] %v3539_v26  ;;  %v3615_v25 = vsub.f32 %v3075_v12, %v3440_v0  ;;  %v3619_v22 = vsub.f32 %v3104_v11, %v3440_v0  ;;  %v3623_v49 = vsub.f32 %v5100_v21, %v3440_v0  ;;  %v5138_v26 = vld [vmem:[#allocation17_spill] sm:$0xff]  ;;  %v5140_v30 = vld [vmem:[#allocation20_spill] sm:$0xff] }
 0x1cb   :  { %5086 = vst [vmem:[#allocation87_spill] sm:$0xff] %v3543_v48  ;;  %5087 = vst [vmem:[#allocation88_spill] sm:$0xff] %v3563_v20  ;;  %v3627_v57 = vsub.f32 %v5101_v52, %v3440_v0  ;;  %v3631_v58 = vsub.f32 %v5102_v29, %v3440_v0  ;;  %v3635_v12 = vsub.f32 %v5104_v14, %v3440_v0  ;;  %v5116_v52 = vld [vmem:[#allocation53_spill] sm:$0xff]  ;;  %v5118_v14 = vld [vmem:[#allocation58_spill] sm:$0xff] }
 0x1cc   :  { %5088 = vst [vmem:[#allocation89_spill] sm:$0xff] %v3567_v8  ;;  %5089 = vst [vmem:[#allocation90_spill] sm:$0xff] %v3571_v60  ;;  %v3639_v11 = vsub.f32 %v5106_v54, %v3440_v0  ;;  %v3643_v13 = vsub.f32 %v5108_v47, %v3440_v0  ;;  %v3647_v56 = vsub.f32 %v5110_v43, %v3440_v0  ;;  %v5120_v47 = vld [vmem:[#allocation60_spill] sm:$0xff]  ;;  %v5148_v50 = vld [vmem:[#allocation29_spill] sm:$0xff] }
 0x1cd   :  { %5090 = vst [vmem:[#allocation91_spill] sm:$0xff] %v3575_v36  ;;  %5091 = vst [vmem:[#allocation92_spill] sm:$0xff] %v3579_v28  ;;  %v3651_v17 = vsub.f32 %v5112_v5, %v3440_v0  ;;  %v3655_v21 = vsub.f32 %v5114_v38, %v3440_v0  ;;  %v3659_v29 = vsub.f32 %v5116_v52, %v3440_v0  ;;  %v5144_v63 = vld [vmem:[#allocation24_spill] sm:$0xff] }
 0x1ce   :  { %5092 = vst [vmem:[#allocation93_spill] sm:$0xff] %v3583_v44  ;;  %5093 = vst [vmem:[#allocation94_spill] sm:$0xff] %v3587_v59  ;;  %v3663_v54 = vsub.f32 %v5118_v14, %v3440_v0  ;;  %v3667_v43 = vsub.f32 %v5120_v47, %v3440_v0 }
 0x1cf   :  { %5095 = vst [vmem:[#allocation10_spill] sm:$0xff] %v3591_v32  ;;  %5097 = vst [vmem:[#allocation9_spill] sm:$0xff] %v3595_v6 }
 0x1d0   :  { %5103 = vst [vmem:[#allocation11_spill] sm:$0xff] %v3631_v58  ;;  %5105 = vst [vmem:[#allocation15_spill] sm:$0xff] %v3635_v12  ;;  %v5134_v12 = vld [vmem:[#allocation12_spill] sm:$0xff]  ;;  %v5136_v58 = vld [vmem:[#allocation14_spill] sm:$0xff] }
 0x1d1   :  { %5107 = vst [vmem:[#allocation25_spill] sm:$0xff] %v3639_v11  ;;  %5109 = vst [vmem:[#allocation30_spill] sm:$0xff] %v3643_v13  ;;  %v5130_v13 = vld [vmem:[#allocation4_spill] sm:$0xff]  ;;  %v5132_v11 = vld [vmem:[#allocation13_spill] sm:$0xff] }
 0x1d2   :  { %5111 = vst [vmem:[#allocation31_spill] sm:$0xff] %v3647_v56  ;;  %5113 = vst [vmem:[#allocation36_spill] sm:$0xff] %v3651_v17  ;;  %v5122_v56 = vld [vmem:[#allocation62_spill] sm:$0xff]  ;;  %v5124_v17 = vld [vmem:[#allocation63_spill] sm:$0xff]  ;;  %v3687_v47 = vsub.f32 %v5130_v13, %v3440_v0  ;;  %v3707_v13 = vsub.f32 %v5140_v30, %v3440_v0 }
 0x1d3   :  { %5115 = vst [vmem:[#allocation37_spill] sm:$0xff] %v3655_v21  ;;  %5117 = vst [vmem:[#allocation41_spill] sm:$0xff] %v3659_v29  ;;  %v3671_v5 = vsub.f32 %v5122_v56, %v3440_v0  ;;  %v3675_v38 = vsub.f32 %v5124_v17, %v3440_v0  ;;  %v5126_v21 = vld [vmem:[#allocation2_spill] sm:$0xff]  ;;  %v5128_v29 = vld [vmem:[#allocation3_spill] sm:$0xff]  ;;  %v3691_v56 = vsub.f32 %v5132_v11, %v3440_v0 }
 0x1d4   :  { %5119 = vst [vmem:[#allocation46_spill] sm:$0xff] %v3663_v54  ;;  %5121 = vst [vmem:[#allocation47_spill] sm:$0xff] %v3667_v43  ;;  %v3679_v52 = vsub.f32 %v5126_v21, %v3440_v0  ;;  %v3683_v14 = vsub.f32 %v5128_v29, %v3440_v0  ;;  %v3695_v17 = vsub.f32 %v5134_v12, %v3440_v0 }
 0x1d5   :  { %5123 = vst [vmem:[#allocation52_spill] sm:$0xff] %v3671_v5  ;;  %5125 = vst [vmem:[#allocation53_spill] sm:$0xff] %v3675_v38  ;;  %v3699_v21 = vsub.f32 %v5136_v58, %v3440_v0  ;;  %v3703_v29 = vsub.f32 %v5138_v26, %v3440_v0  ;;  %v3711_v11 = vsub.f32 %v5142_v27, %v3440_v0 }
 0x1d6   :  { %5127 = vst [vmem:[#allocation58_spill] sm:$0xff] %v3679_v52  ;;  %5129 = vst [vmem:[#allocation60_spill] sm:$0xff] %v3683_v14  ;;  %v3715_v12 = vsub.f32 %v5144_v63, %v3440_v0  ;;  %v3719_v58 = vsub.f32 %v5146_v16, %v3440_v0  ;;  %v3723_v26 = vsub.f32 %v5148_v50, %v3440_v0 }
 0x1d7   :  { %5131 = vst [vmem:[#allocation62_spill] sm:$0xff] %v3687_v47  ;;  %5133 = vst [vmem:[#allocation63_spill] sm:$0xff] %v3691_v56 }
 0x1d8   :  { %5135 = vst [vmem:[#allocation2_spill] sm:$0xff] %v3695_v17  ;;  %5137 = vst [vmem:[#allocation3_spill] sm:$0xff] %v3699_v21 }
 0x1d9   :  { %5139 = vst [vmem:[#allocation4_spill] sm:$0xff] %v3703_v29  ;;  %5141 = vst [vmem:[#allocation13_spill] sm:$0xff] %v3707_v13  ;;  %v5150_v29 = vld [vmem:[#allocation32_spill] sm:$0xff]  ;;  %v5152_v13 = vld [vmem:[#allocation35_spill] sm:$0xff] }
 0x1da   :  { %5143 = vst [vmem:[#allocation12_spill] sm:$0xff] %v3711_v11  ;;  %5145 = vst [vmem:[#allocation14_spill] sm:$0xff] %v3715_v12  ;;  %v3727_v30 = vsub.f32 %v5150_v29, %v3440_v0  ;;  %v3731_v27 = vsub.f32 %v5152_v13, %v3440_v0  ;;  %v5154_v11 = vld [vmem:[#allocation40_spill] sm:$0xff]  ;;  %v5156_v12 = vld [vmem:[#allocation42_spill] sm:$0xff] }
 0x1db   :  { %5147 = vst [vmem:[#allocation17_spill] sm:$0xff] %v3719_v58  ;;  %5149 = vst [vmem:[#allocation20_spill] sm:$0xff] %v3723_v26  ;;  %v3735_v63 = vsub.f32 %v5154_v11, %v3440_v0  ;;  %v3739_v16 = vsub.f32 %v5156_v12, %v3440_v0  ;;  %v5158_v58 = vld [vmem:[#allocation45_spill] sm:$0xff] }
 0x1dc   :  { %5151 = vst [vmem:[#allocation23_spill] sm:$0xff] %v3727_v30  ;;  %5153 = vst [vmem:[#allocation24_spill] sm:$0xff] %v3731_v27  ;;  %v3743_v50 = vsub.f32 %v5158_v58, %v3440_v0  ;;  %v5160_v26 = vld [vmem:[#allocation49_spill] sm:$0xff]  ;;  %v5162_v30 = vld [vmem:[#allocation51_spill] sm:$0xff] }
 0x1dd   :  { %5155 = vst [vmem:[#allocation28_spill] sm:$0xff] %v3735_v63  ;;  %5157 = vst [vmem:[#allocation29_spill] sm:$0xff] %v3739_v16  ;;  %v3747_v29 = vsub.f32 %v5160_v26, %v3440_v0  ;;  %v3751_v13 = vsub.f32 %v5162_v30, %v3440_v0  ;;  %v5164_v27 = vld [vmem:[#allocation55_spill] sm:$0xff]  ;;  %v5166_v63 = vld [vmem:[#allocation57_spill] sm:$0xff] }
 0x1de   :  { %5159 = vst [vmem:[#allocation32_spill] sm:$0xff] %v3743_v50  ;;  %v3755_v11 = vsub.f32 %v5164_v27, %v3440_v0  ;;  %v3759_v12 = vsub.f32 %v5166_v63, %v3440_v0  ;;  %v5168_v16 = vld [vmem:[#allocation16_spill] sm:$0xff]  ;;  %v5170_v50 = vld [vmem:[#allocation18_spill] sm:$0xff] }
 0x1df   :  { %5161 = vst [vmem:[#allocation35_spill] sm:$0xff] %v3747_v29  ;;  %5163 = vst [vmem:[#allocation40_spill] sm:$0xff] %v3751_v13  ;;  %v3763_v58 = vsub.f32 %v5168_v16, %v3440_v0  ;;  %v3767_v26 = vsub.f32 %v5170_v50, %v3440_v0  ;;  %v5172_v29 = vld [vmem:[#allocation19_spill] sm:$0xff]  ;;  %v5174_v13 = vld [vmem:[#allocation21_spill] sm:$0xff] }
 0x1e0   :  { %5165 = vst [vmem:[#allocation42_spill] sm:$0xff] %v3755_v11  ;;  %5167 = vst [vmem:[#allocation45_spill] sm:$0xff] %v3759_v12  ;;  %v3771_v30 = vsub.f32 %v5172_v29, %v3440_v0  ;;  %v3775_v27 = vsub.f32 %v5174_v13, %v3440_v0  ;;  %v5176_v11 = vld [vmem:[#allocation22_spill] sm:$0xff] }
 0x1e1   :  { %5169 = vst [vmem:[#allocation49_spill] sm:$0xff] %v3763_v58  ;;  %5171 = vst [vmem:[#allocation51_spill] sm:$0xff] %v3767_v26  ;;  %v3779_v63 = vsub.f32 %v5176_v11, %v3440_v0  ;;  %v5178_v12 = vld [vmem:[#allocation26_spill] sm:$0xff]  ;;  %v5180_v58 = vld [vmem:[#allocation27_spill] sm:$0xff] }
 0x1e2   :  { %5173 = vst [vmem:[#allocation55_spill] sm:$0xff] %v3771_v30  ;;  %5175 = vst [vmem:[#allocation57_spill] sm:$0xff] %v3775_v27  ;;  %v3783_v16 = vsub.f32 %v5178_v12, %v3440_v0  ;;  %v3787_v50 = vsub.f32 %v5180_v58, %v3440_v0  ;;  %v5182_v26 = vld [vmem:[#allocation33_spill] sm:$0xff]  ;;  %v5184_v30 = vld [vmem:[#allocation34_spill] sm:$0xff] }
 0x1e3   :  { %5177 = vst [vmem:[#allocation16_spill] sm:$0xff] %v3779_v63  ;;  %v3791_v29 = vsub.f32 %v5182_v26, %v3440_v0  ;;  %v3795_v13 = vsub.f32 %v5184_v30, %v3440_v0  ;;  %v5186_v27 = vld [vmem:[#allocation38_spill] sm:$0xff]  ;;  %v5188_v63 = vld [vmem:[#allocation39_spill] sm:$0xff] }
 0x1e4   :  { %5179 = vst [vmem:[#allocation18_spill] sm:$0xff] %v3783_v16  ;;  %5181 = vst [vmem:[#allocation19_spill] sm:$0xff] %v3787_v50  ;;  %v3799_v11 = vsub.f32 %v5186_v27, %v3440_v0  ;;  %v3803_v12 = vsub.f32 %v5188_v63, %v3440_v0  ;;  %v5190_v16 = vld [vmem:[#allocation43_spill] sm:$0xff]  ;;  %v5192_v50 = vld [vmem:[#allocation44_spill] sm:$0xff] }
 0x1e5   :  { %5183 = vst [vmem:[#allocation21_spill] sm:$0xff] %v3791_v29  ;;  %5185 = vst [vmem:[#allocation22_spill] sm:$0xff] %v3795_v13  ;;  %v3807_v58 = vsub.f32 %v5190_v16, %v3440_v0  ;;  %v3811_v26 = vsub.f32 %v5192_v50, %v3440_v0  ;;  %v5194_v29 = vld [vmem:[#allocation48_spill] sm:$0xff]  ;;  %v5196_v13 = vld [vmem:[#allocation50_spill] sm:$0xff]  ;;  %v1338_v16 = vmul.f32 %v3469_v19, %v3469_v19 }
 0x1e6   :  { %5187 = vst [vmem:[#allocation26_spill] sm:$0xff] %v3799_v11  ;;  %5189 = vst [vmem:[#allocation27_spill] sm:$0xff] %v3803_v12  ;;  %v3815_v30 = vsub.f32 %v5194_v29, %v3440_v0  ;;  %v3819_v27 = vsub.f32 %v5196_v13, %v3440_v0  ;;  %v5198_v11 = vld [vmem:[#allocation61_spill] sm:$0xff]  ;;  %v1340_v50 = vmul.f32 %v3477_v35, %v3477_v35 }
 0x1e7   :  { %5191 = vst [vmem:[#allocation33_spill] sm:$0xff] %v3807_v58  ;;  %5193 = vst [vmem:[#allocation34_spill] sm:$0xff] %v3811_v26  ;;  %v3823_v63 = vsub.f32 %v5198_v11, %v3440_v0  ;;  %v1339_v58 = vmul.f32 %v3473_v62, %v3473_v62  ;;  %v3833_v29 = vmul.f32 %v3481_v34, %v3481_v34 }
 0x1e8   :  { %5195 = vst [vmem:[#allocation38_spill] sm:$0xff] %v3815_v30  ;;  %5197 = vst [vmem:[#allocation39_spill] sm:$0xff] %v3819_v27  ;;  %v3837_v13 = vmul.f32 %v3485_v23, %v3485_v23  ;;  %v3841_v11 = vmul.f32 %v3489_v46, %v3489_v46  ;;  %v3845_v19 = vmul.f32 %v3493_v2, %v3493_v2 }
 0x1e9   :  { %5199 = vst [vmem:[#allocation43_spill] sm:$0xff] %v3823_v63  ;;  %v3849_v62 = vmul.f32 %v3497_v1, %v3497_v1  ;;  %v3853_v34 = vmul.f32 %v3501_v4, %v3501_v4  ;;  %v1356_v23 = vmul.f32 %v3563_v20, %v3563_v20  ;;  %v1357_v35 = vmul.f32 %v3567_v8, %v3567_v8 }
 0x1ea   :  { %v1358_v46 = vmul.f32 %v3571_v60, %v3571_v60  ;;  %v1359_v2 = vmul.f32 %v3575_v36, %v3575_v36  ;;  %v1360_v1 = vmul.f32 %v3579_v28, %v3579_v28  ;;  %v1361_v27 = vmul.f32 %v3583_v44, %v3583_v44 }
 0x1eb   :  { %v1381_v4 = vmul.f32 %v3663_v54, %v3663_v54  ;;  %v1382_v20 = vmul.f32 %v3667_v43, %v3667_v43  ;;  %v1383_v8 = vmul.f32 %v3671_v5, %v3671_v5  ;;  %v1384_v60 = vmul.f32 %v3675_v38, %v3675_v38 }
 0x1ec   :  { %v1385_v36 = vmul.f32 %v3679_v52, %v3679_v52  ;;  %v1386_v28 = vmul.f32 %v3683_v14, %v3683_v14  ;;  %v3881_v44 = vmul.f32 %v3505_v7, %v3505_v7  ;;  %v3885_v54 = vmul.f32 %v3509_v33, %v3509_v33 }
 0x1ed   :  { %v1362_v5 = vmul.f32 %v3587_v59, %v3587_v59  ;;  %v1387_v38 = vmul.f32 %v3687_v47, %v3687_v47  ;;  %v3893_v52 = vmul.f32 %v3513_v41, %v3513_v41  ;;  %v3897_v14 = vmul.f32 %v3517_v10, %v3517_v10 }
 0x1ee   :  { %v3901_v43 = vmul.f32 %v3543_v48, %v3543_v48  ;;  %v1363_v33 = vmul.f32 %v3591_v32, %v3591_v32  ;;  %v1364_v59 = vmul.f32 %v3595_v6, %v3595_v6  ;;  %v1365_v47 = vmul.f32 %v3599_v40, %v3599_v40 }
 0x1ef   :  { %v1406_v7 = vadd.f32 %v1381_v4, %v1356_v23  ;;  %v1407_v41 = vadd.f32 %v1382_v20, %v1357_v35  ;;  %v1408_v30 = vadd.f32 %v1383_v8, %v1358_v46  ;;  %v1409_v0 = vadd.f32 %v1384_v60, %v1359_v2 }
 0x1f0   :  { %5200 = vst [vmem:[#allocation44_spill] sm:$0xff] %v3901_v43  ;;  %v1410_v26 = vadd.f32 %v1385_v36, %v1360_v1  ;;  %v1411_v10 = vadd.f32 %v1386_v28, %v1361_v27  ;;  %v1366_v12 = vmul.f32 %v3603_v51, %v3603_v51  ;;  %v1412_v48 = vadd.f32 %v1387_v38, %v1362_v5 }
 0x1f1   :  { %v1431_v43 = vmul.f32 %v3444_v9, %v3444_v9  ;;  %v1432_v32 = vmul.f32 %v3448_v39, %v3448_v39  ;;  %v1433_v6 = vmul.f32 %v3452_v24, %v3452_v24  ;;  %v1434_v35 = vmul.f32 %v3456_v53, %v3456_v53  ;;  %v5205_v53 = vld [vmem:[#allocation14_spill] sm:$0xff]  ;;  %v5207_v39 = vld [vmem:[#allocation55_spill] sm:$0xff] }
 0x1f2   :  { %v1435_v23 = vmul.f32 %v3459_v15, %v3459_v15  ;;  %v1436_v46 = vmul.f32 %v3462_v31, %v3462_v31  ;;  %v1367_v2 = vmul.f32 %v3607_v42, %v3607_v42  ;;  %v1437_v1 = vmul.f32 %v3465_v18, %v3465_v18  ;;  %v5210_v9 = vld [vmem:[#allocation82_spill] sm:$0xff] }
 0x1f3   :  { %v1456_v4 = vadd.f32 %v1431_v43, %v1406_v7  ;;  %v1457_v20 = vadd.f32 %v1432_v32, %v1407_v41  ;;  %v1458_v8 = vadd.f32 %v1433_v6, %v1408_v30  ;;  %v1459_v60 = vadd.f32 %v1434_v35, %v1409_v0  ;;  %v5201_v35 = vld [vmem:[#allocation4_spill] sm:$0xff] }
 0x1f4   :  { %v1460_v36 = vadd.f32 %v1435_v23, %v1410_v26  ;;  %v1461_v28 = vadd.f32 %v1436_v46, %v1411_v10  ;;  %v3929_v5 = vmul.f32 %v3547_v37, %v3547_v37  ;;  %v1368_v38 = vmul.f32 %v3611_v3, %v3611_v3 }
 0x1f5   :  { %v1388_v27 = vadd.f32 %v1363_v33, %v1338_v16  ;;  %v1462_v31 = vadd.f32 %v1437_v1, %v1412_v48  ;;  %v3935_v15 = vmul.f32 %v3551_v55, %v3551_v55  ;;  %v3939_v7 = vmul.f32 %v3555_v45, %v3555_v45 }
 0x1f6   :  { %v1369_v0 = vmul.f32 %v3615_v25, %v3615_v25  ;;  %v1389_v41 = vadd.f32 %v1364_v59, %v1339_v58  ;;  %v3945_v10 = vmul.f32 %v3559_v61, %v3559_v61  ;;  %v1370_v33 = vmul.f32 %v3619_v22, %v3619_v22 }
 0x1f7   :  { %v1390_v48 = vadd.f32 %v1365_v47, %v1340_v50  ;;  %v1413_v32 = vmul.f32 %v3691_v56, %v3691_v56  ;;  %v1371_v6 = vmul.f32 %v3623_v49, %v3623_v49  ;;  %v1391_v43 = vadd.f32 %v1366_v12, %v3833_v29  ;;  %v5202_v12 = vld [vmem:[#allocation13_spill] sm:$0xff] }
 0x1f8   :  { %v1392_v26 = vadd.f32 %v1367_v2, %v3837_v13  ;;  %v1414_v59 = vmul.f32 %v3695_v17, %v3695_v17  ;;  %v1372_v58 = vmul.f32 %v3627_v57, %v3627_v57  ;;  %v1393_v30 = vadd.f32 %v1368_v38, %v3841_v11  ;;  %v5203_v2 = vld [vmem:[#allocation12_spill] sm:$0xff]  ;;  %v5204_v11 = vld [vmem:[#allocation49_spill] sm:$0xff] }
 0x1f9   :  { %v1415_v47 = vmul.f32 %v3699_v21, %v3699_v21  ;;  %v1438_v16 = vadd.f32 %v1413_v32, %v1388_v27  ;;  %v1394_v50 = vadd.f32 %v1369_v0, %v3845_v19  ;;  %v1416_v23 = vmul.f32 %v5201_v35, %v5201_v35  ;;  %v5206_v32 = vld [vmem:[#allocation51_spill] sm:$0xff]  ;;  %v5215_v35 = vld [vmem:[#allocation16_spill] sm:$0xff] }
 0x1fa   :  { %v1417_v29 = vmul.f32 %v5202_v12, %v5202_v12  ;;  %v1439_v13 = vadd.f32 %v1414_v59, %v1389_v41  ;;  %v1395_v46 = vadd.f32 %v1370_v33, %v3849_v62  ;;  %v1418_v1 = vmul.f32 %v5203_v2, %v5203_v2  ;;  %v5208_v59 = vld [vmem:[#allocation57_spill] sm:$0xff]  ;;  %v5214_v2 = vld [vmem:[#allocation86_spill] sm:$0xff] }
 0x1fb   :  { %v1440_v18 = vadd.f32 %v1415_v47, %v1390_v48  ;;  %v1463_v38 = vmul.f32 %v5204_v11, %v5204_v11  ;;  %v1419_v27 = vmul.f32 %v5205_v53, %v5205_v53  ;;  %v1441_v19 = vadd.f32 %v1416_v23, %v1391_v43  ;;  %v5209_v47 = vld [vmem:[#allocation81_spill] sm:$0xff] }
 0x1fc   :  { %v1442_v0 = vadd.f32 %v1417_v29, %v1392_v26  ;;  %v1464_v24 = vmul.f32 %v5206_v32, %v5206_v32  ;;  %v1465_v41 = vmul.f32 %v5207_v39, %v5207_v39  ;;  %v1466_v62 = vmul.f32 %v5208_v59, %v5208_v59  ;;  %v5211_v26 = vld [vmem:[#allocation83_spill] sm:$0xff]  ;;  %v5212_v32 = vld [vmem:[#allocation84_spill] sm:$0xff]  ;;  %v5213_v53 = vld [vmem:[#allocation85_spill] sm:$0xff] }
 0x1fd   :  { %v1481_v33 = vmul.f32 %v3823_v63, %v3823_v63  ;;  %v1488_v48 = vadd.f32 %v1463_v38, %v1438_v16  ;;  %v1482_v11 = vmul.f32 %v5209_v47, %v5209_v47  ;;  %v1483_v43 = vmul.f32 %v5210_v9, %v5210_v9 }
 0x1fe   :  { %v1484_v23 = vmul.f32 %v5211_v26, %v5211_v26  ;;  %v1489_v29 = vadd.f32 %v1464_v24, %v1439_v13  ;;  %v1485_v39 = vmul.f32 %v5212_v32, %v5212_v32  ;;  %v1486_v59 = vmul.f32 %v5213_v53, %v5213_v53 }
 0x1ff   :  { %v1487_v63 = vmul.f32 %v5214_v2, %v5214_v2  ;;  %v1490_v16 = vadd.f32 %v1465_v41, %v1440_v18  ;;  %v3994_v38 = vadd.f32 %v1481_v33, %v1456_v4  ;;  %v3996_v47 = vadd.f32 %v1482_v11, %v1457_v20  ;;  %v5216_v11 = vld [vmem:[#allocation11_spill] sm:$0xff]  ;;  %v5220_v33 = vld [vmem:[#allocation20_spill] sm:$0xff] }
 0x200   :  { %v3998_v12 = vadd.f32 %v1483_v43, %v1458_v8  ;;  %v4000_v9 = vadd.f32 %v1484_v23, %v1459_v60  ;;  %v4002_v26 = vadd.f32 %v1485_v39, %v1460_v36  ;;  %v4004_v24 = vadd.f32 %v1486_v59, %v1461_v28  ;;  %v5217_v39 = vld [vmem:[#allocation17_spill] sm:$0xff]  ;;  %v5219_v59 = vld [vmem:[#allocation15_spill] sm:$0xff] }
 0x201   :  { %v4006_v13 = vadd.f32 %v1487_v63, %v1462_v31  ;;  %v1513_v53 = vsel %vm1181_vm4, %v1488_v48, 0.0  ;;  %v1443_v32 = vadd.f32 %v1418_v1, %v1393_v30  ;;  %v1467_v18 = vmul.f32 %v5215_v35, %v5215_v35  ;;  %v5218_v63 = vld [vmem:[#allocation18_spill] sm:$0xff]  ;;  %v5221_v43 = vld [vmem:[#allocation19_spill] sm:$0xff]  ;;  %v5222_v23 = vld [vmem:[#allocation25_spill] sm:$0xff] }
 0x202   :  { %v1491_v4 = vadd.f32 %v1466_v62, %v1441_v19  ;;  %v1514_v20 = vsel %vm1181_vm4, %v1489_v29, 0.0  ;;  %v1373_v8 = vmul.f32 %v5216_v11, %v5216_v11  ;;  %v1396_v60 = vadd.f32 %v1371_v6, %v3853_v34 }
 0x203   :  { %v1420_v36 = vmul.f32 %v5217_v39, %v5217_v39  ;;  %v1515_v28 = vadd.f32 %v1514_v20, %v1513_v53  ;;  %v1444_v31 = vadd.f32 %v1419_v27, %v1394_v50  ;;  %v1468_v41 = vmul.f32 %v5218_v63, %v5218_v63  ;;  %v5224_v20 = vld [vmem:[#allocation21_spill] sm:$0xff]  ;;  %v5230_v63 = vld [vmem:[#allocation26_spill] sm:$0xff] }
 0x204   :  { %v1492_v30 = vadd.f32 %v1467_v18, %v1442_v0  ;;  %v1516_v1 = vsel %vm1181_vm4, %v1490_v16, 0.0  ;;  %v1374_v19 = vmul.f32 %v5219_v59, %v5219_v59  ;;  %v1397_v62 = vadd.f32 %v1372_v58, %v3881_v44  ;;  %v5223_v16 = vld [vmem:[#allocation23_spill] sm:$0xff] }
 0x205   :  { %v1421_v48 = vmul.f32 %v5220_v33, %v5220_v33  ;;  %v1517_v34 = vadd.f32 %v1516_v1, %v1515_v28  ;;  %v1445_v6 = vadd.f32 %v1420_v36, %v1395_v46  ;;  %v1469_v53 = vmul.f32 %v5221_v43, %v5221_v43  ;;  %v5225_v1 = vld [vmem:[#allocation30_spill] sm:$0xff] }
 0x206   :  { %v1493_v50 = vadd.f32 %v1468_v41, %v1443_v32  ;;  %v1518_v27 = vsel %vm1181_vm4, %v1491_v4, 0.0  ;;  %v1375_v0 = vmul.f32 %v5222_v23, %v5222_v23  ;;  %v1398_v29 = vadd.f32 %v1373_v8, %v3885_v54  ;;  %v5226_v41 = vld [vmem:[#allocation24_spill] sm:$0xff]  ;;  %v5227_v43 = vld [vmem:[#allocation22_spill] sm:$0xff] }
 0x207   :  { %v1422_v18 = vmul.f32 %v5223_v16, %v5223_v16  ;;  %v1519_v44 = vadd.f32 %v1518_v27, %v1517_v34  ;;  %v1446_v58 = vadd.f32 %v1421_v48, %v1396_v60  ;;  %v1470_v28 = vmul.f32 %v5224_v20, %v5224_v20  ;;  %v5228_v27 = vld [vmem:[#allocation31_spill] sm:$0xff]  ;;  %v5290_v16 = vld [vmem:[#allocation62_spill] sm:$0xff] }
 0x208   :  { %v1494_v46 = vadd.f32 %v1469_v53, %v1444_v31  ;;  %v1520_v36 = vsel %vm1181_vm4, %v1492_v30, 0.0  ;;  %v1376_v32 = vmul.f32 %v5225_v1, %v5225_v1  ;;  %v1399_v4 = vadd.f32 %v1374_v19, %v3893_v52  ;;  %v5229_v53 = vld [vmem:[#allocation28_spill] sm:$0xff] }
 0x209   :  { %v1423_v2 = vmul.f32 %v5226_v41, %v5226_v41  ;;  %v1521_v54 = vadd.f32 %v1520_v36, %v1519_v44  ;;  %v1447_v8 = vadd.f32 %v1422_v18, %v1397_v62  ;;  %v1471_v34 = vmul.f32 %v5227_v43, %v5227_v43  ;;  %v5231_v36 = vld [vmem:[#allocation36_spill] sm:$0xff]  ;;  %v5233_v43 = vld [vmem:[#allocation29_spill] sm:$0xff]  ;;  %v5234_v41 = vld [vmem:[#allocation27_spill] sm:$0xff] }
 0x20a   :  { %v1495_v60 = vadd.f32 %v1470_v28, %v1445_v6  ;;  %v1522_v48 = vsel %vm1181_vm4, %v1493_v50, 0.0  ;;  %v1377_v31 = vmul.f32 %v5228_v27, %v5228_v27  ;;  %v1400_v30 = vadd.f32 %v1375_v0, %v3897_v14  ;;  %v5232_v50 = vld [vmem:[#allocation44_spill] sm:$0xff] }
 0x20b   :  { %v1424_v20 = vmul.f32 %v5229_v53, %v5229_v53  ;;  %v1523_v52 = vadd.f32 %v1522_v48, %v1521_v54  ;;  %v1448_v19 = vadd.f32 %v1423_v2, %v1398_v29  ;;  %v1472_v44 = vmul.f32 %v5230_v63, %v5230_v63  ;;  %v5235_v48 = vld [vmem:[#allocation37_spill] sm:$0xff] }
 0x20c   :  { %v1496_v62 = vadd.f32 %v1471_v34, %v1446_v58  ;;  %v1524_v18 = vsel %vm1181_vm4, %v1494_v46, 0.0  ;;  %v1378_v6 = vmul.f32 %v5231_v36, %v5231_v36  ;;  %v1401_v28 = vadd.f32 %v1376_v32, %v5232_v50  ;;  %v5236_v34 = vld [vmem:[#allocation32_spill] sm:$0xff]  ;;  %v5237_v53 = vld [vmem:[#allocation33_spill] sm:$0xff] }
 0x20d   :  { %v1425_v35 = vmul.f32 %v5233_v43, %v5233_v43  ;;  %v1525_v14 = vadd.f32 %v1524_v18, %v1523_v52  ;;  %v1449_v0 = vadd.f32 %v1424_v20, %v1399_v4  ;;  %v1473_v54 = vmul.f32 %v5234_v41, %v5234_v41  ;;  %v5238_v18 = vld [vmem:[#allocation41_spill] sm:$0xff]  ;;  %v5240_v43 = vld [vmem:[#allocation34_spill] sm:$0xff] }
 0x20e   :  { %v1497_v2 = vadd.f32 %v1472_v44, %v1447_v8  ;;  %v1526_v29 = vsel %vm1181_vm4, %v1495_v60, 0.0  ;;  %v1379_v58 = vmul.f32 %v5235_v48, %v5235_v48  ;;  %v1402_v46 = vadd.f32 %v1377_v31, %v3929_v5  ;;  %v5239_v44 = vld [vmem:[#allocation35_spill] sm:$0xff] }
 0x20f   :  { %v1426_v63 = vmul.f32 %v5236_v34, %v5236_v34  ;;  %v1527_v32 = vadd.f32 %v1526_v29, %v1525_v14  ;;  %v1450_v50 = vadd.f32 %v1425_v35, %v1400_v30  ;;  %v1474_v52 = vmul.f32 %v5237_v53, %v5237_v53  ;;  %v5241_v29 = vld [vmem:[#allocation5_spill] sm:$0xff]  ;;  %v5244_v53 = vld [vmem:[#allocation40_spill] sm:$0xff] }
 0x210   :  { %v1498_v20 = vadd.f32 %v1473_v54, %v1448_v19  ;;  %v1528_v4 = vsel %vm1181_vm4, %v1496_v62, 0.0  ;;  %v1380_v8 = vmul.f32 %v5238_v18, %v5238_v18  ;;  %v1403_v60 = vadd.f32 %v1378_v6, %v3935_v15  ;;  %v5242_v19 = vld [vmem:[#allocation54_spill] sm:$0xff] }
 0x211   :  { %v1427_v41 = vmul.f32 %v5239_v44, %v5239_v44  ;;  %v1529_v5 = vadd.f32 %v1528_v4, %v1527_v32  ;;  %v1451_v31 = vadd.f32 %v1426_v63, %v1401_v28  ;;  %v1475_v14 = vmul.f32 %v5240_v43, %v5240_v43  ;;  %v5245_v44 = vld [vmem:[#allocation38_spill] sm:$0xff]  ;;  %v5249_v43 = vld [vmem:[#allocation39_spill] sm:$0xff] }
 0x212   :  { %v1499_v35 = vadd.f32 %v1474_v52, %v1449_v0  ;;  %v1530_v30 = vsel %vm1181_vm4, %v1497_v2, 0.0  ;;  %v4078_v54 = vsub.f32 %v5242_v19, %v5241_v29  ;;  %v1404_v62 = vadd.f32 %v1379_v58, %v3939_v7  ;;  %v5246_v0 = vld [vmem:[#allocation56_spill] sm:$0xff]  ;;  %v5248_v4 = vld [vmem:[#allocation42_spill] sm:$0xff] }
 0x213   :  { %v1428_v15 = vmul.f32 %v5244_v53, %v5244_v53  ;;  %v1531_v6 = vadd.f32 %v1530_v30, %v1529_v5  ;;  %v1452_v34 = vadd.f32 %v1427_v41, %v1402_v46  ;;  %v1476_v63 = vmul.f32 %v5245_v44, %v5245_v44  ;;  %v5286_v44 = vld [vmem:[#allocation52_spill] sm:$0xff] }
 0x214   :  { %5243 = vst [vmem:[#allocation48_spill] sm:$0xff] %v4078_v54  ;;  %v1500_v28 = vadd.f32 %v1475_v14, %v1450_v50  ;;  %v1532_v32 = vsel %vm1181_vm4, %v1498_v20, 0.0  ;;  %v4088_v2 = vsub.f32 %v5246_v0, %v5241_v29  ;;  %v1405_v52 = vadd.f32 %v1380_v8, %v3945_v10  ;;  %v5250_v50 = vld [vmem:[#allocation59_spill] sm:$0xff]  ;;  %v5252_v14 = vld [vmem:[#allocation45_spill] sm:$0xff]  ;;  %v5289_v53 = vld [vmem:[#allocation60_spill] sm:$0xff] }
 0x215   :  { %v1429_v7 = vmul.f32 %v5248_v4, %v5248_v4  ;;  %v1533_v58 = vadd.f32 %v1532_v32, %v1531_v6  ;;  %v1453_v19 = vadd.f32 %v1428_v15, %v1403_v60  ;;  %v1477_v41 = vmul.f32 %v5249_v43, %v5249_v43  ;;  %v5282_v43 = vld [vmem:[#allocation10_spill] sm:$0xff] }
 0x216   :  { %5247 = vst [vmem:[#allocation50_spill] sm:$0xff] %v4088_v2  ;;  %v1501_v46 = vadd.f32 %v1476_v63, %v1451_v31  ;;  %v1534_v5 = vsel %vm1181_vm4, %v1499_v35, 0.0  ;;  %v4098_v20 = vsub.f32 %v5250_v50, %v5241_v29  ;;  %v1430_v30 = vmul.f32 %v5252_v14, %v5252_v14  ;;  %v5287_v14 = vld [vmem:[#allocation53_spill] sm:$0xff]  ;;  %v5288_v4 = vld [vmem:[#allocation58_spill] sm:$0xff] }
 0x217   :  { %v1535_v0 = vadd.f32 %v1534_v5, %v1533_v58  ;;  %v1454_v10 = vadd.f32 %v1429_v7, %v1404_v62  ;;  %v1478_v8 = vmul.f32 %v4078_v54, %v4078_v54  ;;  %v1502_v6 = vadd.f32 %v1477_v41, %v1452_v34 }
 0x218   :  { %5251 = vst [vmem:[#allocation61_spill] sm:$0xff] %v4098_v20  ;;  %v1536_v60 = vsel %vm1181_vm4, %v1500_v28, 0.0  ;;  %v1455_v32 = vadd.f32 %v1430_v30, %v1405_v52  ;;  %v1479_v31 = vmul.f32 %v4088_v2, %v4088_v2  ;;  %v1538_v29 = vsel %vm1181_vm4, %v1501_v46, 0.0 }
 0x219   :  { %v1537_v15 = vadd.f32 %v1536_v60, %v1535_v0  ;;  %v1503_v35 = vadd.f32 %v1478_v8, %v1453_v19  ;;  %v1480_v50 = vmul.f32 %v4098_v20, %v4098_v20  ;;  %v1540_v62 = vsel %vm1181_vm4, %v1502_v6, 0.0  ;;  %v5284_v20 = vld [vmem:[#allocation46_spill] sm:$0xff] }
 0x21a   :  { %v1504_v58 = vadd.f32 %v1479_v31, %v1454_v10  ;;  %v1548_v46 = vsel %vm1181_vm4, %v3994_v38, 0.0  ;;  %v1550_v10 = vsel %vm1181_vm4, %v3996_v47, 0.0  ;;  %v1552_v6 = vsel %vm1181_vm4, %v3998_v12, 0.0 }
 0x21b   :  { %v1539_v63 = vadd.f32 %v1538_v29, %v1537_v15  ;;  %v1505_v5 = vadd.f32 %v1480_v50, %v1455_v32  ;;  %v1542_v34 = vsel %vm1181_vm4, %v1503_v35, 0.0  ;;  %v1554_v15 = vsel %vm1181_vm4, %v4000_v9, 0.0 }
 0x21c   :  { %v1544_v52 = vsel %vm1181_vm4, %v1504_v58, 0.0  ;;  %v1556_v31 = vsel %vm1181_vm4, %v4002_v26, 0.0  ;;  %v1558_v38 = vsel %vm1181_vm4, %v4004_v24, 0.0  ;;  %v1560_v47 = vsel %vm1181_vm4, %v4006_v13, 0.0  ;;  %v1569_v24 = vld [vmem:[%s4825_s3] sm:$0x1] }
 0x21d   :  { %v1541_v7 = vadd.f32 %v1540_v62, %v1539_v63  ;;  %v1546_v30 = vsel %vm1181_vm4, %v1505_v5, 0.0 }
 0x21f   :  { %v1543_v28 = vadd.f32 %v1542_v34, %v1541_v7 }
 0x221   :  { %v1545_v41 = vadd.f32 %v1544_v52, %v1543_v28  ;;  %v1575_v28 = vlaneseq }
 0x223   :  { %v1547_v19 = vadd.f32 %v1546_v30, %v1545_v41  ;;  %v1576_v26 = vshrl.u32 %v1575_v28, 7 }
 0x225   :  { %v1549_v0 = vadd.f32 %v1548_v46, %v1547_v19  ;;  %v1577_v52 = vsub.s32 0, %v1576_v26  ;;  %v5254_v19 = vld [vmem:[#allocation69_spill] sm:$0xff]  ;;  %v4160_v26 = vld [vmem:[%s4826_s4] ss:$0 sm:$0xff] }
 0x227   :  { %v1551_v8 = vadd.f32 %v1550_v10, %v1549_v0  ;;  %v5255_v0 = vld [vmem:[#allocation8_spill] sm:$0xff] }
 0x229   :  { %v1553_v60 = vadd.f32 %v1552_v6, %v1551_v8  ;;  %v5256_v8 = vld [vmem:[#allocation70_spill] sm:$0xff] }
 0x22b   :  { %v1555_v32 = vadd.f32 %v1554_v15, %v1553_v60  ;;  %v5257_v60 = vld [vmem:[#allocation71_spill] sm:$0xff] }
 0x22d   :  { %v1557_v35 = vadd.f32 %v1556_v31, %v1555_v32  ;;  %v5258_v32 = vld [vmem:[#allocation72_spill] sm:$0xff] }
 0x22f   :  { %v1559_v29 = vadd.f32 %v1558_v38, %v1557_v35  ;;  %v5259_v35 = vld [vmem:[#allocation73_spill] sm:$0xff] }
 0x231   :  { %v1561_v63 = vadd.f32 %v1560_v47, %v1559_v29  ;;  %v5260_v29 = vld [vmem:[#allocation74_spill] sm:$0xff] }
 0x233   :  { %v1562_v50 = vrot.slane %v1561_v63, 4 }
 0x235   :  { %v1563_v58 = vadd.f32 %v1562_v50, %v1561_v63  ;;  %v5261_v63 = vld [vmem:[#allocation75_spill] sm:$0xff] }
 0x237   :  { %v1564_v12 = vrot.slane %v1563_v58, 2 }
 0x239   :  { %v1565_v62 = vadd.f32 %v1564_v12, %v1563_v58  ;;  %v5262_v58 = vld [vmem:[#allocation76_spill] sm:$0xff] }
 0x23b   :  { %v1566_v7 = vrot.slane %v1565_v62, 1 }
 0x23d   :  { %v1567_v5 = vadd.f32 %v1566_v7, %v1565_v62  ;;  %v5263_v62 = vld [vmem:[#allocation77_spill] sm:$0xff] }
 0x23f   :  { %v1568_v9 = vmul.f32 0.00125, %v1567_v5  ;;  %v5264_v5 = vld [vmem:[#allocation78_spill] sm:$0xff] }
 0x241   :  { %v1570_v34 = vadd.f32 1e-05, %v1568_v9 }
 0x243   :  { %2514 = vrsqrt.f32 %v1570_v34  ;;  %v5265_v34 = vld [vmem:[#allocation79_spill] sm:$0xff] }
 0x24d   :  { %v2515_v41 = vpop.eup %2514 }
 0x24e   :  { %v1572_v30 = vmul.f32 %v2515_v41, %v1569_v24  ;;  %v5266_v24 = vld [vmem:[#allocation80_spill] sm:$0xff]  ;;  %v5267_v41 = vld [vmem:[#allocation87_spill] sm:$0xff] }
 0x250   :  { %v4131_v13 = vrot.slane %v1572_v30, %v1577_v52 }
 0x252   :  { %5253 = vst [vmem:[#allocation11_spill] sm:$0xff] %v4131_v13  ;;  %v1580_v46 = vmul.f32 %v4131_v13, %v5254_v19  ;;  %v1581_v10 = vmul.f32 %v4131_v13, %v5255_v0  ;;  %v1582_v6 = vmul.f32 %v4131_v13, %v5256_v8  ;;  %v1583_v15 = vmul.f32 %v4131_v13, %v5257_v60 }
 0x253   :  { %v1584_v31 = vmul.f32 %v4131_v13, %v5258_v32  ;;  %v1585_v38 = vmul.f32 %v4131_v13, %v5259_v35  ;;  %v1586_v47 = vmul.f32 %v4131_v13, %v5260_v29  ;;  %v1587_v50 = vmul.f32 %v4131_v13, %v5261_v63  ;;  %v5268_v32 = vld [vmem:[#allocation88_spill] sm:$0xff]  ;;  %v5269_v29 = vld [vmem:[#allocation89_spill] sm:$0xff] }
 0x254   :  { %v1588_v12 = vmul.f32 %v4131_v13, %v5262_v58  ;;  %v1589_v7 = vmul.f32 %v4131_v13, %v5263_v62  ;;  %v1590_v9 = vmul.f32 %v4131_v13, %v5264_v5  ;;  %v1591_v28 = vmul.f32 %v4131_v13, %v5265_v34  ;;  %v5270_v58 = vld [vmem:[#allocation90_spill] sm:$0xff]  ;;  %v5271_v5 = vld [vmem:[#allocation91_spill] sm:$0xff]  ;;  %v5272_v34 = vld [vmem:[#allocation92_spill] sm:$0xff] }
 0x255   :  { %v1592_v52 = vmul.f32 %v4131_v13, %v5266_v24  ;;  %v1593_v30 = vmul.f32 %v4131_v13, %v5267_v41  ;;  %v1594_v19 = vmul.f32 %v4131_v13, %v3547_v37  ;;  %v1595_v0 = vmul.f32 %v4131_v13, %v3551_v55  ;;  %v5273_v24 = vld [vmem:[#allocation93_spill] sm:$0xff]  ;;  %v5274_v41 = vld [vmem:[#allocation94_spill] sm:$0xff] }
 0x256   :  { %v1596_v8 = vmul.f32 %v4131_v13, %v3555_v45  ;;  %v1597_v60 = vmul.f32 %v4131_v13, %v3559_v61  ;;  %v1598_v35 = vmul.f32 %v4131_v13, %v5268_v32  ;;  %v1599_v63 = vmul.f32 %v4131_v13, %v5269_v29 }
 0x257   :  { %v1600_v62 = vmul.f32 %v4131_v13, %v5270_v58  ;;  %v1601_v37 = vmul.f32 %v4131_v13, %v5271_v5  ;;  %v1602_v55 = vmul.f32 %v4131_v13, %v5272_v34  ;;  %v1603_v45 = vmul.f32 %v4131_v13, %v5273_v24 }
 0x258   :  { %v1604_v61 = vmul.f32 %v4131_v13, %v5274_v41  ;;  %v4189_v32 = vadd.f32 %v4160_v26, %v1580_v46  ;;  %v4192_v29 = vadd.f32 %v4160_v26, %v1581_v10  ;;  %v4195_v58 = vadd.f32 %v4160_v26, %v1582_v6 }
 0x259   :  { %v4198_v5 = vadd.f32 %v4160_v26, %v1583_v15  ;;  %v4201_v34 = vadd.f32 %v4160_v26, %v1584_v31  ;;  %v4204_v24 = vadd.f32 %v4160_v26, %v1585_v38  ;;  %v4207_v41 = vadd.f32 %v4160_v26, %v1586_v47 }
 0x25a   :  { %v4210_v46 = vadd.f32 %v4160_v26, %v1587_v50  ;;  %v4213_v10 = vadd.f32 %v4160_v26, %v1588_v12  ;;  %v4216_v6 = vadd.f32 %v4160_v26, %v1589_v7  ;;  %v4219_v15 = vadd.f32 %v4160_v26, %v1590_v9 }
 0x25b   :  { %v4222_v31 = vadd.f32 %v4160_v26, %v1591_v28  ;;  %v4225_v38 = vadd.f32 %v4160_v26, %v1592_v52  ;;  %v4228_v47 = vadd.f32 %v4160_v26, %v1593_v30  ;;  %v4231_v50 = vadd.f32 %v4160_v26, %v1594_v19 }
 0x25c   :  { %v4234_v12 = vadd.f32 %v4160_v26, %v1595_v0  ;;  %v4237_v7 = vadd.f32 %v4160_v26, %v1596_v8  ;;  %v4240_v9 = vadd.f32 %v4160_v26, %v1597_v60  ;;  %v4243_v28 = vadd.f32 %v4160_v26, %v1598_v35 }
 0x25d   :  { %v4246_v52 = vadd.f32 %v4160_v26, %v1599_v63  ;;  %v4249_v30 = vadd.f32 %v4160_v26, %v1600_v62  ;;  %v4252_v19 = vadd.f32 %v4160_v26, %v1601_v37  ;;  %v4255_v0 = vadd.f32 %v4160_v26, %v1602_v55  ;;  %v5283_v55 = vld [vmem:[#allocation9_spill] sm:$0xff] }
 0x25e   :  { %5275 = vst [vmem:[#allocation15_spill] sm:$0xff] %v4243_v28  ;;  %v4258_v8 = vadd.f32 %v4160_v26, %v1603_v45  ;;  %v4261_v60 = vadd.f32 %v4160_v26, %v1604_v61  ;;  %v1661_v2 = vmul.f32 %v4131_v13, %v5282_v43  ;;  %v1662_v45 = vmul.f32 %v4131_v13, %v5283_v55  ;;  %v5285_v61 = vld [vmem:[#allocation47_spill] sm:$0xff] }
 0x25f   :  { %5276 = vst [vmem:[#allocation25_spill] sm:$0xff] %v4246_v52  ;;  %5277 = vst [vmem:[#allocation30_spill] sm:$0xff] %v4249_v30  ;;  %v1663_v54 = vmul.f32 %v4131_v13, %v3599_v40  ;;  %v1664_v35 = vmul.f32 %v4131_v13, %v3603_v51  ;;  %v1665_v63 = vmul.f32 %v4131_v13, %v3607_v42 }
 0x260   :  { %5278 = vst [vmem:[#allocation31_spill] sm:$0xff] %v4252_v19  ;;  %5279 = vst [vmem:[#allocation36_spill] sm:$0xff] %v4255_v0  ;;  %v1666_v62 = vmul.f32 %v4131_v13, %v3611_v3  ;;  %v1667_v37 = vmul.f32 %v4131_v13, %v3615_v25  ;;  %v1668_v43 = vmul.f32 %v4131_v13, %v3619_v22 }
 0x261   :  { %5280 = vst [vmem:[#allocation44_spill] sm:$0xff] %v4258_v8  ;;  %5281 = vst [vmem:[#allocation37_spill] sm:$0xff] %v4261_v60  ;;  %v1669_v55 = vmul.f32 %v4131_v13, %v3623_v49  ;;  %v1670_v40 = vmul.f32 %v4131_v13, %v3627_v57  ;;  %v1671_v51 = vmul.f32 %v4131_v13, %v5216_v11 }
 0x262   :  { %v1672_v42 = vmul.f32 %v4131_v13, %v5219_v59  ;;  %v1673_v3 = vmul.f32 %v4131_v13, %v5222_v23  ;;  %v1674_v25 = vmul.f32 %v4131_v13, %v5225_v1  ;;  %v1675_v22 = vmul.f32 %v4131_v13, %v5228_v27 }
 0x263   :  { %v1676_v49 = vmul.f32 %v4131_v13, %v5231_v36  ;;  %v1677_v57 = vmul.f32 %v4131_v13, %v5235_v48  ;;  %v1678_v11 = vmul.f32 %v4131_v13, %v5238_v18  ;;  %v1679_v59 = vmul.f32 %v4131_v13, %v5284_v20 }
 0x264   :  { %v1680_v23 = vmul.f32 %v4131_v13, %v5285_v61  ;;  %v1681_v1 = vmul.f32 %v4131_v13, %v5286_v44  ;;  %v1682_v27 = vmul.f32 %v4131_v13, %v5287_v14  ;;  %v1683_v36 = vmul.f32 %v4131_v13, %v5288_v4 }
 0x265   :  { %v1684_v48 = vmul.f32 %v4131_v13, %v5289_v53  ;;  %v1685_v18 = vmul.f32 %v4131_v13, %v5290_v16  ;;  %v1686_v20 = vadd.f32 %v4160_v26, %v1661_v2  ;;  %v1687_v33 = vadd.f32 %v4160_v26, %v1662_v45 }
 0x266   :  { %v1688_v61 = vadd.f32 %v4160_v26, %v1663_v54  ;;  %v1689_v44 = vadd.f32 %v4160_v26, %v1664_v35  ;;  %v1690_v39 = vadd.f32 %v4160_v26, %v1665_v63  ;;  %v1691_v14 = vadd.f32 %v4160_v26, %v1666_v62 }
 0x267   :  { %v1692_v4 = vadd.f32 %v4160_v26, %v1667_v37  ;;  %v1693_v21 = vadd.f32 %v4160_v26, %v1668_v43  ;;  %v1694_v53 = vadd.f32 %v4160_v26, %v1669_v55  ;;  %v1695_v16 = vadd.f32 %v4160_v26, %v1670_v40 }
 0x268   :  { %v1696_v2 = vadd.f32 %v4160_v26, %v1671_v51  ;;  %v1697_v45 = vadd.f32 %v4160_v26, %v1672_v42  ;;  %v1698_v54 = vadd.f32 %v4160_v26, %v1673_v3  ;;  %v1699_v35 = vadd.f32 %v4160_v26, %v1674_v25 }
 0x269   :  { %v1700_v63 = vadd.f32 %v4160_v26, %v1675_v22  ;;  %v1701_v62 = vadd.f32 %v4160_v26, %v1676_v49  ;;  %v1702_v37 = vadd.f32 %v4160_v26, %v1677_v57  ;;  %v1703_v43 = vadd.f32 %v4160_v26, %v1678_v11 }
 0x26a   :  { %v1704_v55 = vadd.f32 %v4160_v26, %v1679_v59  ;;  %v1705_v40 = vadd.f32 %v4160_v26, %v1680_v23  ;;  %v1706_v51 = vadd.f32 %v4160_v26, %v1681_v1  ;;  %v1707_v42 = vadd.f32 %v4160_v26, %v1682_v27 }
 0x26b   :  { %v1708_v3 = vadd.f32 %v4160_v26, %v1683_v36  ;;  %v1709_v25 = vadd.f32 %v4160_v26, %v1684_v48  ;;  %v1710_v22 = vadd.f32 %v4160_v26, %v1685_v18  ;;  %v1711_v17 = vmax.f32 %v1686_v20, 0.0 }
 0x26c   :  { %v1712_v49 = vmax.f32 %v1687_v33, 0.0  ;;  %v1713_v13 = vmax.f32 %v1688_v61, 0.0  ;;  %v1714_v57 = vmax.f32 %v1689_v44, 0.0  ;;  %v1715_v56 = vmax.f32 %v1690_v39, 0.0 }
 0x26d   :  { %v1716_v11 = vmax.f32 %v1691_v14, 0.0  ;;  %v1717_v60 = vmax.f32 %v1692_v4, 0.0  ;;  %v1718_v59 = vmax.f32 %v1693_v21, 0.0  ;;  %v1719_v8 = vmax.f32 %v1694_v53, 0.0 }
 0x26e   :  { %v1720_v23 = vmax.f32 %v1695_v16, 0.0  ;;  %v1721_v0 = vmax.f32 %v1696_v2, 0.0  ;;  %v1722_v1 = vmax.f32 %v1697_v45, 0.0  ;;  %v1723_v19 = vmax.f32 %v1698_v54, 0.0 }
 0x26f   :  { %v1724_v27 = vmax.f32 %v1699_v35, 0.0  ;;  %v1725_v30 = vmax.f32 %v1700_v63, 0.0  ;;  %v1726_v36 = vmax.f32 %v1701_v62, 0.0  ;;  %v1727_v52 = vmax.f32 %v1702_v37, 0.0 }
 0x270   :  { %v1728_v48 = vmax.f32 %v1703_v43, 0.0  ;;  %v1729_v28 = vmax.f32 %v1704_v55, 0.0  ;;  %v1730_v18 = vmax.f32 %v1705_v40, 0.0  ;;  %v1731_v20 = vmax.f32 %v1706_v51, 0.0 }
 0x271   :  { %v1732_v33 = vmax.f32 %v1707_v42, 0.0  ;;  %v1733_v61 = vmax.f32 %v1708_v3, 0.0  ;;  %v1734_v44 = vmax.f32 %v1709_v25, 0.0  ;;  %v1735_v39 = vmax.f32 %v1710_v22, 0.0  ;;  %v5309_v42 = vld [vmem:[#allocation15_spill] sm:$0xff]  ;;  %v5312_v25 = vld [vmem:[#allocation25_spill] sm:$0xff] }
 0x272   :  { %v5291_v14 = vmax.f32 %v4189_v32, 0.0  ;;  %v5292_v4 = vmax.f32 %v4192_v29, 0.0  ;;  %v5293_v16 = vmax.f32 %v4195_v58, 0.0  ;;  %v5294_v45 = vmax.f32 %v4198_v5, 0.0  ;;  %v5315_v22 = vld [vmem:[#allocation30_spill] sm:$0xff] }
 0x273   :  { %v5295_v35 = vmax.f32 %v4201_v34, 0.0  ;;  %v5296_v32 = vmax.f32 %v4204_v24, 0.0  ;;  %v5297_v29 = vmax.f32 %v4207_v41, 0.0  ;;  %v5298_v58 = vmax.f32 %v4210_v46, 0.0 }
 0x274   :  { %v4365_v21 = vmax.f32 %v5291_v14, %v1711_v17  ;;  %v4369_v53 = vmax.f32 %v5292_v4, %v1712_v49  ;;  %v4373_v2 = vmax.f32 %v5293_v16, %v1713_v13  ;;  %v4377_v54 = vmax.f32 %v5294_v45, %v1714_v57  ;;  %v5318_v57 = vld [vmem:[#allocation31_spill] sm:$0xff]  ;;  %v5332_v4 = vld [vmem:[#allocation2_spill] sm:$0xff] }
 0x275   :  { %v4381_v63 = vmax.f32 %v5295_v35, %v1715_v56  ;;  %v4385_v17 = vmax.f32 %v5296_v32, %v1716_v11  ;;  %v4389_v62 = vmax.f32 %v5297_v29, %v1717_v60  ;;  %v4393_v13 = vmax.f32 %v5298_v58, %v1718_v59  ;;  %v5321_v11 = vld [vmem:[#allocation36_spill] sm:$0xff]  ;;  %v5331_v14 = vld [vmem:[#allocation11_spill] sm:$0xff]  ;;  %v5335_v32 = vld [vmem:[#allocation13_spill] sm:$0xff] }
 0x276   :  { %v5299_v5 = vmax.f32 %v4213_v10, 0.0  ;;  %v5300_v34 = vmax.f32 %v4216_v6, 0.0  ;;  %v5301_v24 = vmax.f32 %v4219_v15, 0.0  ;;  %v5302_v41 = vmax.f32 %v4222_v31, 0.0  ;;  %v5334_v35 = vld [vmem:[#allocation4_spill] sm:$0xff] }
 0x277   :  { %v5303_v46 = vmax.f32 %v4225_v38, 0.0  ;;  %v5304_v10 = vmax.f32 %v4228_v47, 0.0  ;;  %v5305_v6 = vmax.f32 %v4231_v50, 0.0  ;;  %v5306_v15 = vmax.f32 %v4234_v12, 0.0  ;;  %v5336_v29 = vld [vmem:[#allocation12_spill] sm:$0xff] }
 0x278   :  { %v4397_v37 = vmax.f32 %v5299_v5, %v1719_v8  ;;  %v4401_v56 = vmax.f32 %v5300_v34, %v1720_v23  ;;  %v4405_v43 = vmax.f32 %v5301_v24, %v1721_v0  ;;  %v4409_v60 = vmax.f32 %v5302_v41, %v1722_v1  ;;  %v5324_v23 = vld [vmem:[#allocation44_spill] sm:$0xff]  ;;  %v5338_v34 = vld [vmem:[#allocation17_spill] sm:$0xff] }
 0x279   :  { %v4413_v55 = vmax.f32 %v5303_v46, %v1723_v19  ;;  %v4417_v8 = vmax.f32 %v5304_v10, %v1724_v27  ;;  %v4421_v40 = vmax.f32 %v5305_v6, %v1725_v30  ;;  %v4425_v0 = vmax.f32 %v5306_v15, %v1726_v36  ;;  %v5327_v27 = vld [vmem:[#allocation37_spill] sm:$0xff]  ;;  %v5339_v41 = vld [vmem:[#allocation20_spill] sm:$0xff]  ;;  %v5340_v10 = vld [vmem:[#allocation23_spill] sm:$0xff] }
 0x27a   :  { %v5307_v31 = vmax.f32 %v4237_v7, 0.0  ;;  %v5308_v38 = vmax.f32 %v4240_v9, 0.0  ;;  %v5310_v47 = vmax.f32 %v5309_v42, 0.0  ;;  %v5313_v50 = vmax.f32 %v5312_v25, 0.0  ;;  %v5341_v15 = vld [vmem:[#allocation24_spill] sm:$0xff] }
 0x27b   :  { %v5316_v12 = vmax.f32 %v5315_v22, 0.0  ;;  %v5319_v7 = vmax.f32 %v5318_v57, 0.0  ;;  %v5322_v9 = vmax.f32 %v5321_v11, 0.0  ;;  %v5325_v1 = vmax.f32 %v5324_v23, 0.0 }
 0x27c   :  { %v4429_v51 = vmax.f32 %v5307_v31, %v1727_v52  ;;  %v4433_v19 = vmax.f32 %v5308_v38, %v1728_v48  ;;  %v4437_v3 = vmax.f32 %v5310_v47, %v1729_v28  ;;  %v4441_v30 = vmax.f32 %v5313_v50, %v1730_v18  ;;  %v5330_v18 = vld [vmem:[#allocation63_spill] sm:$0xff]  ;;  %v5342_v38 = vld [vmem:[#allocation28_spill] sm:$0xff]  ;;  %v5343_v47 = vld [vmem:[#allocation29_spill] sm:$0xff] }
 0x27d   :  { %v4445_v49 = vmax.f32 %v5316_v12, %v1731_v20  ;;  %v4449_v52 = vmax.f32 %v5319_v7, %v1732_v33  ;;  %v4453_v59 = vmax.f32 %v5322_v9, %v1733_v61  ;;  %v4457_v28 = vmax.f32 %v5325_v1, %v1734_v44  ;;  %v5333_v33 = vld [vmem:[#allocation3_spill] sm:$0xff]  ;;  %v5344_v50 = vld [vmem:[#allocation32_spill] sm:$0xff]  ;;  %v5347_v9 = vld [vmem:[#allocation42_spill] sm:$0xff] }
 0x27e   :  { %5311 = vst [vmem:[#allocation41_spill] sm:$0xff] %v4437_v3  ;;  %5314 = vst [vmem:[#allocation5_spill] sm:$0xff] %v4441_v30  ;;  %v5328_v36 = vmax.f32 %v5327_v27, 0.0  ;;  %v1761_v20 = vmul.f32 %v5331_v14, %v5330_v18  ;;  %v1762_v16 = vmul.f32 %v5331_v14, %v5332_v4  ;;  %v1763_v45 = vmul.f32 %v5331_v14, %v5333_v33  ;;  %v5345_v12 = vld [vmem:[#allocation35_spill] sm:$0xff]  ;;  %v5346_v7 = vld [vmem:[#allocation40_spill] sm:$0xff] }
 0x27f   :  { %5317 = vst [vmem:[#allocation54_spill] sm:$0xff] %v4445_v49  ;;  %5320 = vst [vmem:[#allocation56_spill] sm:$0xff] %v4449_v52  ;;  %v1764_v61 = vmul.f32 %v5331_v14, %v5334_v35  ;;  %v1765_v44 = vmul.f32 %v5331_v14, %v5335_v32  ;;  %v1766_v58 = vmul.f32 %v5331_v14, %v5336_v29  ;;  %v5348_v1 = vld [vmem:[#allocation45_spill] sm:$0xff]  ;;  %v5350_v4 = vld [vmem:[#allocation7_spill] sm:$0xff] }
 0x280   :  { %5323 = vst [vmem:[#allocation59_spill] sm:$0xff] %v4453_v59  ;;  %5326 = vst [vmem:[#allocation69_spill] sm:$0xff] %v4457_v28  ;;  %v4461_v48 = vmax.f32 %v5328_v36, %v1735_v39  ;;  %v5337_v39 = vld [vmem:[#allocation14_spill] sm:$0xff]  ;;  %v1768_v24 = vmul.f32 %v5331_v14, %v5338_v34  ;;  %v1769_v46 = vmul.f32 %v5331_v14, %v5339_v41  ;;  %v5351_v35 = vld [vmem:[#allocation64_spill] sm:$0xff] }
 0x281   :  { %v1767_v5 = vmul.f32 %v5331_v14, %v5337_v39  ;;  %v1770_v6 = vmul.f32 %v5331_v14, %v5340_v10  ;;  %v1771_v31 = vmul.f32 %v5331_v14, %v5341_v15  ;;  %v1772_v42 = vmul.f32 %v5331_v14, %v5342_v38  ;;  %v5349_v36 = vld [vmem:[#allocation6_spill] sm:$0xff]  ;;  %v5352_v29 = vld [vmem:[#allocation65_spill] sm:$0xff]  ;;  %v5354_v10 = vld [vmem:[#allocation67_spill] sm:$0xff] }
 0x282   :  { %5329 = vst [vmem:[#allocation8_spill] sm:$0xff] %v4461_v48  ;;  %v1773_v25 = vmul.f32 %v5331_v14, %v5343_v47  ;;  %v1774_v22 = vmul.f32 %v5331_v14, %v5344_v50  ;;  %v1775_v57 = vmul.f32 %v5331_v14, %v5345_v12  ;;  %v1776_v11 = vmul.f32 %v5331_v14, %v5346_v7  ;;  %v5353_v34 = vld [vmem:[#allocation66_spill] sm:$0xff]  ;;  %v5355_v38 = vld [vmem:[#allocation68_spill] sm:$0xff] }
 0x283   :  { %v1777_v23 = vmul.f32 %v5331_v14, %v5347_v9  ;;  %v1778_v27 = vmul.f32 %v5331_v14, %v5348_v1  ;;  %v1779_v18 = vmul.f32 %v5331_v14, %v5349_v36  ;;  %v1780_v33 = vmul.f32 %v5331_v14, %v5350_v4 }
 0x284   :  { %v1781_v32 = vmul.f32 %v5331_v14, %v5351_v35  ;;  %v1782_v39 = vmul.f32 %v5331_v14, %v5352_v29  ;;  %v1783_v41 = vmul.f32 %v5331_v14, %v5353_v34  ;;  %v1784_v15 = vmul.f32 %v5331_v14, %v5354_v10 }
 0x285   :  { %v1785_v47 = vmul.f32 %v5331_v14, %v5355_v38  ;;  %v1786_v50 = vadd.f32 %v4160_v26, %v1761_v20  ;;  %v1787_v12 = vadd.f32 %v4160_v26, %v1762_v16  ;;  %v1788_v7 = vadd.f32 %v4160_v26, %v1763_v45 }
 0x286   :  { %v1789_v9 = vadd.f32 %v4160_v26, %v1764_v61  ;;  %v1790_v1 = vadd.f32 %v4160_v26, %v1765_v44  ;;  %v1791_v36 = vadd.f32 %v4160_v26, %v1766_v58  ;;  %v1792_v4 = vadd.f32 %v4160_v26, %v1767_v5 }
 0x287   :  { %v1793_v35 = vadd.f32 %v4160_v26, %v1768_v24  ;;  %v1794_v29 = vadd.f32 %v4160_v26, %v1769_v46  ;;  %v1795_v34 = vadd.f32 %v4160_v26, %v1770_v6  ;;  %v1796_v20 = vadd.f32 %v4160_v26, %v1771_v31 }
 0x288   :  { %v1797_v16 = vadd.f32 %v4160_v26, %v1772_v42  ;;  %v1798_v45 = vadd.f32 %v4160_v26, %v1773_v25  ;;  %v1799_v61 = vadd.f32 %v4160_v26, %v1774_v22  ;;  %v1800_v44 = vadd.f32 %v4160_v26, %v1775_v57 }
 0x289   :  { %v1801_v58 = vadd.f32 %v4160_v26, %v1776_v11  ;;  %v1802_v5 = vadd.f32 %v4160_v26, %v1777_v23  ;;  %v1803_v24 = vadd.f32 %v4160_v26, %v1778_v27  ;;  %v1804_v46 = vadd.f32 %v4160_v26, %v1779_v18 }
 0x28a   :  { %v1805_v6 = vadd.f32 %v4160_v26, %v1780_v33  ;;  %v1806_v31 = vadd.f32 %v4160_v26, %v1781_v32  ;;  %v1807_v42 = vadd.f32 %v4160_v26, %v1782_v39  ;;  %v1808_v25 = vadd.f32 %v4160_v26, %v1783_v41 }
 0x28b   :  { %v1809_v22 = vadd.f32 %v4160_v26, %v1784_v15  ;;  %v1810_v57 = vadd.f32 %v4160_v26, %v1785_v47  ;;  %v1811_v10 = vmax.f32 %v1786_v50, 0.0  ;;  %v1812_v11 = vmax.f32 %v1787_v12, 0.0 }
 0x28c   :  { %v1813_v38 = vmax.f32 %v1788_v7, 0.0  ;;  %v1814_v23 = vmax.f32 %v1789_v9, 0.0  ;;  %v1815_v14 = vmax.f32 %v1790_v1, 0.0  ;;  %v1816_v27 = vmax.f32 %v1791_v36, 0.0 }
 0x28d   :  { %v1817_v48 = vmax.f32 %v1792_v4, 0.0  ;;  %v1818_v18 = vmax.f32 %v1793_v35, 0.0  ;;  %v1819_v28 = vmax.f32 %v1794_v29, 0.0  ;;  %v1820_v33 = vmax.f32 %v1795_v34, 0.0 }
 0x28e   :  { %v1821_v59 = vmax.f32 %v1796_v20, 0.0  ;;  %v1822_v32 = vmax.f32 %v1797_v16, 0.0  ;;  %v1823_v52 = vmax.f32 %v1798_v45, 0.0  ;;  %v1824_v39 = vmax.f32 %v1799_v61, 0.0  ;;  %v5370_v45 = vld [vmem:[#allocation11_spill] sm:$0xff] }
 0x28f   :  { %v1825_v49 = vmax.f32 %v1800_v44, 0.0  ;;  %v1826_v41 = vmax.f32 %v1801_v58, 0.0  ;;  %v1827_v30 = vmax.f32 %v1802_v5, 0.0  ;;  %v1828_v15 = vmax.f32 %v1803_v24, 0.0  ;;  %v5371_v44 = vld [vmem:[#allocation51_spill] sm:$0xff] }
 0x290   :  { %v1829_v3 = vmax.f32 %v1804_v46, 0.0  ;;  %v1830_v47 = vmax.f32 %v1805_v6, 0.0  ;;  %v1831_v50 = vmax.f32 %v1806_v31, 0.0  ;;  %v1832_v12 = vmax.f32 %v1807_v42, 0.0  ;;  %v5372_v5 = vld [vmem:[#allocation55_spill] sm:$0xff]  ;;  %v5373_v46 = vld [vmem:[#allocation57_spill] sm:$0xff] }
 0x291   :  { %v1833_v7 = vmax.f32 %v1808_v25, 0.0  ;;  %v1834_v9 = vmax.f32 %v1809_v22, 0.0  ;;  %v1835_v1 = vmax.f32 %v1810_v57, 0.0  ;;  %v4539_v36 = vmax.f32 %v4365_v21, %v1811_v10  ;;  %v5374_v31 = vld [vmem:[#allocation16_spill] sm:$0xff]  ;;  %v5375_v25 = vld [vmem:[#allocation18_spill] sm:$0xff]  ;;  %v5376_v57 = vld [vmem:[#allocation19_spill] sm:$0xff] }
 0x292   :  { %v4542_v4 = vmax.f32 %v4369_v53, %v1812_v11  ;;  %v4545_v35 = vmax.f32 %v4373_v2, %v1813_v38  ;;  %v4548_v29 = vmax.f32 %v4377_v54, %v1814_v23  ;;  %v4551_v34 = vmax.f32 %v4381_v63, %v1815_v14  ;;  %v5377_v11 = vld [vmem:[#allocation21_spill] sm:$0xff]  ;;  %v5378_v23 = vld [vmem:[#allocation22_spill] sm:$0xff] }
 0x293   :  { %v4554_v20 = vmax.f32 %v4385_v17, %v1816_v27  ;;  %v4557_v16 = vmax.f32 %v4389_v62, %v1817_v48  ;;  %v4560_v21 = vmax.f32 %v4393_v13, %v1818_v18  ;;  %v4563_v53 = vmax.f32 %v4397_v37, %v1819_v28  ;;  %v5379_v18 = vld [vmem:[#allocation26_spill] sm:$0xff] }
 0x294   :  { %v4566_v2 = vmax.f32 %v4401_v56, %v1820_v33  ;;  %v4569_v54 = vmax.f32 %v4405_v43, %v1821_v59  ;;  %v4572_v63 = vmax.f32 %v4409_v60, %v1822_v32  ;;  %v4575_v17 = vmax.f32 %v4413_v55, %v1823_v52  ;;  %v5356_v60 = vld [vmem:[#allocation41_spill] sm:$0xff]  ;;  %v5380_v32 = vld [vmem:[#allocation27_spill] sm:$0xff] }
 0x295   :  { %v4578_v62 = vmax.f32 %v4417_v8, %v1824_v39  ;;  %v4581_v13 = vmax.f32 %v4421_v40, %v1825_v49  ;;  %v4584_v37 = vmax.f32 %v4425_v0, %v1826_v41  ;;  %v4587_v56 = vmax.f32 %v4429_v51, %v1827_v30  ;;  %v5357_v55 = vld [vmem:[#allocation5_spill] sm:$0xff]  ;;  %v5359_v8 = vld [vmem:[#allocation54_spill] sm:$0xff]  ;;  %v5361_v40 = vld [vmem:[#allocation56_spill] sm:$0xff] }
 0x296   :  { %v4590_v43 = vmax.f32 %v4433_v19, %v1828_v15  ;;  %v4593_v59 = vmax.f32 %v5356_v60, %v1829_v3  ;;  %v4596_v52 = vmax.f32 %v5357_v55, %v1830_v47  ;;  %v4599_v28 = vmax.f32 %v5359_v8, %v1831_v50  ;;  %v5363_v0 = vld [vmem:[#allocation59_spill] sm:$0xff]  ;;  %v5365_v51 = vld [vmem:[#allocation69_spill] sm:$0xff]  ;;  %v5367_v19 = vld [vmem:[#allocation8_spill] sm:$0xff] }
 0x297   :  { %v4602_v49 = vmax.f32 %v5361_v40, %v1832_v12  ;;  %v4605_v48 = vmax.f32 %v5363_v0, %v1833_v7  ;;  %v4608_v30 = vmax.f32 %v5365_v51, %v1834_v9  ;;  %v4611_v14 = vmax.f32 %v5367_v19, %v1835_v1  ;;  %v5369_v3 = vld [vmem:[#allocation49_spill] sm:$0xff]  ;;  %v5382_v47 = vld [vmem:[#allocation34_spill] sm:$0xff]  ;;  %v5384_v9 = vld [vmem:[#allocation39_spill] sm:$0xff] }
 0x298   :  { %5358 = vst [vmem:[#allocation70_spill] sm:$0xff] %v4596_v52  ;;  %5360 = vst [vmem:[#allocation71_spill] sm:$0xff] %v4599_v28  ;;  %v1861_v61 = vmul.f32 %v5370_v45, %v5369_v3  ;;  %v1862_v58 = vmul.f32 %v5370_v45, %v5371_v44  ;;  %v1863_v24 = vmul.f32 %v5370_v45, %v5372_v5  ;;  %v5381_v41 = vld [vmem:[#allocation33_spill] sm:$0xff]  ;;  %v5383_v12 = vld [vmem:[#allocation38_spill] sm:$0xff] }
 0x299   :  { %5362 = vst [vmem:[#allocation72_spill] sm:$0xff] %v4602_v49  ;;  %5364 = vst [vmem:[#allocation73_spill] sm:$0xff] %v4605_v48  ;;  %v1864_v6 = vmul.f32 %v5370_v45, %v5373_v46  ;;  %v1865_v42 = vmul.f32 %v5370_v45, %v5374_v31  ;;  %v1866_v22 = vmul.f32 %v5370_v45, %v5375_v25  ;;  %v5385_v60 = vld [vmem:[#allocation48_spill] sm:$0xff]  ;;  %v5386_v8 = vld [vmem:[#allocation50_spill] sm:$0xff] }
 0x29a   :  { %5366 = vst [vmem:[#allocation74_spill] sm:$0xff] %v4608_v30  ;;  %5368 = vst [vmem:[#allocation75_spill] sm:$0xff] %v4611_v14  ;;  %v1867_v10 = vmul.f32 %v5370_v45, %v5376_v57  ;;  %v1868_v38 = vmul.f32 %v5370_v45, %v5377_v11  ;;  %v1869_v27 = vmul.f32 %v5370_v45, %v5378_v23  ;;  %v5387_v0 = vld [vmem:[#allocation61_spill] sm:$0xff]  ;;  %v5388_v19 = vld [vmem:[#allocation43_spill] sm:$0xff] }
 0x29b   :  { %v1870_v33 = vmul.f32 %v5370_v45, %v5379_v18  ;;  %v1871_v39 = vmul.f32 %v5370_v45, %v5380_v32  ;;  %v1872_v15 = vmul.f32 %v5370_v45, %v5381_v41  ;;  %v1873_v50 = vmul.f32 %v5370_v45, %v5382_v47  ;;  %v5389_v44 = vld [vmem:[#allocation81_spill] sm:$0xff]  ;;  %v5390_v46 = vld [vmem:[#allocation82_spill] sm:$0xff]  ;;  %v5391_v25 = vld [vmem:[#allocation83_spill] sm:$0xff] }
 0x29c   :  { %v1874_v7 = vmul.f32 %v5370_v45, %v5383_v12  ;;  %v1875_v1 = vmul.f32 %v5370_v45, %v5384_v9  ;;  %v1876_v55 = vmul.f32 %v5370_v45, %v5385_v60  ;;  %v1877_v40 = vmul.f32 %v5370_v45, %v5386_v8  ;;  %v5392_v11 = vld [vmem:[#allocation84_spill] sm:$0xff]  ;;  %v5393_v18 = vld [vmem:[#allocation85_spill] sm:$0xff]  ;;  %v5394_v41 = vld [vmem:[#allocation86_spill] sm:$0xff] }
 0x29d   :  { %v1878_v51 = vmul.f32 %v5370_v45, %v5387_v0  ;;  %v1879_v3 = vmul.f32 %v5370_v45, %v5388_v19  ;;  %v1880_v5 = vmul.f32 %v5370_v45, %v5389_v44  ;;  %v1881_v31 = vmul.f32 %v5370_v45, %v5390_v46 }
 0x29e   :  { %v1882_v57 = vmul.f32 %v5370_v45, %v5391_v25  ;;  %v1883_v23 = vmul.f32 %v5370_v45, %v5392_v11  ;;  %v1884_v32 = vmul.f32 %v5370_v45, %v5393_v18  ;;  %v1885_v47 = vmul.f32 %v5370_v45, %v5394_v41 }
 0x29f   :  { %v1886_v12 = vadd.f32 %v4160_v26, %v1861_v61  ;;  %v1887_v9 = vadd.f32 %v4160_v26, %v1862_v58  ;;  %v1888_v60 = vadd.f32 %v4160_v26, %v1863_v24  ;;  %v1889_v8 = vadd.f32 %v4160_v26, %v1864_v6 }
 0x2a0   :  { %v1890_v0 = vadd.f32 %v4160_v26, %v1865_v42  ;;  %v1891_v19 = vadd.f32 %v4160_v26, %v1866_v22  ;;  %v1892_v44 = vadd.f32 %v4160_v26, %v1867_v10  ;;  %v1893_v46 = vadd.f32 %v4160_v26, %v1868_v38 }
 0x2a1   :  { %v1894_v25 = vadd.f32 %v4160_v26, %v1869_v27  ;;  %v1895_v45 = vadd.f32 %v4160_v26, %v1870_v33  ;;  %v1896_v61 = vadd.f32 %v4160_v26, %v1871_v39  ;;  %v1897_v58 = vadd.f32 %v4160_v26, %v1872_v15 }
 0x2a2   :  { %v1898_v24 = vadd.f32 %v4160_v26, %v1873_v50  ;;  %v1899_v6 = vadd.f32 %v4160_v26, %v1874_v7  ;;  %v1900_v42 = vadd.f32 %v4160_v26, %v1875_v1  ;;  %v1901_v22 = vadd.f32 %v4160_v26, %v1876_v55 }
 0x2a3   :  { %v1902_v10 = vadd.f32 %v4160_v26, %v1877_v40  ;;  %v1903_v38 = vadd.f32 %v4160_v26, %v1878_v51  ;;  %v1904_v27 = vadd.f32 %v4160_v26, %v1879_v3  ;;  %v1905_v33 = vadd.f32 %v4160_v26, %v1880_v5 }
 0x2a4   :  { %v1906_v39 = vadd.f32 %v4160_v26, %v1881_v31  ;;  %v1907_v15 = vadd.f32 %v4160_v26, %v1882_v57  ;;  %v4686_v50 = vadd.f32 %v4160_v26, %v1883_v23  ;;  %v4689_v7 = vadd.f32 %v4160_v26, %v1884_v32 }
 0x2a5   :  { %v4692_v1 = vadd.f32 %v4160_v26, %v1885_v47  ;;  %v1911_v55 = vmax.f32 %v1886_v12, 0.0  ;;  %v1912_v40 = vmax.f32 %v1887_v9, 0.0  ;;  %v1913_v51 = vmax.f32 %v1888_v60, 0.0 }
 0x2a6   :  { %v1914_v11 = vmax.f32 %v1889_v8, 0.0  ;;  %v1915_v3 = vmax.f32 %v1890_v0, 0.0  ;;  %v1916_v18 = vmax.f32 %v1891_v19, 0.0  ;;  %v1917_v5 = vmax.f32 %v1892_v44, 0.0 }
 0x2a7   :  { %v1918_v41 = vmax.f32 %v1893_v46, 0.0  ;;  %v1919_v31 = vmax.f32 %v1894_v25, 0.0  ;;  %v1920_v14 = vmax.f32 %v1895_v45, 0.0  ;;  %v1921_v57 = vmax.f32 %v1896_v61, 0.0 }
 0x2a8   :  { %v1922_v30 = vmax.f32 %v1897_v58, 0.0  ;;  %v1923_v23 = vmax.f32 %v1898_v24, 0.0  ;;  %v1924_v48 = vmax.f32 %v1899_v6, 0.0  ;;  %v1925_v49 = vmax.f32 %v1900_v42, 0.0 }
 0x2a9   :  { %v1926_v32 = vmax.f32 %v1901_v22, 0.0  ;;  %v1927_v28 = vmax.f32 %v1902_v10, 0.0  ;;  %v1928_v52 = vmax.f32 %v1903_v38, 0.0  ;;  %v1929_v26 = vmax.f32 %v1904_v27, 0.0 }
 0x2aa   :  { %v1930_v47 = vmax.f32 %v1905_v33, 0.0  ;;  %v1931_v12 = vmax.f32 %v1906_v39, 0.0  ;;  %v1932_v9 = vmax.f32 %v1907_v15, 0.0  ;;  %v1933_v60 = vmax.f32 %v4686_v50, 0.0 }
 0x2ab   :  { %v1934_v8 = vmax.f32 %v4689_v7, 0.0  ;;  %v1935_v0 = vmax.f32 %v4692_v1, 0.0  ;;  %v1936_v19 = vmax.f32 %v4539_v36, %v1911_v55  ;;  %v1937_v44 = vmax.f32 %v4542_v4, %v1912_v40 }
 0x2ac   :  { %v1938_v46 = vmax.f32 %v4545_v35, %v1913_v51  ;;  %v1939_v25 = vmax.f32 %v4548_v29, %v1914_v11  ;;  %v1940_v45 = vmax.f32 %v4551_v34, %v1915_v3  ;;  %v1941_v61 = vmax.f32 %v4554_v20, %v1916_v18 }
 0x2ad   :  { %v1942_v58 = vmax.f32 %v4557_v16, %v1917_v5  ;;  %v1943_v24 = vmax.f32 %v4560_v21, %v1918_v41  ;;  %v1944_v6 = vmax.f32 %v4563_v53, %v1919_v31  ;;  %v1945_v42 = vmax.f32 %v4566_v2, %v1920_v14  ;;  %1961 = vst.msk [vmem:[%s4827_s5] sm:$0xff] %vm1181_vm4, %v1936_v19  ;;  %v5395_v2 = vld [vmem:[#allocation70_spill] sm:$0xff] }
 0x2ae   :  { %1962 = vst.msk [vmem:[%s4827_s5 + $0x8] sm:$0xff] %vm1181_vm4, %v1937_v44  ;;  %v1946_v36 = vmax.f32 %v4569_v54, %v1921_v57  ;;  %v1947_v4 = vmax.f32 %v4572_v63, %v1922_v30  ;;  %v1948_v35 = vmax.f32 %v4575_v17, %v1923_v23  ;;  %v1949_v29 = vmax.f32 %v4578_v62, %v1924_v48  ;;  %v5396_v63 = vld [vmem:[#allocation71_spill] sm:$0xff]  ;;  %v5397_v62 = vld [vmem:[#allocation72_spill] sm:$0xff] }
 0x2af   :  { %1963 = vst.msk [vmem:[%s4827_s5 + $0x10] sm:$0xff] %vm1181_vm4, %v1938_v46  ;;  %1964 = vst.msk [vmem:[%s4827_s5 + $0x18] sm:$0xff] %vm1181_vm4, %v1939_v25  ;;  %v1950_v34 = vmax.f32 %v4581_v13, %v1925_v49  ;;  %v1951_v20 = vmax.f32 %v4584_v37, %v1926_v32  ;;  %v1952_v16 = vmax.f32 %v4587_v56, %v1927_v28  ;;  %v5398_v37 = vld [vmem:[#allocation73_spill] sm:$0xff] }
 0x2b0   :  { %1965 = vst.msk [vmem:[%s4827_s5 + $0x20] sm:$0xff] %vm1181_vm4, %v1940_v45  ;;  %1966 = vst.msk [vmem:[%s4827_s5 + $0x28] sm:$0xff] %vm1181_vm4, %v1941_v61  ;;  %v1953_v21 = vmax.f32 %v4590_v43, %v1928_v52  ;;  %v1954_v53 = vmax.f32 %v4593_v59, %v1929_v26  ;;  %v1955_v54 = vmax.f32 %v5395_v2, %v1930_v47  ;;  %v5399_v43 = vld [vmem:[#allocation74_spill] sm:$0xff]  ;;  %v5400_v52 = vld [vmem:[#allocation75_spill] sm:$0xff] }
 0x2b1   :  { %1967 = vst.msk [vmem:[%s4827_s5 + $0x30] sm:$0xff] %vm1181_vm4, %v1942_v58  ;;  %1968 = vst.msk [vmem:[%s4827_s5 + $0x38] sm:$0xff] %vm1181_vm4, %v1943_v24  ;;  %v1956_v17 = vmax.f32 %v5396_v63, %v1931_v12  ;;  %v1957_v13 = vmax.f32 %v5397_v62, %v1932_v9  ;;  %v1958_v56 = vmax.f32 %v5398_v37, %v1933_v60 }
 0x2b2   :  { %1969 = vst.msk [vmem:[%s4827_s5 + $0x40] sm:$0xff] %vm1181_vm4, %v1944_v6  ;;  %1970 = vst.msk [vmem:[%s4827_s5 + $0x48] sm:$0xff] %vm1181_vm4, %v1945_v42  ;;  %v1959_v59 = vmax.f32 %v5399_v43, %v1934_v8  ;;  %v1960_v28 = vmax.f32 %v5400_v52, %v1935_v0 }
 0x2b3   :  { %1971 = vst.msk [vmem:[%s4827_s5 + $0x50] sm:$0xff] %vm1181_vm4, %v1946_v36  ;;  %1972 = vst.msk [vmem:[%s4827_s5 + $0x58] sm:$0xff] %vm1181_vm4, %v1947_v4 }
 0x2b4   :  { %1973 = vst.msk [vmem:[%s4827_s5 + $0x60] sm:$0xff] %vm1181_vm4, %v1948_v35  ;;  %1974 = vst.msk [vmem:[%s4827_s5 + $0x68] sm:$0xff] %vm1181_vm4, %v1949_v29 }
 0x2b5   :  { %1975 = vst.msk [vmem:[%s4827_s5 + $0x70] sm:$0xff] %vm1181_vm4, %v1950_v34  ;;  %1976 = vst.msk [vmem:[%s4827_s5 + $0x78] sm:$0xff] %vm1181_vm4, %v1951_v20 }
 0x2b6   :  { %1977 = vst.msk [vmem:[%s4827_s5 + $0x80] sm:$0xff] %vm1181_vm4, %v1952_v16  ;;  %1978 = vst.msk [vmem:[%s4827_s5 + $0x88] sm:$0xff] %vm1181_vm4, %v1953_v21 }
 0x2b7   :  { %1979 = vst.msk [vmem:[%s4827_s5 + $0x90] sm:$0xff] %vm1181_vm4, %v1954_v53  ;;  %1980 = vst.msk [vmem:[%s4827_s5 + $0x98] sm:$0xff] %vm1181_vm4, %v1955_v54 }
 0x2b8   :  { %1981 = vst.msk [vmem:[%s4827_s5 + $0xa0] sm:$0xff] %vm1181_vm4, %v1956_v17  ;;  %1982 = vst.msk [vmem:[%s4827_s5 + $0xa8] sm:$0xff] %vm1181_vm4, %v1957_v13 }
 0x2b9   :  { %1983 = vst.msk [vmem:[%s4827_s5 + $0xb0] sm:$0xff] %vm1181_vm4, %v1958_v56  ;;  %1984 = vst.msk [vmem:[%s4827_s5 + $0xb8] sm:$0xff] %vm1181_vm4, %v1959_v59 }
 0x2ba   :  { %1985 = vst.msk [vmem:[%s4827_s5 + $0xc0] sm:$0xff] %vm1181_vm4, %v1960_v28 }

// kernel: convnet_forward.4
= control target key start
LH: loop header
LB: loop body
LE: loop exit
PB: predicated region body
PF: predicated region fallthrough
CT: control target
= control target key end

     0   :  { %vm89_vm0 = vcmask 588800   ;;  %vm102_vm1 = vcmask 1043456   ;;  %vm497_vm2 = vcmask 64512   ;;  %vm509_vm3 = vcmask 58368   ;;  %s1431_s1 = inlined_call_operand.vmem [shape: bf16[72,8], index: 1, kind: input, shape index: {}]   ;;  %s1432_s0 = inlined_call_operand.vmem [shape: bf16[4,50,72], index: 0, kind: input, shape index: {}]   ;;  %s1433_s2 = inlined_call_operand.vmem [shape: f32[1,8], index: 2, kind: input, shape index: {}, may-alias: {2,4}]   ;;  %s1434_s3 = inlined_call_operand.vmem [shape: f32[1,8], index: 3, kind: input, shape index: {}]   ;;  %s1435_s4 = inlined_call_operand.vmem [shape: f32[1,8], index: 4, kind: input, shape index: {}, may-alias: {2,4}]   ;;  %s1436_s5 = inlined_call_operand.vmem [shape: f32[50,8], index: 5, kind: output, shape index: {}]  }
   0x1   :  { %v921_v0 = vld [vmem:[%s1431_s1] sm:$0xff]   ;;  %v922_v1 = vld [vmem:[%s1431_s1 + $0x8] sm:$0xff]   ;;  %v923_v2 = vld [vmem:[%s1431_s1 + $0x10] sm:$0xff]  }
   0x2   :  { %845 = vmatprep.subr.bf16.mxu0 %v921_v0  ;;  %863 = vmatprep.subr.bf16.mxu1 %v921_v0  ;;  %v926_v3 = vld [vmem:[%s1432_s0] sm:$0xff]   ;;  %v924_v5 = vld [vmem:[%s1431_s1 + $0x18] sm:$0xff]   ;;  %v928_v8 = vld [vmem:[%s1432_s0 + $0x8] sm:$0xff]  }
   0x3   :  { %846 = vmatpush3.bf16.msra.mxu0 %v921_v0  ;;  %864 = vmatpush3.bf16.msra.mxu1 %v921_v0  ;;  %v927_v4 = vld [vmem:[%s1432_s0 + $0x1c] sm:$0xff]   ;;  %v929_v9 = vld [vmem:[%s1432_s0 + $0x24] sm:$0xff]   ;;  %v930_v10 = vld [vmem:[%s1432_s0 + $0x10] sm:$0xff]  }
   0x4   :  { %847 = vmatprep.subr.bf16.mxu0 %v922_v1  ;;  %865 = vmatprep.subr.bf16.mxu1 %v922_v1  ;;  %v925_v6 = vld [vmem:[%s1431_s1 + $0x20] ss:$0 sps:$4 sm:$0xff]   ;;  %v931_v11 = vld [vmem:[%s1432_s0 + $0x2c] sm:$0xff]   ;;  %v932_v12 = vld [vmem:[%s1432_s0 + $0x18] ss:$0 sps:$4 sm:$0x11]  }
   0x5   :  { %855 = vmatprep.mubr.msk.bf16.mxu0 %vm89_vm0, %v926_v3  ;;  %873 = vmatprep.mubr.msk.bf16.mxu1 %vm89_vm0, %v927_v4  ;;  %v104_v7 = vsel %vm102_vm1, %v925_v6, 0  ;;  %v933_v13 = vld [vmem:[%s1432_s0 + $0x34] ss:$0 sps:$4 sm:$0x11]   ;;  %v934_v14 = vld [vmem:[%s1432_s0 + $0x38] sm:$0xff]   ;;  %v936_v16 = vld [vmem:[%s1432_s0 + $0x40] sm:$0xff]  }
   0x6   :  { %v935_v15 = vld [vmem:[%s1432_s0 + $0x54] sm:$0xff]   ;;  %v937_v17 = vld [vmem:[%s1432_s0 + $0x5c] sm:$0xff]   ;;  %v938_v18 = vld [vmem:[%s1432_s0 + $0x48] sm:$0xff]  }
   0x7   :  { %848 = vmatpush3.bf16.msra.mxu0 %v922_v1  ;;  %866 = vmatpush3.bf16.msra.mxu1 %v922_v1  ;;  %v939_v19 = vld [vmem:[%s1432_s0 + $0x64] sm:$0xff]   ;;  %v940_v20 = vld [vmem:[%s1432_s0 + $0x50] ss:$0 sps:$4 sm:$0x11]   ;;  %v1061_v22 = vld [vmem:[%s1433_s2] ss:$0 sm:$0xff] }
   0x8   :  { %849 = vmatprep.subr.bf16.mxu0 %v923_v2  ;;  %867 = vmatprep.subr.bf16.mxu1 %v923_v2  ;;  %v941_v21 = vld [vmem:[%s1432_s0 + $0x6c] ss:$0 sps:$4 sm:$0x11]  }
   0xb   :  { %850 = vmatpush3.bf16.msra.mxu0 %v923_v2  ;;  %868 = vmatpush3.bf16.msra.mxu1 %v923_v2 }
   0xc   :  { %851 = vmatprep.subr.bf16.mxu0 %v924_v5  ;;  %869 = vmatprep.subr.bf16.mxu1 %v924_v5 }
   0xf   :  { %852 = vmatpush3.bf16.msra.mxu0 %v924_v5  ;;  %870 = vmatpush3.bf16.msra.mxu1 %v924_v5 }
  0x10   :  { %917 = vmatprep.subr.msk.bf16.mxu0 %vm102_vm1, %v925_v6  ;;  %918 = vmatprep.subr.msk.bf16.mxu1 %vm102_vm1, %v925_v6 }
  0x13   :  { %854 = vmatpush3.bf16.msra.mxu0 %v104_v7  ;;  %872 = vmatpush3.bf16.msra.mxu1 %v104_v7 }
  0x14   :  { %881 = vmatprep.subr.bf16.mxu0 %v921_v0  ;;  %899 = vmatprep.subr.bf16.mxu1 %v921_v0 }
  0x16   :  { %856 = vmatmul.mubr.msk.bf16.vlgmr.msra.gmra.mrb[0].mxu0 %vm89_vm0, %v928_v8  ;;  %874 = vmatmul.mubr.msk.bf16.vlgmr.msra.gmra.mrb[0].mxu1 %vm89_vm0, %v929_v9 }
  0x17   :  { %882 = vmatpush3.bf16.msra.mxu0 %v921_v0  ;;  %900 = vmatpush3.bf16.msra.mxu1 %v921_v0 }
  0x18   :  { %883 = vmatprep.subr.bf16.mxu0 %v922_v1  ;;  %901 = vmatprep.subr.bf16.mxu1 %v922_v1 }
  0x19   :  { %859 = vmatprep.mubr.msk.bf16.mxu0 %vm89_vm0, %v930_v10  ;;  %877 = vmatprep.mubr.msk.bf16.mxu1 %vm89_vm0, %v931_v11 }
  0x1b   :  { %884 = vmatpush3.bf16.msra.mxu0 %v922_v1  ;;  %902 = vmatpush3.bf16.msra.mxu1 %v922_v1 }
  0x1c   :  { %885 = vmatprep.subr.bf16.mxu0 %v923_v2  ;;  %903 = vmatprep.subr.bf16.mxu1 %v923_v2 }
  0x1e   :  { %860 = vmatmul.mubr.msk.bf16.gmra.mrb[4].mxu0 %vm89_vm0, %v932_v12  ;;  %878 = vmatmul.mubr.msk.bf16.gmra.mrb[4].mxu1 %vm89_vm0, %v933_v13 }
  0x1f   :  { %886 = vmatpush3.bf16.msra.mxu0 %v923_v2  ;;  %904 = vmatpush3.bf16.msra.mxu1 %v923_v2 }
  0x20   :  { %887 = vmatprep.subr.bf16.mxu0 %v924_v5  ;;  %905 = vmatprep.subr.bf16.mxu1 %v924_v5 }
  0x21   :  { %891 = vmatprep.mubr.msk.bf16.mxu0 %vm89_vm0, %v934_v14  ;;  %909 = vmatprep.mubr.msk.bf16.mxu1 %vm89_vm0, %v935_v15 }
  0x23   :  { %888 = vmatpush3.bf16.msra.mxu0 %v924_v5  ;;  %906 = vmatpush3.bf16.msra.mxu1 %v924_v5 }
  0x24   :  { %919 = vmatprep.subr.msk.bf16.mxu0 %vm102_vm1, %v925_v6  ;;  %920 = vmatprep.subr.msk.bf16.mxu1 %vm102_vm1, %v925_v6 }
  0x27   :  { %890 = vmatpush3.bf16.msra.mxu0 %v104_v7  ;;  %908 = vmatpush3.bf16.msra.mxu1 %v104_v7 }
  0x2a   :  { %892 = vmatmul.mubr.msk.bf16.vlgmr.msra.gmra.mrb[8].mxu0 %vm89_vm0, %v936_v16  ;;  %910 = vmatmul.mubr.msk.bf16.vlgmr.msra.gmra.mrb[8].mxu1 %vm89_vm0, %v937_v17 }
  0x2b   :  { %895 = vmatprep.mubr.msk.bf16.mxu0 %vm89_vm0, %v938_v18  ;;  %913 = vmatprep.mubr.msk.bf16.mxu1 %vm89_vm0, %v939_v19 }
  0x32   :  { %896 = vmatmul.mubr.msk.bf16.gmra.mrb[12].mxu0 %vm89_vm0, %v940_v20  ;;  %914 = vmatmul.mubr.msk.bf16.gmra.mrb[12].mxu1 %vm89_vm0, %v941_v21 }
  0xe9   :  { %v857_v23 = vpop.f32.mrb[0].mxu0  ;;  %v875_v24 = vpop.f32.mrb[0].mxu1 }
  0xea   :  { %v1064_v25 = vadd.f32 %v857_v23, %v1061_v22  ;;  %v1067_v26 = vadd.f32 %v875_v24, %v1061_v22  ;;  %v140_v27 = vpop.f32.mrb[1].mxu0  ;;  %v242_v28 = vpop.f32.mrb[1].mxu1 }
  0xeb   :  { %v1070_v29 = vadd.f32 %v1061_v22, %v140_v27  ;;  %v1073_v30 = vadd.f32 %v1061_v22, %v242_v28  ;;  %v858_v31 = vpop.f32.mrb[2].mxu0  ;;  %v876_v32 = vpop.f32.mrb[2].mxu1 }
  0xec   :  { %v478_v33 = vadd.f32 %v1067_v26, %v1064_v25  ;;  %v1078_v34 = vadd.f32 %v858_v31, %v1061_v22  ;;  %v1081_v35 = vadd.f32 %v876_v32, %v1061_v22  ;;  %v143_v36 = vpop.f32.mrb[3].mxu0  ;;  %v245_v37 = vpop.f32.mrb[3].mxu1 }
  0xed   :  { %v476_v38 = vadd.f32 %v1073_v30, %v1070_v29  ;;  %v1086_v39 = vadd.f32 %v1061_v22, %v143_v36  ;;  %v1089_v40 = vadd.f32 %v1061_v22, %v245_v37 }
  0xee   :  { %v479_v41 = vadd.f32 %v1081_v35, %v1078_v34 }
  0xef   :  { %v477_v42 = vadd.f32 %v1089_v40, %v1086_v39 }
  0xf1   :  { %v861_v43 = vpop.f32.mrb[4].mxu0  ;;  %v879_v44 = vpop.f32.mrb[4].mxu1 }
  0xf2   :  { %v1096_v45 = vadd.f32 %v861_v43, %v1061_v22  ;;  %v1099_v46 = vadd.f32 %v879_v44, %v1061_v22  ;;  %v156_v47 = vpop.f32.mrb[5].mxu0  ;;  %v258_v48 = vpop.f32.mrb[5].mxu1 }
  0xf3   :  { %v1102_v49 = vadd.f32 %v1061_v22, %v156_v47  ;;  %v1105_v50 = vadd.f32 %v1061_v22, %v258_v48  ;;  %v862_v51 = vpop.f32.mrb[6].mxu0  ;;  %v880_v52 = vpop.f32.mrb[6].mxu1 }
  0xf4   :  { %v482_v53 = vadd.f32 %v1099_v46, %v1096_v45  ;;  %v159_v54 = vpop.f32.mrb[7].mxu0  ;;  %v261_v55 = vpop.f32.mrb[7].mxu1 }
  0xf5   :  { %v480_v56 = vadd.f32 %v1105_v50, %v1102_v49  ;;  %v1112_v57 = vadd.f32 %v1061_v22, %v159_v54  ;;  %v1115_v58 = vadd.f32 %v1061_v22, %v261_v55 }
  0xf7   :  { %v481_v59 = vadd.f32 %v1115_v58, %v1112_v57 }
  0xfd   :  { %v893_v60 = vpop.f32.mrb[8].mxu0  ;;  %v911_v61 = vpop.f32.mrb[8].mxu1 }
  0xfe   :  { %v1120_v62 = vadd.f32 %v893_v60, %v1061_v22  ;;  %v1123_v63 = vadd.f32 %v911_v61, %v1061_v22  ;;  %v344_v0 = vpop.f32.mrb[9].mxu0  ;;  %v446_v1 = vpop.f32.mrb[9].mxu1 }
  0xff   :  { %v1126_v2 = vadd.f32 %v1061_v22, %v344_v0  ;;  %v1129_v3 = vadd.f32 %v1061_v22, %v446_v1  ;;  %v894_v4 = vpop.f32.mrb[10].mxu0  ;;  %v912_v5 = vpop.f32.mrb[10].mxu1 }
 0x100   :  { %v485_v6 = vadd.f32 %v478_v33, %v1120_v62  ;;  %v1133_v7 = vadd.f32 %v894_v4, %v1061_v22  ;;  %v347_v8 = vpop.f32.mrb[11].mxu0  ;;  %v449_v9 = vpop.f32.mrb[11].mxu1  ;;  %v1142_v14 = vadd.f32 %v912_v5, %v1061_v22 }
 0x101   :  { %v483_v10 = vadd.f32 %v476_v38, %v1126_v2  ;;  %v1137_v11 = vadd.f32 %v1061_v22, %v347_v8  ;;  %v1147_v17 = vadd.f32 %v1061_v22, %v449_v9 }
 0x102   :  { %v492_v12 = vadd.f32 %v485_v6, %v1123_v63  ;;  %v486_v13 = vadd.f32 %v479_v41, %v1133_v7 }
 0x103   :  { %v490_v15 = vadd.f32 %v483_v10, %v1129_v3  ;;  %v484_v16 = vadd.f32 %v477_v42, %v1137_v11 }
 0x104   :  { %v493_v18 = vadd.f32 %v486_v13, %v1142_v14  ;;  %v501_v47 = vsel %vm497_vm2, %v492_v12, 0.0 }
 0x105   :  { %v491_v19 = vadd.f32 %v484_v16, %v1147_v17  ;;  %v897_v20 = vpop.f32.mrb[12].mxu0  ;;  %v915_v21 = vpop.f32.mrb[12].mxu1  ;;  %v498_v31 = vsel %vm497_vm2, %v490_v15, 0.0 }
 0x106   :  { %v369_v23 = vadd.f32 %v897_v20, %v1061_v22  ;;  %v1153_v24 = vadd.f32 %v915_v21, %v1061_v22  ;;  %v360_v27 = vpop.f32.mrb[13].mxu0  ;;  %v462_v28 = vpop.f32.mrb[13].mxu1  ;;  %v503_v55 = vsel %vm497_vm2, %v493_v18, 0.0 }
 0x107   :  { %v499_v32 = vsel %vm497_vm2, %v491_v19, 0.0  ;;  %v361_v33 = vadd.f32 %v1061_v22, %v360_v27  ;;  %v463_v36 = vadd.f32 %v1061_v22, %v462_v28  ;;  %v898_v37 = vpop.f32.mrb[14].mxu0  ;;  %v916_v38 = vpop.f32.mrb[14].mxu1 }
 0x108   :  { %v500_v41 = vadd.f32 %v499_v32, %v498_v31  ;;  %v489_v42 = vadd.f32 %v482_v53, %v369_v23  ;;  %v363_v43 = vpop.f32.mrb[15].mxu0  ;;  %v465_v44 = vpop.f32.mrb[15].mxu1 }
 0x109   :  { %v487_v48 = vadd.f32 %v480_v56, %v361_v33  ;;  %v364_v51 = vadd.f32 %v1061_v22, %v363_v43  ;;  %v466_v0 = vadd.f32 %v1061_v22, %v465_v44 }
 0x10a   :  { %v502_v52 = vadd.f32 %v501_v47, %v500_v41  ;;  %v496_v54 = vadd.f32 %v489_v42, %v1153_v24 }
 0x10b   :  { %v494_v60 = vadd.f32 %v487_v48, %v463_v36  ;;  %v488_v61 = vadd.f32 %v481_v59, %v364_v51 }
 0x10c   :  { %v504_v1 = vadd.f32 %v503_v55, %v502_v52  ;;  %v510_v8 = vsel %vm509_vm3, %v496_v54, 0.0 }
 0x10d   :  { %v505_v4 = vsel %vm497_vm2, %v494_v60, 0.0  ;;  %v495_v53 = vadd.f32 %v488_v61, %v466_v0 }
 0x10e   :  { %v506_v5 = vadd.f32 %v505_v4, %v504_v1 }
 0x10f   :  { %v507_v6 = vsel %vm497_vm2, %v495_v53, 0.0 }
 0x110   :  { %v508_v56 = vadd.f32 %v507_v6, %v506_v5 }
 0x112   :  { %v511_v9 = vadd.f32 %v510_v8, %v508_v56 }
 0x114   :  { %v512_v10 = vrot.slane %v511_v9, 4 }
 0x116   :  { %v513_v12 = vadd.f32 %v512_v10, %v511_v9 }
 0x118   :  { %v514_v13 = vrot.slane %v513_v12, 2 }
 0x11a   :  { %v515_v15 = vadd.f32 %v514_v13, %v513_v12 }
 0x11c   :  { %v516_v16 = vrot.slane %v515_v15, 1 }
 0x11e   :  { %v517_v59 = vadd.f32 %v516_v16, %v515_v15 }
 0x120   :  { %v518_v18 = vmul.f32 0.005, %v517_v59 }
 0x122   :  { %v1168_v22 = vsub.f32 %v1070_v29, %v518_v18  ;;  %v1171_v19 = vsub.f32 %v1086_v39, %v518_v18  ;;  %v1174_v20 = vsub.f32 %v1064_v25, %v518_v18  ;;  %v1177_v21 = vsub.f32 %v1078_v34, %v518_v18 }
 0x123   :  { %v1180_v27 = vsub.f32 %v1102_v49, %v518_v18  ;;  %v1183_v28 = vsub.f32 %v1112_v57, %v518_v18  ;;  %v1186_v31 = vsub.f32 %v1096_v45, %v518_v18  ;;  %v1189_v29 = vsub.f32 %v1073_v30, %v518_v18 }
 0x124   :  { %v1192_v39 = vsub.f32 %v1089_v40, %v518_v18  ;;  %v1195_v25 = vsub.f32 %v1067_v26, %v518_v18  ;;  %v1198_v34 = vsub.f32 %v1081_v35, %v518_v18  ;;  %v1201_v49 = vsub.f32 %v1105_v50, %v518_v18 }
 0x125   :  { %v1204_v57 = vsub.f32 %v1115_v58, %v518_v18  ;;  %v1207_v45 = vsub.f32 %v1099_v46, %v518_v18  ;;  %v1210_v30 = vsub.f32 %v1126_v2, %v518_v18  ;;  %v1213_v40 = vsub.f32 %v1137_v11, %v518_v18 }
 0x126   :  { %v1216_v26 = vsub.f32 %v1120_v62, %v518_v18  ;;  %v1219_v35 = vsub.f32 %v1133_v7, %v518_v18  ;;  %v1221_v50 = vsub.f32 %v361_v33, %v518_v18  ;;  %v1223_v32 = vsub.f32 %v364_v51, %v518_v18 }
 0x127   :  { %v1225_v58 = vsub.f32 %v369_v23, %v518_v18  ;;  %v1228_v46 = vsub.f32 %v1129_v3, %v518_v18  ;;  %v1231_v2 = vsub.f32 %v1147_v17, %v518_v18  ;;  %v1234_v11 = vsub.f32 %v1123_v63, %v518_v18 }
 0x128   :  { %v1237_v62 = vsub.f32 %v1142_v14, %v518_v18  ;;  %v1239_v7 = vsub.f32 %v463_v36, %v518_v18  ;;  %v1241_v33 = vsub.f32 %v466_v0, %v518_v18  ;;  %v1244_v37 = vsub.f32 %v1153_v24, %v518_v18 }
 0x129   :  { %v547_v3 = vmul.f32 %v1168_v22, %v1168_v22  ;;  %v548_v17 = vmul.f32 %v1171_v19, %v1171_v19  ;;  %v549_v63 = vmul.f32 %v1174_v20, %v1174_v20  ;;  %v550_v14 = vmul.f32 %v1177_v21, %v1177_v21 }
 0x12a   :  { %v551_v23 = vmul.f32 %v1180_v27, %v1180_v27  ;;  %v552_v36 = vmul.f32 %v1183_v28, %v1183_v28  ;;  %v553_v24 = vmul.f32 %v1186_v31, %v1186_v31  ;;  %v554_v38 = vmul.f32 %v1189_v29, %v1189_v29 }
 0x12b   :  { %v555_v41 = vmul.f32 %v1192_v39, %v1192_v39  ;;  %v556_v42 = vmul.f32 %v1195_v25, %v1195_v25  ;;  %v557_v43 = vmul.f32 %v1198_v34, %v1198_v34  ;;  %v558_v44 = vmul.f32 %v1201_v49, %v1201_v49 }
 0x12c   :  { %v559_v47 = vmul.f32 %v1204_v57, %v1204_v57  ;;  %v560_v48 = vmul.f32 %v1207_v45, %v1207_v45  ;;  %v561_v51 = vadd.f32 %v554_v38, %v547_v3  ;;  %v568_v52 = vmul.f32 %v1210_v30, %v1210_v30 }
 0x12d   :  { %v562_v54 = vadd.f32 %v555_v41, %v548_v17  ;;  %v563_v55 = vadd.f32 %v556_v42, %v549_v63  ;;  %v564_v60 = vadd.f32 %v557_v43, %v550_v14  ;;  %v565_v61 = vadd.f32 %v558_v44, %v551_v23 }
 0x12e   :  { %v566_v0 = vadd.f32 %v559_v47, %v552_v36  ;;  %v567_v1 = vadd.f32 %v560_v48, %v553_v24  ;;  %v569_v4 = vmul.f32 %v1213_v40, %v1213_v40  ;;  %v570_v53 = vmul.f32 %v1216_v26, %v1216_v26 }
 0x12f   :  { %v571_v5 = vmul.f32 %v1219_v35, %v1219_v35  ;;  %v572_v6 = vmul.f32 %v1221_v50, %v1221_v50  ;;  %v573_v56 = vmul.f32 %v1223_v32, %v1223_v32  ;;  %v574_v8 = vmul.f32 %v1225_v58, %v1225_v58 }
 0x130   :  { %v575_v9 = vadd.f32 %v568_v52, %v561_v51  ;;  %v576_v10 = vadd.f32 %v569_v4, %v562_v54  ;;  %v577_v12 = vadd.f32 %v570_v53, %v563_v55  ;;  %v582_v13 = vmul.f32 %v1228_v46, %v1228_v46 }
 0x131   :  { %v578_v15 = vadd.f32 %v571_v5, %v564_v60  ;;  %v579_v16 = vadd.f32 %v572_v6, %v565_v61  ;;  %v580_v59 = vadd.f32 %v573_v56, %v566_v0  ;;  %v581_v18 = vadd.f32 %v574_v8, %v567_v1 }
 0x132   :  { %v583_v3 = vmul.f32 %v1231_v2, %v1231_v2  ;;  %v584_v17 = vmul.f32 %v1234_v11, %v1234_v11  ;;  %v585_v63 = vmul.f32 %v1237_v62, %v1237_v62  ;;  %v586_v14 = vmul.f32 %v1239_v7, %v1239_v7 }
 0x133   :  { %v587_v23 = vmul.f32 %v1241_v33, %v1241_v33  ;;  %v588_v36 = vmul.f32 %v1244_v37, %v1244_v37  ;;  %v589_v24 = vadd.f32 %v582_v13, %v575_v9 }
 0x134   :  { %v590_v38 = vadd.f32 %v583_v3, %v576_v10  ;;  %v591_v41 = vadd.f32 %v584_v17, %v577_v12  ;;  %v592_v42 = vadd.f32 %v585_v63, %v578_v15  ;;  %v593_v43 = vadd.f32 %v586_v14, %v579_v16  ;;  %v616_v3 = vld [vmem:[%s1434_s3] sm:$0x1] }
 0x135   :  { %v594_v44 = vadd.f32 %v587_v23, %v580_v59  ;;  %v595_v47 = vadd.f32 %v588_v36, %v581_v18  ;;  %v596_v48 = vsel %vm497_vm2, %v589_v24, 0.0  ;;  %v622_v59 = vlaneseq  ;;  %v1317_v36 = vld [vmem:[%s1435_s4] ss:$0 sm:$0xff] }
 0x136   :  { %v597_v51 = vsel %vm497_vm2, %v590_v38, 0.0  ;;  %v599_v54 = vsel %vm497_vm2, %v591_v41, 0.0  ;;  %v601_v60 = vsel %vm497_vm2, %v592_v42, 0.0  ;;  %v603_v0 = vsel %vm497_vm2, %v593_v43, 0.0 }
 0x137   :  { %v598_v52 = vadd.f32 %v597_v51, %v596_v48  ;;  %v605_v4 = vsel %vm497_vm2, %v594_v44, 0.0  ;;  %v607_v5 = vsel %vm509_vm3, %v595_v47, 0.0  ;;  %v623_v18 = vshrl.u32 %v622_v59, 7 }
 0x139   :  { %v600_v55 = vadd.f32 %v599_v54, %v598_v52  ;;  %v624_v17 = vsub.s32 0, %v623_v18 }
 0x13b   :  { %v602_v61 = vadd.f32 %v601_v60, %v600_v55 }
 0x13d   :  { %v604_v1 = vadd.f32 %v603_v0, %v602_v61 }
 0x13f   :  { %v606_v53 = vadd.f32 %v605_v4, %v604_v1 }
 0x141   :  { %v608_v6 = vadd.f32 %v607_v5, %v606_v53 }
 0x143   :  { %v609_v56 = vrot.slane %v608_v6, 4 }
 0x145   :  { %v610_v8 = vadd.f32 %v609_v56, %v608_v6 }
 0x147   :  { %v611_v9 = vrot.slane %v610_v8, 2 }
 0x149   :  { %v612_v10 = vadd.f32 %v611_v9, %v610_v8 }
 0x14b   :  { %v613_v12 = vrot.slane %v612_v10, 1 }
 0x14d   :  { %v614_v13 = vadd.f32 %v613_v12, %v612_v10 }
 0x14f   :  { %v615_v15 = vmul.f32 0.005, %v614_v13 }
 0x151   :  { %v617_v16 = vadd.f32 1e-05, %v615_v15 }
 0x153   :  { %942 = vrsqrt.f32 %v617_v16 }
 0x15d   :  { %v943_v63 = vpop.eup %942 }
 0x15e   :  { %v619_v14 = vmul.f32 %v943_v63, %v616_v3 }
 0x160   :  { %v1312_v23 = vrot.slane %v619_v14, %v624_v17 }
 0x162   :  { %v627_v24 = vmul.f32 %v1312_v23, %v1168_v22  ;;  %v628_v38 = vmul.f32 %v1312_v23, %v1171_v19  ;;  %v629_v41 = vmul.f32 %v1312_v23, %v1174_v20  ;;  %v630_v42 = vmul.f32 %v1312_v23, %v1177_v21 }
 0x163   :  { %v631_v43 = vmul.f32 %v1312_v23, %v1180_v27  ;;  %v632_v44 = vmul.f32 %v1312_v23, %v1183_v28  ;;  %v633_v47 = vmul.f32 %v1312_v23, %v1186_v31  ;;  %v654_v22 = vmul.f32 %v1312_v23, %v1189_v29 }
 0x164   :  { %v640_v19 = vadd.f32 %v1317_v36, %v627_v24  ;;  %v641_v48 = vadd.f32 %v1317_v36, %v628_v38  ;;  %v642_v20 = vadd.f32 %v1317_v36, %v629_v41  ;;  %v643_v21 = vadd.f32 %v1317_v36, %v630_v42 }
 0x165   :  { %v644_v51 = vadd.f32 %v1317_v36, %v631_v43  ;;  %v645_v27 = vadd.f32 %v1317_v36, %v632_v44  ;;  %v646_v28 = vadd.f32 %v1317_v36, %v633_v47  ;;  %v655_v31 = vmul.f32 %v1312_v23, %v1192_v39 }
 0x166   :  { %v647_v52 = vmax.f32 %v640_v19, 0.0  ;;  %v648_v54 = vmax.f32 %v641_v48, 0.0  ;;  %v649_v29 = vmax.f32 %v642_v20, 0.0  ;;  %v650_v55 = vmax.f32 %v643_v21, 0.0 }
 0x167   :  { %v651_v60 = vmax.f32 %v644_v51, 0.0  ;;  %v652_v61 = vmax.f32 %v645_v27, 0.0  ;;  %v653_v0 = vmax.f32 %v646_v28, 0.0  ;;  %v656_v1 = vmul.f32 %v1312_v23, %v1195_v25 }
 0x168   :  { %v657_v4 = vmul.f32 %v1312_v23, %v1198_v34  ;;  %v658_v53 = vmul.f32 %v1312_v23, %v1201_v49  ;;  %v659_v5 = vmul.f32 %v1312_v23, %v1204_v57  ;;  %v660_v39 = vmul.f32 %v1312_v23, %v1207_v45 }
 0x169   :  { %v661_v6 = vadd.f32 %v1317_v36, %v654_v22  ;;  %v662_v56 = vadd.f32 %v1317_v36, %v655_v31  ;;  %v663_v8 = vadd.f32 %v1317_v36, %v656_v1  ;;  %v682_v25 = vmul.f32 %v1312_v23, %v1210_v30 }
 0x16a   :  { %v664_v34 = vadd.f32 %v1317_v36, %v657_v4  ;;  %v665_v9 = vadd.f32 %v1317_v36, %v658_v53  ;;  %v666_v49 = vadd.f32 %v1317_v36, %v659_v5  ;;  %v667_v57 = vadd.f32 %v1317_v36, %v660_v39 }
 0x16b   :  { %v668_v10 = vmax.f32 %v661_v6, 0.0  ;;  %v669_v12 = vmax.f32 %v662_v56, 0.0  ;;  %v670_v45 = vmax.f32 %v663_v8, 0.0  ;;  %v683_v13 = vmul.f32 %v1312_v23, %v1213_v40 }
 0x16c   :  { %v671_v15 = vmax.f32 %v664_v34, 0.0  ;;  %v672_v16 = vmax.f32 %v665_v9, 0.0  ;;  %v673_v59 = vmax.f32 %v666_v49, 0.0  ;;  %v674_v18 = vmax.f32 %v667_v57, 0.0 }
 0x16d   :  { %v675_v3 = vmax.f32 %v647_v52, %v668_v10  ;;  %v676_v30 = vmax.f32 %v648_v54, %v669_v12  ;;  %v677_v17 = vmax.f32 %v649_v29, %v670_v45  ;;  %v684_v63 = vmul.f32 %v1312_v23, %v1216_v26 }
 0x16e   :  { %v678_v14 = vmax.f32 %v650_v55, %v671_v15  ;;  %v679_v24 = vmax.f32 %v651_v60, %v672_v16  ;;  %v680_v38 = vmax.f32 %v652_v61, %v673_v59  ;;  %v681_v41 = vmax.f32 %v653_v0, %v674_v18 }
 0x16f   :  { %v685_v42 = vmul.f32 %v1312_v23, %v1219_v35  ;;  %v686_v40 = vmul.f32 %v1312_v23, %v1221_v50  ;;  %v687_v43 = vmul.f32 %v1312_v23, %v1223_v32  ;;  %v688_v44 = vmul.f32 %v1312_v23, %v1225_v58 }
 0x170   :  { %v689_v47 = vadd.f32 %v1317_v36, %v682_v25  ;;  %v690_v26 = vadd.f32 %v1317_v36, %v683_v13  ;;  %v691_v22 = vadd.f32 %v1317_v36, %v684_v63  ;;  %v710_v19 = vmul.f32 %v1312_v23, %v1228_v46 }
 0x171   :  { %v692_v35 = vadd.f32 %v1317_v36, %v685_v42  ;;  %v693_v48 = vadd.f32 %v1317_v36, %v686_v40  ;;  %v694_v50 = vadd.f32 %v1317_v36, %v687_v43  ;;  %v695_v32 = vadd.f32 %v1317_v36, %v688_v44 }
 0x172   :  { %v696_v20 = vmax.f32 %v689_v47, 0.0  ;;  %v697_v21 = vmax.f32 %v690_v26, 0.0  ;;  %v698_v58 = vmax.f32 %v691_v22, 0.0  ;;  %v711_v51 = vmul.f32 %v1312_v23, %v1231_v2 }
 0x173   :  { %v699_v27 = vmax.f32 %v692_v35, 0.0  ;;  %v700_v28 = vmax.f32 %v693_v48, 0.0  ;;  %v701_v31 = vmax.f32 %v694_v50, 0.0  ;;  %v702_v52 = vmax.f32 %v695_v32, 0.0 }
 0x174   :  { %v703_v54 = vmax.f32 %v675_v3, %v696_v20  ;;  %v704_v46 = vmax.f32 %v676_v30, %v697_v21  ;;  %v705_v29 = vmax.f32 %v677_v17, %v698_v58  ;;  %v712_v55 = vmul.f32 %v1312_v23, %v1234_v11 }
 0x175   :  { %v706_v60 = vmax.f32 %v678_v14, %v699_v27  ;;  %v707_v61 = vmax.f32 %v679_v24, %v700_v28  ;;  %v708_v0 = vmax.f32 %v680_v38, %v701_v31  ;;  %v709_v1 = vmax.f32 %v681_v41, %v702_v52 }
 0x176   :  { %v713_v4 = vmul.f32 %v1312_v23, %v1237_v62  ;;  %v714_v2 = vmul.f32 %v1312_v23, %v1239_v7  ;;  %v715_v53 = vmul.f32 %v1312_v23, %v1241_v33  ;;  %v716_v5 = vmul.f32 %v1312_v23, %v1244_v37 }
 0x177   :  { %v717_v39 = vadd.f32 %v1317_v36, %v710_v19  ;;  %v718_v11 = vadd.f32 %v1317_v36, %v711_v51  ;;  %v719_v6 = vadd.f32 %v1317_v36, %v712_v55 }
 0x178   :  { %v720_v56 = vadd.f32 %v1317_v36, %v713_v4  ;;  %v721_v8 = vadd.f32 %v1317_v36, %v714_v2  ;;  %v722_v62 = vadd.f32 %v1317_v36, %v715_v53  ;;  %v723_v7 = vadd.f32 %v1317_v36, %v716_v5 }
 0x179   :  { %v724_v25 = vmax.f32 %v717_v39, 0.0  ;;  %v725_v34 = vmax.f32 %v718_v11, 0.0  ;;  %v726_v33 = vmax.f32 %v719_v6, 0.0 }
 0x17a   :  { %v727_v9 = vmax.f32 %v720_v56, 0.0  ;;  %v728_v49 = vmax.f32 %v721_v8, 0.0  ;;  %v729_v37 = vmax.f32 %v722_v62, 0.0  ;;  %v730_v23 = vmax.f32 %v723_v7, 0.0 }
 0x17b   :  { %v731_v57 = vmax.f32 %v703_v54, %v724_v25  ;;  %v732_v10 = vmax.f32 %v704_v46, %v725_v34  ;;  %v733_v12 = vmax.f32 %v705_v29, %v726_v33 }
 0x17c   :  { %v734_v45 = vmax.f32 %v706_v60, %v727_v9  ;;  %v735_v13 = vmax.f32 %v707_v61, %v728_v49  ;;  %v736_v15 = vmax.f32 %v708_v0, %v729_v37  ;;  %v737_v16 = vmax.f32 %v709_v1, %v730_v23 }
 0x17d   :  { %738 = vst.msk [vmem:[%s1436_s5] sm:$0xff] %vm497_vm2, %v731_v57  ;;  %739 = vst.msk [vmem:[%s1436_s5 + $0x8] sm:$0xff] %vm497_vm2, %v732_v10 }
 0x17e   :  { %740 = vst.msk [vmem:[%s1436_s5 + $0x10] sm:$0xff] %vm497_vm2, %v733_v12  ;;  %741 = vst.msk [vmem:[%s1436_s5 + $0x18] sm:$0xff] %vm497_vm2, %v734_v45 }
 0x17f   :  { %742 = vst.msk [vmem:[%s1436_s5 + $0x20] sm:$0xff] %vm497_vm2, %v735_v13  ;;  %743 = vst.msk [vmem:[%s1436_s5 + $0x28] sm:$0xff] %vm497_vm2, %v736_v15 }
 0x180   :  { %744 = vst.msk [vmem:[%s1436_s5 + $0x30] sm:$0x3] %vm509_vm3, %v737_v16 }

// kernel: convnet_forward.5
= control target key start
LH: loop header
LB: loop body
LE: loop exit
PB: predicated region body
PF: predicated region fallthrough
CT: control target
= control target key end

     0   :  { %v453_v1 = vmov 0   ;;  %v454_v3 = vmov 0.0   ;;  %v73_v5 = vlaneseq  ;;  %v455_v8 = vmov 1966171168   ;;  %s581_s0 = inlined_call_operand.vmem [shape: bf16[2,200], index: 0, kind: input, shape index: {}]   ;;  %s582_s1 = inlined_call_operand.vmem [shape: bf16[200,32], index: 1, kind: input, shape index: {}]   ;;  %s583_s2 = inlined_call_operand.vmem [shape: f32[1,32], index: 2, kind: input, shape index: {}, may-alias: {2,4}]   ;;  %s584_s3 = inlined_call_operand.vmem [shape: bf16[32,32], index: 3, kind: input, shape index: {}]   ;;  %s585_s4 = inlined_call_operand.vmem [shape: f32[1,32], index: 4, kind: input, shape index: {}, may-alias: {2,4}]   ;;  %s586_s5 = inlined_call_operand.vmem [shape: bf16[32,5], index: 5, kind: input, shape index: {}]   ;;  %s587_s6 = inlined_call_operand.vmem [shape: f32[1,5], index: 6, kind: input, shape index: {}]   ;;  %s588_s7 = inlined_call_operand.hbm [shape: f32[2,5], index: 7, kind: output, shape index: {}]  }
   0x1   :  { %v412_v0 = vld [vmem:[%s582_s1] sm:$0xff]   ;;  %168 = vmatprep.subr.bf16.mxu0 %v453_v1  ;;  %v413_v2 = vld [vmem:[%s582_s1 + $0x8] sm:$0xff]   ;;  %391 = vmatprep.subr.bf16.mxu1 %v454_v3  ;;  %v414_v4 = vld [vmem:[%s582_s1 + $0x10] sm:$0xff]   ;;  %v71_v9 = vunpack.c.l.s4 %v455_v8 }
   0x2   :  { %169 = vmatpush1.bf16.msra.mxu0 %v412_v0  ;;  %v415_v6 = vld [vmem:[%s582_s1 + $0x18] sm:$0xff]   ;;  %v362_v7 = vld.sshfl [vmem:[%s581_s0] sm:$0x11 pattern:$0x75316420]  ;;  %v74_v10 = vshrl.u32 %v73_v5, 7 }
   0x3   :  { %170 = vmatprep.subr.bf16.mxu0 %v453_v1  ;;  %v416_v11 = vld [vmem:[%s582_s1 + $0x20] sm:$0xff]   ;;  %v69_v12 = vcombine.high %v362_v7, %v362_v7  ;;  %v72_v13 = vunpack.c.0.s8 %v71_v9 }
   0x5   :  { %v75_v14 = vsub.s32 %v72_v13, %v74_v10 }
   0x6   :  { %171 = vmatpush1.bf16.msra.mxu0 %v413_v2 }
   0x7   :  { %172 = vmatprep.subr.bf16.mxu0 %v453_v1 }
   0xa   :  { %173 = vmatpush1.bf16.msra.mxu0 %v414_v4 }
   0xb   :  { %174 = vmatprep.subr.bf16.mxu0 %v453_v1 }
   0xe   :  { %175 = vmatpush1.bf16.msra.mxu0 %v415_v6 }
   0xf   :  { %176 = vmatprep.subr.bf16.mxu0 %v453_v1 }
  0x10   :  { %12 = vsyncpa [#allocation3], 0  ;;  %v417_v15 = vld [vmem:[%s582_s1 + $0x28] sm:$0xff]   ;;  %vm160_vm0 = vcmask 588800   ;;  %v83_v16 = vrot.slane %v69_v12, %v75_v14  ;;  %v418_v17 = vld [vmem:[%s582_s1 + $0x30] sm:$0xff]   ;;  %vm164_vm1 = vcmask 1043456   ;;  %v76_v25 = vrot.slane %v362_v7, %v75_v14 }
  0x11   :  { %v419_v18 = vld [vmem:[%s582_s1 + $0x38] sm:$0xff]   ;;  %v420_v19 = vld [vmem:[%s582_s1 + $0x40] sm:$0xff]   ;;  %v421_v20 = vld [vmem:[%s582_s1 + $0x48] sm:$0xff]   ;;  %vm456_vm2 = vmmov 0   ;;  %vm233_vm3 = vcmask 261120   ;;  %s457_s15 = smov [#allocation2]  }
  0x12   :  { %177 = vmatpush1.bf16.msra.mxu0 %v416_v11  ;;  %376 = vmatprep.mubr.msk.bf16.mxu0 %vm160_vm0, %v83_v16  ;;  %v422_v21 = vld [vmem:[%s582_s1 + $0x50] sm:$0xff]   ;;  %v423_v22 = vld [vmem:[%s582_s1 + $0x58] sm:$0xff]   ;;  %v424_v23 = vld [vmem:[%s582_s1 + $0x60] ss:$0 sps:$4 sm:$0xff]   ;;  %vm345_vm4 = vcmask 33792  }
  0x13   :  { %178 = vmatprep.subr.bf16.mxu0 %v453_v1  ;;  %v166_v24 = vsel %vm164_vm1, %v424_v23, 0  ;;  %v425_v26 = vld [vmem:[%s584_s3] sm:$0xff]   ;;  %v426_v27 = vld [vmem:[%s584_s3 + $0x8] sm:$0xff]   ;;  %395 = vmatprep.mubr.msk.bf16.mxu1 %vm456_vm2, %v454_v3 }
  0x14   :  { %392 = vmatpush3.bf16.msra.mxu1 %v425_v26  ;;  %v361_v28 = vld [vmem:[%s583_s2] ss:$0 sm:$0xff]  ;;  %v428_v37 = vld [vmem:[%s586_s5 + $0x8] sm:$0xff]  }
  0x15   :  { %393 = vmatprep.subr.bf16.mxu1 %v454_v3  ;;  %v427_v35 = vld [vmem:[%s586_s5] sm:$0xff]   ;;  %s353_s5 = sshll.u32 %s457_s15, 4  ;;  %s354_s5 = int_to_ptr.vmem [resolvable:$true] %s353_s5 }
  0x16   :  { %179 = vmatpush1.bf16.msra.mxu0 %v417_v15  ;;  %v377_v38 = vld [vmem:[%s585_s4] ss:$0 sm:$0xff]  ;;  %s429_s4 = scalar_lea.vmem %s354_s5, 32  ;;  %p434_p1 = scmp.lt.s32.totalorder %s354_s5, %s354_s5 }
  0x17   :  { %180 = vmatprep.subr.bf16.mxu0 %v453_v1  ;;  %v381_v46 = vld [vmem:[%s587_s6] ss:$0 sm:$0xff]  ;;  %p430_p0 = scmp.ne.s32.totalorder %s354_s5, %s429_s4  ;;  %p435_p2 = scmp.lt.s32.totalorder %s429_s4, %s429_s4 }
  0x18   :  { %394 = vmatpush3.bf16.msra.mxu1 %v426_v27 }
  0x19   :  { %399 = vmatprep.subr.bf16.mxu1 %v454_v3  ;;  %p436_p3 = por %p435_p2, %p434_p1 }
  0x1a   :  { %181 = vmatpush1.bf16.msra.mxu0 %v418_v17 }
  0x1b   :  { %182 = vmatprep.subr.bf16.mxu0 %v453_v1  ;;  %p437_p4 = pnand %p436_p3, %p430_p0 }
  0x1e   :  { %183 = vmatpush1.bf16.msra.mxu0 %v419_v18 }
  0x1f   :  { %184 = vmatprep.subr.bf16.mxu0 %v453_v1 }
  0x22   :  { %185 = vmatpush1.bf16.msra.mxu0 %v420_v19 }
  0x23   :  { %186 = vmatprep.subr.bf16.mxu0 %v453_v1 }
  0x26   :  { %187 = vmatpush1.bf16.msra.mxu0 %v421_v20 }
  0x27   :  { %188 = vmatprep.subr.bf16.mxu0 %v453_v1 }
  0x2a   :  { %189 = vmatpush1.bf16.msra.mxu0 %v422_v21 }
  0x2b   :  { %190 = vmatprep.subr.bf16.mxu0 %v453_v1 }
  0x2e   :  { %191 = vmatpush1.bf16.msra.mxu0 %v423_v22 }
  0x2f   :  { %192 = vmatprep.subr.bf16.mxu0 %v453_v1 }
  0x32   :  { %193 = vmatpush1.bf16.msra.mxu0 %v166_v24 }
  0x35   :  { %201 = vmatmul.mubr.bf16.vlgmr.msra.gmra.mrb[0].mxu0 %v76_v25 }
 0x108   :  { %v202_v29 = vpop.f32.mrb[0].mxu0 }
 0x109   :  { %v203_v30 = vadd.f32 %v361_v28, %v202_v29  ;;  %v204_v31 = vpop.f32.mrb[1].mxu0 }
 0x10a   :  { %v205_v32 = vpop.f32.mrb[2].mxu0 }
 0x10b   :  { %v208_v33 = vmax.f32 %v203_v30, 0.0  ;;  %v206_v34 = vpop.f32.mrb[3].mxu0 }
 0x10d   :  { %v209_v36 = vpack.c.bf16 %v208_v33, %v208_v33 }
 0x10f   :  { %396 = vmatmul.mubr.msk.bf16.vlgmr.msra.gmra.mrb[0].mxu1 %vm233_vm3, %v209_v36 }
 0x110   :  { %400 = vmatpush3.bf16.msra.mxu1 %v427_v35  ;;  %403 = vmatprep.mubr.msk.bf16.mxu1 %vm456_vm2, %v454_v3 }
 0x111   :  { %401 = vmatprep.subr.bf16.mxu1 %v454_v3 }
 0x114   :  { %402 = vmatpush3.bf16.msra.mxu1 %v428_v37 }
 0x1e2   :  { %v271_v39 = vpop.f32.mrb[0].mxu1 }
 0x1e3   :  { %v272_v40 = vadd.f32 %v377_v38, %v271_v39  ;;  %v397_v41 = vpop.f32.mrb[1].mxu1 }
 0x1e4   :  { %v274_v42 = vpop.f32.mrb[2].mxu1 }
 0x1e5   :  { %v277_v43 = vmax.f32 %v272_v40, 0.0  ;;  %v398_v44 = vpop.f32.mrb[3].mxu1 }
 0x1e7   :  { %v278_v45 = vpack.c.bf16 %v277_v43, %v277_v43 }
 0x1e9   :  { %404 = vmatmul.mubr.msk.bf16.vlgmr.msra.gmra.mrb[4].mxu1 %vm233_vm3, %v278_v45 }
 0x2bc   :  { %v339_v47 = vpop.f32.mrb[4].mxu1 }
 0x2bd   :  { %v340_v48 = vadd.f32 %v381_v46, %v339_v47  ;;  %v405_v49 = vpop.f32.mrb[5].mxu1 }
 0x2be   :  { %v342_v50 = vpop.f32.mrb[6].mxu1 }
 0x2bf   :  { %v406_v51 = vpop.f32.mrb[7].mxu1  ;;  %346 = vst.msk [vmem:[#allocation2] sm:$0x3] %vm345_vm4, %v340_v48 }
 0x2c0   :  { %440 = shalt.err (!%p437_p4)
}
 0x2c1   :  { %s441_s6 = scalar_lea.hbm %s588_s7, 32 }
 0x2c2   :  { %p442_p5 = scmp.ne.s32.totalorder %s588_s7, %s441_s6  ;;  %p445_p6 = scmp.lt.u32.totalorder %s441_s6, %s588_s7 }
 0x2c4   :  { %p447_p7 = pnand %p445_p6, %p442_p5 }
 0x2c6   :  { %450 = shalt.err (!%p447_p7)
}
 0x2c7   :  { %356 = dma.vmem_to_hbm [thread:$0]  %s354_s5, 32, %s588_s7, [#allocation3]  }
 0x2c8   :  { %451 = dma.done.wait [#allocation3], 32  }
 0x2c9   :  { %452 = vsyncadd [#allocation3], 4294967264 }
 0x2ca   :  { %360 = vsyncpa [#allocation3], 1 }

</bundles_post_ra>
